<compile_context>
chip_gen: v7x
topology: tpu7x:2x2x1
jax: 0.10.0
libtpu: 0.0.40
codegen_flags: <defaults>
</compile_context>

<pallas_src>
import functools

import jax
import jax.numpy as jnp
from jax import lax
from jax.experimental import pallas as pl
from jax.experimental.pallas import tpu as pltpu


def _round_up(x, m):
    return (x + m - 1) // m * m


def _corblock_z_kernel(x_ref, w_ref, b_ref, o_ref, conv_sc, vmax_sc,
                       *, H, W, KH, KW, cin_p, cout_p, Hout, Wout):
    """One batch element: conv(+bias) -> ReLU -> 3x3/s2/p1 max-pool.

    x_ref   : (1, H+KH-1, W+KW-1, cin_p)   zero-padded input image (bf16)
    w_ref   : (KH*KW, cin_p, cout_p)       conv weights (bf16)
    b_ref   : (1, cout_p)                  bias (f32)
    o_ref   : (1, Hout, Wout, cout_p)      pooled output (f32)
    conv_sc : (H+2, W+2, cout_p) f32       ReLU(conv)+bias with a zero ring
                                           (valid -inf stand-in post-ReLU)
    vmax_sc : (Hout, W+2, cout_p) f32      vertically pooled rows
    """
    # Zero the scratch every step (provides the zero ring; re-done per step so
    # the batch grid axis can be safely megacore-parallel).
    conv_sc[...] = jnp.zeros_like(conv_sc)

    # ---- convolution: KH*KW whole-image MXU matmuls, f32 accumulation -------
    # Bias broadcast hoisted: accumulator starts at the broadcast bias.
    acc = jnp.broadcast_to(b_ref[...].astype(jnp.float32), (H * W, cout_p))
    for idx in range(KH * KW):                      # 9 static iterations
        kh, kw = idx // KW, idx % KW
        xwin = x_ref[0, kh:kh + H, kw:kw + W, :].reshape(H * W, cin_p)
        acc = acc + jnp.dot(xwin, w_ref[idx],
                            preferred_element_type=jnp.float32)
    relu = jnp.maximum(acc, 0.0).reshape(H, W, cout_p)
    conv_sc[1:H + 1, 1:W + 1, :] = relu             # interior write, ring stays 0

    # ---- max pool: kernel 3, stride 2, padding 1 -----------------------------
    # Vertical: shifted-window max over rows 2i, 2i+1, 2i+2 via strided reads.
    v = jnp.maximum(
        jnp.maximum(conv_sc[pl.ds(0, Hout, stride=2), :, :],
                    conv_sc[pl.ds(1, Hout, stride=2), :, :]),
        conv_sc[pl.ds(2, Hout, stride=2), :, :])            # (Hout, W+2, cout_p)
    vmax_sc[...] = v
    # Horizontal: shifted-window max over columns 2j, 2j+1, 2j+2.
    pooled = jnp.maximum(
        jnp.maximum(vmax_sc[:, pl.ds(0, Wout, stride=2), :],
                    vmax_sc[:, pl.ds(1, Wout, stride=2), :]),
        vmax_sc[:, pl.ds(2, Wout, stride=2), :])            # (Hout, Wout, cout_p)

    o_ref[0, :, :, :] = pooled.astype(o_ref.dtype)  # one lane-dense block store


def corblock_z_forward(x_nchw, w_oihw, bias, *, kernel_size=3, stride=1,
                       compute_dtype=jnp.bfloat16):
    # TODO(synk): CORnet-Z's V1 block (7x7 conv, stride 2) is not covered here;
    # CORBlockZ's default (kernel=3, stride=1) path only.
    assert stride == 1, "CORBlockZ default stride=1 implemented"
    N, cin, H, W = x_nchw.shape
    cout = w_oihw.shape[0]
    KH = KW = kernel_size
    pad = kernel_size // 2

    cin_p = max(128, _round_up(cin, 128))           # lane-pad channels
    cout_p = max(128, _round_up(cout, 128))

    # ---- glue: layout conversion + spatial/channel zero padding --------------
    x = jnp.transpose(x_nchw, (0, 2, 3, 1))                     # NHWC
    x = jnp.pad(x, ((0, 0), (pad, pad), (pad, pad), (0, cin_p - cin)))
    x = x.astype(compute_dtype)                                 # bf16 matmul operand
    w = jnp.transpose(w_oihw, (2, 3, 1, 0))                     # HWIO
    w = jnp.pad(w, ((0, 0), (0, 0), (0, cin_p - cin), (0, cout_p - cout)))
    w = w.reshape(KH * KW, cin_p, cout_p).astype(compute_dtype)
    b = jnp.pad(bias, (0, cout_p - cout)).reshape(1, cout_p).astype(jnp.float32)

    Hc, Wc = H, W                                               # 'same' conv
    Hout = (Hc + 2 * 1 - 3) // 2 + 1
    Wout = (Wc + 2 * 1 - 3) // 2 + 1
    Hp, Wp = Hc + KH - 1, Wc + KW - 1

    kernel = functools.partial(_corblock_z_kernel, H=Hc, W=Wc, KH=KH, KW=KW,
                               cin_p=cin_p, cout_p=cout_p, Hout=Hout, Wout=Wout)

    # VMEM budget (double-buffered blocks + scratch); only override the default
    # scoped limit when the estimate actually needs it.
    itemsize = jnp.dtype(compute_dtype).itemsize
    vmem_est = (2 * Hp * Wp * cin_p * itemsize
                + 2 * KH * KW * cin_p * cout_p * itemsize
                + 2 * cout_p * 4
                + 2 * Hout * Wout * cout_p * 4
                + (Hc + 2) * (Wc + 2) * cout_p * 4
                + Hout * (Wc + 2) * cout_p * 4)
    vmem_limit = min(int(vmem_est * 1.5) + (4 << 20), 112 << 20)
    compiler_params = pltpu.CompilerParams(
        dimension_semantics=("parallel",),          # batch-independent -> megacore
        vmem_limit_bytes=vmem_limit if vmem_limit > (16 << 20) else None,
    )
    # TODO(synk): for real CORnet-Z spatial sizes (H,W up to 224) add a row-tile
    # grid axis with a 2-row halo so the scratch stays inside v7x's 64 MiB VMEM.

    cost = pl.CostEstimate(
        flops=2 * N * KH * KW * Hc * Wc * cin_p * cout_p,
        transcendentals=0,
        bytes_accessed=int(x.size * itemsize + w.size * itemsize
                           + N * Hout * Wout * cout_p * 4),
    )

    out_nhwc = pl.pallas_call(
        kernel,
        out_shape=jax.ShapeDtypeStruct((N, Hout, Wout, cout_p), jnp.float32),
        grid_spec=pltpu.PrefetchScalarGridSpec(
            num_scalar_prefetch=0,
            grid=(N,),
            in_specs=[
                pl.BlockSpec((1, Hp, Wp, cin_p), lambda n: (n, 0, 0, 0)),
                pl.BlockSpec((KH * KW, cin_p, cout_p), lambda n: (0, 0, 0)),
                pl.BlockSpec((1, cout_p), lambda n: (0, 0)),
            ],
            out_specs=pl.BlockSpec((1, Hout, Wout, cout_p),
                                   lambda n: (n, 0, 0, 0)),
            scratch_shapes=[
                pltpu.VMEM((Hc + 2, Wc + 2, cout_p), jnp.float32),
                pltpu.VMEM((Hout, Wc + 2, cout_p), jnp.float32),
            ],
        ),
        compiler_params=compiler_params,
        cost_estimate=cost,
    )(x, w, b)

    out_nhwc = out_nhwc[..., :cout]                             # strip lane pad
    return jnp.transpose(out_nhwc, (0, 3, 1, 2))                # back to NCHW


def corblock_z_reference(x_nchw, w_oihw, bias, compute_dtype=jnp.bfloat16):
    """Pure-JAX reference (torch Conv2d + ReLU + MaxPool2d), with the same
    bf16 rounding of the matmul operands that the kernel applies."""
    xr = x_nchw.astype(compute_dtype).astype(jnp.float32)
    wr = w_oihw.astype(compute_dtype).astype(jnp.float32)
    y = lax.conv_general_dilated(xr, wr, (1, 1), [(1, 1), (1, 1)],
                                 dimension_numbers=("NCHW", "OIHW", "NCHW"))
    y = jnp.maximum(y + bias.reshape(1, -1, 1, 1), 0.0)
    return lax.reduce_window(y, -jnp.inf, lax.max,
                             (1, 1, 3, 3), (1, 1, 2, 2),
                             [(0, 0), (0, 0), (1, 1), (1, 1)])


if __name__ == "__main__":
    key = jax.random.PRNGKey(0)
    kx, kw, kb = jax.random.split(key, 3)

    # Small shapes consistent with CORBlockZ(in_channels=4, out_channels=8).
    N, cin, cout, H, W = 2, 4, 8, 16, 16
    x = jax.random.normal(kx, (N, cin, H, W), jnp.float32)
    conv_w = jax.random.normal(kw, (cout, cin, 3, 3), jnp.float32) * 0.1
    conv_b = jax.random.normal(kb, (cout,), jnp.float32) * 0.1

    out = jax.block_until_ready(corblock_z_forward(x, conv_w, conv_b))
    ref = jax.block_until_ready(corblock_z_reference(x, conv_w, conv_b))

    assert out.shape == (N, cout, 8, 8), out.shape
    err = float(jnp.max(jnp.abs(out - ref)))
    assert jnp.allclose(out, ref, atol=1e-3, rtol=1e-3), err
    print("KERNEL_OK")
</pallas_src>

<mosaic_0001>
module attributes {stable_mosaic.version = 11 : i64} {
  func.func @_corblock_z_kernel(%arg0: i32, %arg1: memref<1x18x18x128xbf16, #tpu.memory_space<vmem>>, %arg2: memref<9x128x128xbf16, #tpu.memory_space<vmem>>, %arg3: memref<1x128xf32, #tpu.memory_space<vmem>>, %arg4: memref<1x8x8x128xf32, #tpu.memory_space<vmem>>, %arg5: memref<18x18x128xf32, #tpu.memory_space<vmem>>, %arg6: memref<8x18x128xf32, #tpu.memory_space<vmem>>) attributes {dimension_semantics = [#tpu.dimension_semantics<parallel>], iteration_bounds = array<i64: 2>, scalar_prefetch = 0 : i64, scratch_operands = 2 : i64, tpu.core_type = #tpu.core_type<tc>, window_params = [{transform_indices = @transform_0, window_bounds = array<i64: 1, 18, 18, 128>}, {pipeline_mode = #tpu.pipeline_mode<synchronous>, transform_indices = @transform_1, window_bounds = array<i64: 9, 128, 128>}, {pipeline_mode = #tpu.pipeline_mode<synchronous>, transform_indices = @transform_2, window_bounds = array<i64: 1, 128>}, {transform_indices = @transform_3, window_bounds = array<i64: 1, 8, 8, 128>}]} {
    %cst = arith.constant 0.000000e+00 : f32
    %0 = vector.broadcast %cst : f32 to vector<18x18x128xf32>
    %c0 = arith.constant 0 : index
    %c0_0 = arith.constant 0 : index
    %c0_1 = arith.constant 0 : index
    %1 = vector.load %arg5[%c0, %c0_0, %c0_1] : memref<18x18x128xf32, #tpu.memory_space<vmem>>, vector<18x18x128xf32>
    tpu.vector_store %arg5[%c0, %c0_0, %c0_1], %0 {strides = array<i32>} : memref<18x18x128xf32, #tpu.memory_space<vmem>>, vector<18x18x128xf32>,
    %c0_2 = arith.constant 0 : index
    %c0_3 = arith.constant 0 : index
    %2 = vector.load %arg3[%c0_2, %c0_3] : memref<1x128xf32, #tpu.memory_space<vmem>>, vector<1x128xf32>
    %3 = vector.shape_cast %2 : vector<1x128xf32> to vector<1x128xf32>
    %4 = vector.broadcast %3 : vector<1x128xf32> to vector<256x128xf32>
    %c0_4 = arith.constant 0 : index
    %c0_5 = arith.constant 0 : index
    %c0_6 = arith.constant 0 : index
    %c0_7 = arith.constant 0 : index
    %5 = vector.load %arg1[%c0_4, %c0_5, %c0_6, %c0_7] : memref<1x18x18x128xbf16, #tpu.memory_space<vmem>>, vector<1x16x16x128xbf16>
    %6 = vector.shape_cast %5 : vector<1x16x16x128xbf16> to vector<16x16x128xbf16>
    %7 = vector.shape_cast %6 : vector<16x16x128xbf16> to vector<256x128xbf16>
    %c0_8 = arith.constant 0 : index
    %c0_9 = arith.constant 0 : index
    %c0_10 = arith.constant 0 : index
    %8 = vector.load %arg2[%c0_8, %c0_9, %c0_10] : memref<9x128x128xbf16, #tpu.memory_space<vmem>>, vector<1x128x128xbf16>
    %9 = vector.shape_cast %8 : vector<1x128x128xbf16> to vector<128x128xbf16>
    %cst_11 = arith.constant dense<0.000000e+00> : vector<256x128xf32>
    %10 = tpu.matmul %7, %9, %cst_11 {dimension_numbers = #tpu.dot_dimension_numbers<[1], [0], [0], [1], [0, 0, 1, 1], [], []>} : vector<256x128xbf16>, vector<128x128xbf16>, vector<256x128xf32> -> vector<256x128xf32>
    %11 = arith.addf %4, %10 : vector<256x128xf32>
    %c0_12 = arith.constant 0 : index
    %c0_13 = arith.constant 0 : index
    %c1 = arith.constant 1 : index
    %c0_14 = arith.constant 0 : index
    %12 = vector.load %arg1[%c0_12, %c0_13, %c1, %c0_14] : memref<1x18x18x128xbf16, #tpu.memory_space<vmem>>, vector<1x16x16x128xbf16>
    %13 = vector.shape_cast %12 : vector<1x16x16x128xbf16> to vector<16x16x128xbf16>
    %14 = vector.shape_cast %13 : vector<16x16x128xbf16> to vector<256x128xbf16>
    %c1_15 = arith.constant 1 : index
    %c0_16 = arith.constant 0 : index
    %c0_17 = arith.constant 0 : index
    %15 = vector.load %arg2[%c1_15, %c0_16, %c0_17] : memref<9x128x128xbf16, #tpu.memory_space<vmem>>, vector<1x128x128xbf16>
    %16 = vector.shape_cast %15 : vector<1x128x128xbf16> to vector<128x128xbf16>
    %cst_18 = arith.constant dense<0.000000e+00> : vector<256x128xf32>
    %17 = tpu.matmul %14, %16, %cst_18 {dimension_numbers = #tpu.dot_dimension_numbers<[1], [0], [0], [1], [0, 0, 1, 1], [], []>} : vector<256x128xbf16>, vector<128x128xbf16>, vector<256x128xf32> -> vector<256x128xf32>
    %18 = arith.addf %11, %17 : vector<256x128xf32>
    %c0_19 = arith.constant 0 : index
    %c0_20 = arith.constant 0 : index
    %c2 = arith.constant 2 : index
    %c0_21 = arith.constant 0 : index
    %19 = vector.load %arg1[%c0_19, %c0_20, %c2, %c0_21] : memref<1x18x18x128xbf16, #tpu.memory_space<vmem>>, vector<1x16x16x128xbf16>
    %20 = vector.shape_cast %19 : vector<1x16x16x128xbf16> to vector<16x16x128xbf16>
    %21 = vector.shape_cast %20 : vector<16x16x128xbf16> to vector<256x128xbf16>
    %c2_22 = arith.constant 2 : index
    %c0_23 = arith.constant 0 : index
    %c0_24 = arith.constant 0 : index
    %22 = vector.load %arg2[%c2_22, %c0_23, %c0_24] : memref<9x128x128xbf16, #tpu.memory_space<vmem>>, vector<1x128x128xbf16>
    %23 = vector.shape_cast %22 : vector<1x128x128xbf16> to vector<128x128xbf16>
    %cst_25 = arith.constant dense<0.000000e+00> : vector<256x128xf32>
    %24 = tpu.matmul %21, %23, %cst_25 {dimension_numbers = #tpu.dot_dimension_numbers<[1], [0], [0], [1], [0, 0, 1, 1], [], []>} : vector<256x128xbf16>, vector<128x128xbf16>, vector<256x128xf32> -> vector<256x128xf32>
    %25 = arith.addf %18, %24 : vector<256x128xf32>
    %c0_26 = arith.constant 0 : index
    %c1_27 = arith.constant 1 : index
    %c0_28 = arith.constant 0 : index
    %c0_29 = arith.constant 0 : index
    %26 = vector.load %arg1[%c0_26, %c1_27, %c0_28, %c0_29] : memref<1x18x18x128xbf16, #tpu.memory_space<vmem>>, vector<1x16x16x128xbf16>
    %27 = vector.shape_cast %26 : vector<1x16x16x128xbf16> to vector<16x16x128xbf16>
    %28 = vector.shape_cast %27 : vector<16x16x128xbf16> to vector<256x128xbf16>
    %c3 = arith.constant 3 : index
    %c0_30 = arith.constant 0 : index
    %c0_31 = arith.constant 0 : index
    %29 = vector.load %arg2[%c3, %c0_30, %c0_31] : memref<9x128x128xbf16, #tpu.memory_space<vmem>>, vector<1x128x128xbf16>
    %30 = vector.shape_cast %29 : vector<1x128x128xbf16> to vector<128x128xbf16>
    %cst_32 = arith.constant dense<0.000000e+00> : vector<256x128xf32>
    %31 = tpu.matmul %28, %30, %cst_32 {dimension_numbers = #tpu.dot_dimension_numbers<[1], [0], [0], [1], [0, 0, 1, 1], [], []>} : vector<256x128xbf16>, vector<128x128xbf16>, vector<256x128xf32> -> vector<256x128xf32>
    %32 = arith.addf %25, %31 : vector<256x128xf32>
    %c0_33 = arith.constant 0 : index
    %c1_34 = arith.constant 1 : index
    %c1_35 = arith.constant 1 : index
    %c0_36 = arith.constant 0 : index
    %33 = vector.load %arg1[%c0_33, %c1_34, %c1_35, %c0_36] : memref<1x18x18x128xbf16, #tpu.memory_space<vmem>>, vector<1x16x16x128xbf16>
    %34 = vector.shape_cast %33 : vector<1x16x16x128xbf16> to vector<16x16x128xbf16>
    %35 = vector.shape_cast %34 : vector<16x16x128xbf16> to vector<256x128xbf16>
    %c4 = arith.constant 4 : index
    %c0_37 = arith.constant 0 : index
    %c0_38 = arith.constant 0 : index
    %36 = vector.load %arg2[%c4, %c0_37, %c0_38] : memref<9x128x128xbf16, #tpu.memory_space<vmem>>, vector<1x128x128xbf16>
    %37 = vector.shape_cast %36 : vector<1x128x128xbf16> to vector<128x128xbf16>
    %cst_39 = arith.constant dense<0.000000e+00> : vector<256x128xf32>
    %38 = tpu.matmul %35, %37, %cst_39 {dimension_numbers = #tpu.dot_dimension_numbers<[1], [0], [0], [1], [0, 0, 1, 1], [], []>} : vector<256x128xbf16>, vector<128x128xbf16>, vector<256x128xf32> -> vector<256x128xf32>
    %39 = arith.addf %32, %38 : vector<256x128xf32>
    %c0_40 = arith.constant 0 : index
    %c1_41 = arith.constant 1 : index
    %c2_42 = arith.constant 2 : index
    %c0_43 = arith.constant 0 : index
    %40 = vector.load %arg1[%c0_40, %c1_41, %c2_42, %c0_43] : memref<1x18x18x128xbf16, #tpu.memory_space<vmem>>, vector<1x16x16x128xbf16>
    %41 = vector.shape_cast %40 : vector<1x16x16x128xbf16> to vector<16x16x128xbf16>
    %42 = vector.shape_cast %41 : vector<16x16x128xbf16> to vector<256x128xbf16>
    %c5 = arith.constant 5 : index
    %c0_44 = arith.constant 0 : index
    %c0_45 = arith.constant 0 : index
    %43 = vector.load %arg2[%c5, %c0_44, %c0_45] : memref<9x128x128xbf16, #tpu.memory_space<vmem>>, vector<1x128x128xbf16>
    %44 = vector.shape_cast %43 : vector<1x128x128xbf16> to vector<128x128xbf16>
    %cst_46 = arith.constant dense<0.000000e+00> : vector<256x128xf32>
    %45 = tpu.matmul %42, %44, %cst_46 {dimension_numbers = #tpu.dot_dimension_numbers<[1], [0], [0], [1], [0, 0, 1, 1], [], []>} : vector<256x128xbf16>, vector<128x128xbf16>, vector<256x128xf32> -> vector<256x128xf32>
    %46 = arith.addf %39, %45 : vector<256x128xf32>
    %c0_47 = arith.constant 0 : index
    %c2_48 = arith.constant 2 : index
    %c0_49 = arith.constant 0 : index
    %c0_50 = arith.constant 0 : index
    %47 = vector.load %arg1[%c0_47, %c2_48, %c0_49, %c0_50] : memref<1x18x18x128xbf16, #tpu.memory_space<vmem>>, vector<1x16x16x128xbf16>
    %48 = vector.shape_cast %47 : vector<1x16x16x128xbf16> to vector<16x16x128xbf16>
    %49 = vector.shape_cast %48 : vector<16x16x128xbf16> to vector<256x128xbf16>
    %c6 = arith.constant 6 : index
    %c0_51 = arith.constant 0 : index
    %c0_52 = arith.constant 0 : index
    %50 = vector.load %arg2[%c6, %c0_51, %c0_52] : memref<9x128x128xbf16, #tpu.memory_space<vmem>>, vector<1x128x128xbf16>
    %51 = vector.shape_cast %50 : vector<1x128x128xbf16> to vector<128x128xbf16>
    %cst_53 = arith.constant dense<0.000000e+00> : vector<256x128xf32>
    %52 = tpu.matmul %49, %51, %cst_53 {dimension_numbers = #tpu.dot_dimension_numbers<[1], [0], [0], [1], [0, 0, 1, 1], [], []>} : vector<256x128xbf16>, vector<128x128xbf16>, vector<256x128xf32> -> vector<256x128xf32>
    %53 = arith.addf %46, %52 : vector<256x128xf32>
    %c0_54 = arith.constant 0 : index
    %c2_55 = arith.constant 2 : index
    %c1_56 = arith.constant 1 : index
    %c0_57 = arith.constant 0 : index
    %54 = vector.load %arg1[%c0_54, %c2_55, %c1_56, %c0_57] : memref<1x18x18x128xbf16, #tpu.memory_space<vmem>>, vector<1x16x16x128xbf16>
    %55 = vector.shape_cast %54 : vector<1x16x16x128xbf16> to vector<16x16x128xbf16>
    %56 = vector.shape_cast %55 : vector<16x16x128xbf16> to vector<256x128xbf16>
    %c7 = arith.constant 7 : index
    %c0_58 = arith.constant 0 : index
    %c0_59 = arith.constant 0 : index
    %57 = vector.load %arg2[%c7, %c0_58, %c0_59] : memref<9x128x128xbf16, #tpu.memory_space<vmem>>, vector<1x128x128xbf16>
    %58 = vector.shape_cast %57 : vector<1x128x128xbf16> to vector<128x128xbf16>
    %cst_60 = arith.constant dense<0.000000e+00> : vector<256x128xf32>
    %59 = tpu.matmul %56, %58, %cst_60 {dimension_numbers = #tpu.dot_dimension_numbers<[1], [0], [0], [1], [0, 0, 1, 1], [], []>} : vector<256x128xbf16>, vector<128x128xbf16>, vector<256x128xf32> -> vector<256x128xf32>
    %60 = arith.addf %53, %59 : vector<256x128xf32>
    %c0_61 = arith.constant 0 : index
    %c2_62 = arith.constant 2 : index
    %c2_63 = arith.constant 2 : index
    %c0_64 = arith.constant 0 : index
    %61 = vector.load %arg1[%c0_61, %c2_62, %c2_63, %c0_64] : memref<1x18x18x128xbf16, #tpu.memory_space<vmem>>, vector<1x16x16x128xbf16>
    %62 = vector.shape_cast %61 : vector<1x16x16x128xbf16> to vector<16x16x128xbf16>
    %63 = vector.shape_cast %62 : vector<16x16x128xbf16> to vector<256x128xbf16>
    %c8 = arith.constant 8 : index
    %c0_65 = arith.constant 0 : index
    %c0_66 = arith.constant 0 : index
    %64 = vector.load %arg2[%c8, %c0_65, %c0_66] : memref<9x128x128xbf16, #tpu.memory_space<vmem>>, vector<1x128x128xbf16>
    %65 = vector.shape_cast %64 : vector<1x128x128xbf16> to vector<128x128xbf16>
    %cst_67 = arith.constant dense<0.000000e+00> : vector<256x128xf32>
    %66 = tpu.matmul %63, %65, %cst_67 {dimension_numbers = #tpu.dot_dimension_numbers<[1], [0], [0], [1], [0, 0, 1, 1], [], []>} : vector<256x128xbf16>, vector<128x128xbf16>, vector<256x128xf32> -> vector<256x128xf32>
    %67 = arith.addf %60, %66 : vector<256x128xf32>
    %cst_68 = arith.constant 0.000000e+00 : f32
    %68 = vector.broadcast %cst_68 : f32 to vector<256x128xf32>
    %69 = arith.maximumf %67, %68 : vector<256x128xf32>
    %70 = vector.shape_cast %69 : vector<256x128xf32> to vector<16x16x128xf32>
    %c1_69 = arith.constant 1 : index
    %c1_70 = arith.constant 1 : index
    %c0_71 = arith.constant 0 : index
    %71 = vector.load %arg5[%c1_69, %c1_70, %c0_71] : memref<18x18x128xf32, #tpu.memory_space<vmem>>, vector<16x16x128xf32>
    tpu.vector_store %arg5[%c1_69, %c1_70, %c0_71], %70 {strides = array<i32>} : memref<18x18x128xf32, #tpu.memory_space<vmem>>, vector<16x16x128xf32>,
    %c0_72 = arith.constant 0 : index
    %c0_73 = arith.constant 0 : index
    %c0_74 = arith.constant 0 : index
    %72 = tpu.strided_load %arg5[%c0_72, %c0_73, %c0_74] {strides = array<i32: 2, 1, 1>} : memref<18x18x128xf32, #tpu.memory_space<vmem>>, vector<8x18x128xf32>
    %c1_75 = arith.constant 1 : index
    %c0_76 = arith.constant 0 : index
    %c0_77 = arith.constant 0 : index
    %73 = tpu.strided_load %arg5[%c1_75, %c0_76, %c0_77] {strides = array<i32: 2, 1, 1>} : memref<18x18x128xf32, #tpu.memory_space<vmem>>, vector<8x18x128xf32>
    %74 = arith.maximumf %72, %73 : vector<8x18x128xf32>
    %c2_78 = arith.constant 2 : index
    %c0_79 = arith.constant 0 : index
    %c0_80 = arith.constant 0 : index
    %75 = tpu.strided_load %arg5[%c2_78, %c0_79, %c0_80] {strides = array<i32: 2, 1, 1>} : memref<18x18x128xf32, #tpu.memory_space<vmem>>, vector<8x18x128xf32>
    %76 = arith.maximumf %74, %75 : vector<8x18x128xf32>
    %c0_81 = arith.constant 0 : index
    %c0_82 = arith.constant 0 : index
    %c0_83 = arith.constant 0 : index
    %77 = vector.load %arg6[%c0_81, %c0_82, %c0_83] : memref<8x18x128xf32, #tpu.memory_space<vmem>>, vector<8x18x128xf32>
    tpu.vector_store %arg6[%c0_81, %c0_82, %c0_83], %76 {strides = array<i32>} : memref<8x18x128xf32, #tpu.memory_space<vmem>>, vector<8x18x128xf32>,
    %c0_84 = arith.constant 0 : index
    %c0_85 = arith.constant 0 : index
    %c0_86 = arith.constant 0 : index
    %78 = tpu.strided_load %arg6[%c0_84, %c0_85, %c0_86] {strides = array<i32: 1, 2, 1>} : memref<8x18x128xf32, #tpu.memory_space<vmem>>, vector<8x8x128xf32>
    %c0_87 = arith.constant 0 : index
    %c1_88 = arith.constant 1 : index
    %c0_89 = arith.constant 0 : index
    %79 = tpu.strided_load %arg6[%c0_87, %c1_88, %c0_89] {strides = array<i32: 1, 2, 1>} : memref<8x18x128xf32, #tpu.memory_space<vmem>>, vector<8x8x128xf32>
    %80 = arith.maximumf %78, %79 : vector<8x8x128xf32>
    %c0_90 = arith.constant 0 : index
    %c2_91 = arith.constant 2 : index
    %c0_92 = arith.constant 0 : index
    %81 = tpu.strided_load %arg6[%c0_90, %c2_91, %c0_92] {strides = array<i32: 1, 2, 1>} : memref<8x18x128xf32, #tpu.memory_space<vmem>>, vector<8x8x128xf32>
    %82 = arith.maximumf %80, %81 : vector<8x8x128xf32>
    %c0_93 = arith.constant 0 : index
    %c0_94 = arith.constant 0 : index
    %c0_95 = arith.constant 0 : index
    %c0_96 = arith.constant 0 : index
    %83 = vector.load %arg4[%c0_93, %c0_94, %c0_95, %c0_96] : memref<1x8x8x128xf32, #tpu.memory_space<vmem>>, vector<1x8x8x128xf32>
    %84 = vector.shape_cast %83 : vector<1x8x8x128xf32> to vector<8x8x128xf32>
    %85 = vector.shape_cast %82 : vector<8x8x128xf32> to vector<1x8x8x128xf32>
    tpu.vector_store %arg4[%c0_93, %c0_94, %c0_95, %c0_96], %85 {strides = array<i32>} : memref<1x8x8x128xf32, #tpu.memory_space<vmem>>, vector<1x8x8x128xf32>,
    return
  }
  func.func @transform_0(%arg0: i32) -> (i32, i32, i32, i32) {
    %c0_i32 = arith.constant 0 : i32
    %c0_i32_0 = arith.constant 0 : i32
    %c0_i32_1 = arith.constant 0 : i32
    %c0_i32_2 = arith.constant 0 : i32
    return %arg0, %c0_i32, %c0_i32_0, %c0_i32_1 : i32, i32, i32, i32
  }
  func.func @transform_1(%arg0: i32) -> (i32, i32, i32) {
    %c0_i32 = arith.constant 0 : i32
    %c0_i32_0 = arith.constant 0 : i32
    %c0_i32_1 = arith.constant 0 : i32
    %c0_i32_2 = arith.constant 0 : i32
    return %c0_i32, %c0_i32_0, %c0_i32_1 : i32, i32, i32
  }
  func.func @transform_2(%arg0: i32) -> (i32, i32) {
    %c0_i32 = arith.constant 0 : i32
    %c0_i32_0 = arith.constant 0 : i32
    %c0_i32_1 = arith.constant 0 : i32
    return %c0_i32, %c0_i32_0 : i32, i32
  }
  func.func @transform_3(%arg0: i32) -> (i32, i32, i32, i32) {
    %c0_i32 = arith.constant 0 : i32
    %c0_i32_0 = arith.constant 0 : i32
    %c0_i32_1 = arith.constant 0 : i32
    %c0_i32_2 = arith.constant 0 : i32
    return %arg0, %c0_i32, %c0_i32_0, %c0_i32_1 : i32, i32, i32, i32
  }
}

</mosaic_0001>

<bundles_post_ra>
// kernel: tpu_custom_call.1
= control target key start
LH: loop header
LB: loop body
LE: loop exit
PB: predicated region body
PF: predicated region fallthrough
CT: control target
= control target key end

     0   :  { %8 = vsyncpa [#allocation5], 0  ;;  %s9004_s0 = inlined_call_operand.vmem [shape: bf16[2,18,18,128], index: 0, kind: input, shape index: {}]   ;;  %s9005_s1 = inlined_call_operand.vmem [shape: bf16[9,128,128], index: 1, kind: input, shape index: {}]   ;;  %s9006_s2 = inlined_call_operand.vmem [shape: f32[1,128], index: 2, kind: input, shape index: {}]   ;;  %s9007_s3 = inlined_call_operand.hbm [shape: f32[2,8,8,128], index: 3, kind: output, shape index: {}]  }
   0x1   :  { %10 = vsyncpa [#allocation5 + $0x1], 0  ;;  %s7339_s12 = smov 0   ;;  %s7341_s13 = smov 0  }
   0x2   :  { %s7343_s14 = smov 0   ;;  %s7345_s15 = smov 0  }
   0x3 LB: > { %s7360_s16 = sadd.s32 4294967295, %s7313_s15   ;;  %s5509_s17 = sadd.s32 4294967294, %s7313_s15   ;;  %s7313_s15 = sphi %s7345_s15, %s9017_s15   ;;  %s7309_s14 = sphi %s7343_s14, %s9016_s14   ;;  %s7305_s13 = sphi %s7341_s13, %s9015_s13   ;;  %s7301_s12 = sphi %s7339_s12, %s9014_s12  }
   0x4   : > { %s7364_s18 = sadd.s32 1, %s7313_s15   ;;  %s91_s19 = sadd.s32 1, %s7309_s14 }
   0x5   : > { %s88_s20 = ssub.s32 %s7313_s15, %s7364_s18  ;;  %p101_p0 = scmp.ne.s32.totalorder %s7309_s14, %s7305_s13 }
   0x6   : > { %p89_p1 = scmp.eq.s32.totalorder %s88_s20, 0  ;;  %p102_p2 = scmp.eq.s32.totalorder %s7360_s16, 1 }
   0x7   : > { %p107_p3 = scmp.ne.s32.totalorder %s7305_s13, %s7301_s12  ;;  %p108_p4 = scmp.eq.s32.totalorder %s5509_s17, 1 }
   0x8   : > { %s7375_s21 = scalar_select %p89_p1, %s7309_s14, %s91_s19  }
   0x9   : > { %p7377_p5 = por %p102_p2, %p101_p0  ;;  %p7381_p6 = por %p108_p4, %p107_p3 }
   0xa   : > { %p5512_p7 = scmp.ge.s32.totalorder %s7313_s15, 1  ;;  %p140_p8 = scmp.lt.s32.totalorder %s7313_s15, 3 }
   0xc   : > { %p141_p9 = pnand %p5512_p7, %p140_p8 }
   0xd   : > { %v7101_v0 = vld [vmem:[%s9005_s1] sm:$0xff] (!%p141_p9)   ;;  %v7103_v2 = vld [vmem:[%s9005_s1 + $0x8] sm:$0xff] (!%p141_p9)   ;;  %p164_p10 = scmp.lt.s32.totalorder (!%p141_p9), %s7360_s16, 1  ;;  %v7105_v4 = vld [vmem:[%s9005_s1 + $0x10] sm:$0xff] (!%p141_p9)   ;;  %vm664_vm0 = vsmask.f32 (!%p141_p9), 3328 }
   0xe   : > { %144 = sbr.rel (%p141_p9) target bundleno = 592 (0x250), region = 32  ;;  %v7102_v1 = vld [vmem:[%s9005_s1 + $0x100] sm:$0xff] (!%p141_p9)   ;;  %6322 = vmatprep.subr.bf16.mxu1 (!%p141_p9), %v7101_v0  ;;  %v7104_v3 = vld [vmem:[%s9005_s1 + $0x108] sm:$0xff] (!%p141_p9)   ;;  %v7106_v5 = vld [vmem:[%s9005_s1 + $0x110] sm:$0xff] (!%p141_p9)   ;;  %vm665_vm1 = vsmask.f32 (!%p141_p9), 7440 }
   0xf   : > { %6514 = vmatprep.subr.bf16.mxu0 (!%p141_p9), %v7102_v1  ;;  %6323 = vmatpush3.bf16.msra.mxu1 (!%p141_p9), %v7101_v0  ;;  %v7107_v6 = vld [vmem:[%s9005_s1 + $0x18] sm:$0xff] (!%p141_p9)   ;;  %v7109_v8 = vld [vmem:[%s9005_s1 + $0x20] sm:$0xff] (!%p141_p9)   ;;  %v7111_v10 = vld [vmem:[%s9005_s1 + $0x28] sm:$0xff] (!%p141_p9)   ;;  %vm1437_vm3 = vcmask (!%p141_p9), 1042432   ;;  %vm1438_vm4 = vcmask (!%p141_p9), 1046532   ;;  %s6105_s17 = sshll.u32 (!%p141_p9), %s7360_s16, 10 }
  0x10   : > { %6515 = vmatpush3.bf16.msra.mxu0 (!%p141_p9), %v7102_v1  ;;  %6324 = vmatprep.subr.bf16.mxu1 (!%p141_p9), %v7103_v2  ;;  %v7108_v7 = vld [vmem:[%s9005_s1 + $0x118] sm:$0xff] (!%p141_p9)   ;;  %v7110_v9 = vld [vmem:[%s9005_s1 + $0x120] sm:$0xff] (!%p141_p9)   ;;  %v7112_v12 = vld [vmem:[%s9005_s1 + $0x128] sm:$0xff] (!%p141_p9)   ;;  %s8956_s25 = scalar_lea.hbm (!%p141_p9), %s9007_s3, %s6105_s17  ;;  %s7316_s27 = smov (!%p141_p9), [#allocation4]  }
  0x11   : > { %6516 = vmatprep.subr.bf16.mxu0 (!%p141_p9), %v7104_v3  ;;  %v7113_v18 = vld [vmem:[%s9005_s1 + $0x30] sm:$0xff] (!%p141_p9)   ;;  %v7115_v28 = vld [vmem:[%s9005_s1 + $0x38] sm:$0xff] (!%p141_p9)   ;;  %vm7458_vm2 = vmor (!%p141_p9), %vm664_vm0, %vm665_vm1  ;;  %s7255_s28 = sshll.u32 (!%p141_p9), %s7316_s27, 4  ;;  %s7256_s28 = int_to_ptr.vmem [resolvable:$false] %s7255_s28 }
  0x12   : > { %v7114_v24 = vld [vmem:[%s9005_s1 + $0x130] sm:$0xff] (!%p141_p9)   ;;  %v7116_v32 = vld [vmem:[%s9005_s1 + $0x138] sm:$0xff] (!%p141_p9)   ;;  %v7119_v49 = vld [vmem:[%s9005_s1 + $0x40] sm:$0xff] (!%p141_p9)   ;;  %s7257_s29 = scalar_lea.vmem (!%p141_p9), %s7256_s28, 2048 }
  0x13   : > { %6325 = vmatpush3.bf16.msra.mxu1 (!%p141_p9), %v7103_v2  ;;  %v7120_v55 = vld [vmem:[%s9005_s1 + $0x140] sm:$0xff] (!%p141_p9)   ;;  %vm7606_vm5 = vmor (!%p141_p9), %vm1437_vm3, %vm1438_vm4 }
  0x14   : > { %6517 = vmatpush3.bf16.msra.mxu0 (!%p141_p9), %v7104_v3  ;;  %6326 = vmatprep.subr.bf16.mxu1 (!%p141_p9), %v7105_v4 }
  0x15   : > { %s165_s9 = scalar_select %p164_p10, %s7360_s16, 1  ;;  %6518 = vmatprep.subr.bf16.mxu0 %v7106_v5 }
  0x17   : > { %s7058_s20 = smul.u32 216, %s165_s9  ;;  %6327 = vmatpush3.bf16.msra.mxu1 %v7105_v4  ;;  %s161_s9 = sand.u32 1, %s7305_s13  }
  0x18   : > { %6519 = vmatpush3.bf16.msra.mxu0 %v7106_v5  ;;  %6328 = vmatprep.subr.bf16.mxu1 %v7107_v6  ;;  %s8923_s10 = sshll.u32 %s161_s9, 6  ;;  %s8963_s26 = scalar_lea.sflag [#allocation5], %s161_s9 }
  0x19   : > { %6520 = vmatprep.subr.bf16.mxu0 %v7108_v7  ;;  %s7422_s30 = scalar_lea.vmem %s9004_s0, %s7058_s20  ;;  %s8930_s11 = scalar_lea.vmem [#allocation4], %s8923_s10 }
  0x1a   : > { %v7117_v11 = vld [vmem:[%s7422_s30] sm:$0xff]   ;;  %v5708_v13 = vld [vmem:[%s7422_s30 + $0xc] sm:$0xf]  ;;  %v7433_v14 = vld [vmem:[%s7422_s30 + $0x10] sm:$0xf]  ;;  %s5447_s19 = sshll.u32 %s8930_s11, 4  ;;  %s8958_s19 = int_to_ptr.vmem [resolvable:$true] %s5447_s19 }
  0x1b   : > { %6329 = vmatpush3.bf16.msra.mxu1 %v7107_v6  ;;  %6338 = vmatprep.mubr.bf16.mxu1 %v7117_v11  ;;  %v7436_v15 = vld [vmem:[%s7422_s30 + $0x14] sm:$0x1]  ;;  %v2310_v16 = vshrl.u32 %v5708_v13, 16  ;;  %v2313_v17 = vshll.u32 %v5708_v13, 16  ;;  %v2319_v19 = vshll.u32 %v7433_v14, 16  ;;  %v2323_v20 = vshrl.u32 %v7433_v14, 16  ;;  %p7258_p0 = scmp.lt.s32.totalorder %s8958_s19, %s7256_s28 }
  0x1c   : > { %6521 = vmatpush3.bf16.msra.mxu0 %v7108_v7  ;;  %6330 = vmatprep.subr.bf16.mxu1 %v7109_v8  ;;  %v2329_v21 = vshll.u32 %v7436_v15, 16  ;;  %v5711_v30 = vld [vmem:[%s7422_s30 + $0x18] sm:$0xf]  ;;  %v7452_v31 = vld [vmem:[%s7422_s30 + $0x1c] sm:$0xf]  ;;  %v3084_v48 = vrot.slane %v7436_v15, 5 }
  0x1d   : > { %6522 = vmatprep.subr.bf16.mxu0 %v7110_v9  ;;  %v2312_v22 = vrot.slane %v2310_v16, 4  ;;  %v2315_v23 = vrot.slane %v2313_v17, 5  ;;  %v2321_v25 = vrot.slane %v2319_v19, 5  ;;  %v2325_v26 = vrot.slane %v2323_v20, 4  ;;  %v7463_v35 = vld [vmem:[%s7422_s30 + $0x20] sm:$0x1] }
  0x1e   : > { %v2331_v27 = vrot.slane %v2329_v21, 5  ;;  %v2334_v36 = vshrl.u32 %v5711_v30, 16  ;;  %v2337_v37 = vshll.u32 %v5711_v30, 16  ;;  %v2343_v38 = vshll.u32 %v7452_v31, 16  ;;  %v7118_v57 = vld [vmem:[%s7422_s30 + $0xc] sm:$0xff]   ;;  %v7122_v3 = vld [vmem:[%s7422_s30 + $0x18] sm:$0xff]  }
  0x1f   : > { %6331 = vmatpush3.bf16.msra.mxu1 %v7109_v8  ;;  %v2316_v29 = vor.u32 %v2315_v23, %v2312_v22  ;;  %v2326_v34 = vor.u32 %v2325_v26, %v2321_v25  ;;  %v2347_v40 = vshrl.u32 %v7452_v31, 16  ;;  %v2353_v41 = vshll.u32 %v7463_v35, 16  ;;  %v5714_v59 = vld [vmem:[%s7422_s30 + $0x24] sm:$0xf]  ;;  %v7487_v60 = vld [vmem:[%s7422_s30 + $0x28] sm:$0xf] }
  0x20   : > { %6523 = vmatpush3.bf16.msra.mxu0 %v7110_v9  ;;  %6332 = vmatprep.subr.bf16.mxu1 %v7111_v10  ;;  %v3088_v42 = vrot.slane %v7452_v31, 5  ;;  %v2336_v44 = vrot.slane %v2334_v36, 4  ;;  %v2339_v45 = vrot.slane %v2337_v37, 5  ;;  %v2345_v46 = vrot.slane %v2343_v38, 5  ;;  %v7490_v62 = vld [vmem:[%s7422_s30 + $0x2c] sm:$0x1] }
  0x21   : > { %6524 = vmatprep.subr.bf16.mxu0 %v7112_v12  ;;  %v2317_v39 = vrot.slane %v2316_v29, 4  ;;  %v2327_v43 = vrot.slane %v2326_v34, 4  ;;  %v2349_v50 = vrot.slane %v2347_v40, 4  ;;  %v2355_v53 = vrot.slane %v2353_v41, 5  ;;  %v7121_v7 = vld [vmem:[%s9005_s1 + $0x148] sm:$0xff]   ;;  %v7125_v29 = vld [vmem:[%s9005_s1 + $0x150] sm:$0xff]  }
  0x22   : > { %v2340_v52 = vor.u32 %v2339_v45, %v2336_v44  ;;  %v7479_v54 = vrot.slane %v3088_v42, 4  ;;  %v2358_v63 = vshrl.u32 %v5714_v59, 16  ;;  %v2361_v0 = vshll.u32 %v5714_v59, 16  ;;  %v7124_v11 = vld [vmem:[%s9005_s1 + $0x48] sm:$0xff]   ;;  %v5717_v19 = vld [vmem:[%s7422_s30 + $0x30] sm:$0xf] }
  0x23   : > { %6333 = vmatpush3.bf16.msra.mxu1 %v7111_v10  ;;  %v2322_v47 = vsel %vm7458_vm2, %v2317_v39, %v2321_v25  ;;  %v2332_v51 = vsel %vm7458_vm2, %v2327_v43, %v2331_v27  ;;  %v2350_v58 = vor.u32 %v2349_v50, %v2345_v46  ;;  %v2367_v1 = vshll.u32 %v7487_v60, 16  ;;  %v7508_v20 = vld [vmem:[%s7422_s30 + $0x34] sm:$0xf]  ;;  %v7511_v21 = vld [vmem:[%s7422_s30 + $0x38] sm:$0x1]  ;;  %v7143_v15 = vld [vmem:[%s9005_s1 + $0x68] sm:$0xff]  }
  0x24   : > { %6525 = vmatpush3.bf16.msra.mxu0 %v7112_v12  ;;  %6334 = vmatprep.subr.bf16.mxu1 %v7113_v18  ;;  %v5772_v56 = vcombine.low %v2322_v47, %v2332_v51  ;;  %v2341_v61 = vrot.slane %v2340_v52, 4  ;;  %v2371_v4 = vshrl.u32 %v7487_v60, 16  ;;  %v2377_v5 = vshll.u32 %v7490_v62, 16  ;;  %v7127_v41 = vld [vmem:[%s7422_s30 + $0x30] sm:$0xff]   ;;  %v5720_v45 = vld [vmem:[%s7422_s30 + $0x3c] sm:$0xf] }
  0x25   : > { %6526 = vmatprep.subr.bf16.mxu0 %v7114_v24  ;;  %v2351_v2 = vrot.slane %v2350_v58, 4  ;;  %v2360_v8 = vrot.slane %v2358_v63, 4  ;;  %v2363_v9 = vrot.slane %v2361_v0, 5  ;;  %v2369_v10 = vrot.slane %v2367_v1, 5  ;;  %v7530_v50 = vld [vmem:[%s7422_s30 + $0x44] sm:$0x1] }
  0x26   : > { %6530 = vmatprep.mubr.bf16.mxu0 %v5772_v56  ;;  %v2346_v6 = vsel %vm7458_vm2, %v2341_v61, %v2345_v46  ;;  %v2373_v13 = vrot.slane %v2371_v4, 4  ;;  %v2379_v16 = vrot.slane %v2377_v5, 5  ;;  %v2382_v23 = vshrl.u32 %v5717_v19, 16  ;;  %v7527_v46 = vld [vmem:[%s7422_s30 + $0x40] sm:$0xf]  ;;  %v7126_v59 = vld [vmem:[%s9005_s1 + $0x158] sm:$0xff]  }
  0x27   : > { %6335 = vmatpush3.bf16.msra.mxu1 %v7113_v18  ;;  %v2356_v12 = vsel %vm7458_vm2, %v2351_v2, %v2355_v53  ;;  %v2364_v18 = vor.u32 %v2363_v9, %v2360_v8  ;;  %v2391_v25 = vshll.u32 %v7508_v20, 16  ;;  %v2395_v27 = vshrl.u32 %v7508_v20, 16  ;;  %v7129_v4 = vld [vmem:[%s9005_s1 + $0x50] sm:$0xff]   ;;  %v7547_v8 = vld [vmem:[%s7422_s30 + $0x4c] sm:$0xf]  ;;  %s7251_s16 = scalar_lea.vmem %s8958_s19, 1024 }
  0x28   : > { %6527 = vmatpush3.bf16.msra.mxu0 %v7114_v24  ;;  %6336 = vmatprep.subr.bf16.mxu1 %v7115_v28  ;;  %v5773_v17 = vcombine.low %v2346_v6, %v2356_v12  ;;  %v2374_v22 = vor.u32 %v2373_v13, %v2369_v10  ;;  %v2385_v24 = vshll.u32 %v5717_v19, 16  ;;  %v2384_v34 = vrot.slane %v2382_v23, 4  ;;  %v7550_v9 = vld [vmem:[%s7422_s30 + $0x50] sm:$0x1]  ;;  %p7252_p11 = scmp.ne.s32.totalorder %s8958_s19, %s7251_s16  ;;  %p7259_p1 = scmp.lt.s32.totalorder %s7257_s29, %s7251_s16 }
  0x29   : > { %6528 = vmatprep.subr.bf16.mxu0 %v7116_v32  ;;  %v2365_v26 = vrot.slane %v2364_v18, 4  ;;  %v2393_v37 = vrot.slane %v2391_v25, 5  ;;  %v2397_v39 = vrot.slane %v2395_v27, 4  ;;  %v2406_v51 = vshrl.u32 %v5720_v45, 16 }
  0x2a   : > { %v2375_v30 = vrot.slane %v2374_v22, 4  ;;  %v2387_v36 = vrot.slane %v2385_v24, 5  ;;  %v2409_v52 = vshll.u32 %v5720_v45, 16  ;;  %v2419_v56 = vshrl.u32 %v7527_v46, 16  ;;  %v7130_v22 = vld [vmem:[%s9005_s1 + $0x160] sm:$0xff]   ;;  %p7253_p12 = pnand %p7252_p11, %p7377_p5  ;;  %p7260_p2 = por %p7259_p1, %p7258_p0 }
  0x2b   : > { %6337 = vmatpush3.bf16.msra.mxu1 %v7115_v28  ;;  %v2401_v28 = vshll.u32 %v7511_v21, 16  ;;  %v2370_v38 = vsel %vm7458_vm2, %v2365_v26, %v2369_v10  ;;  %v2408_v61 = vrot.slane %v2406_v51, 4  ;;  %v2443_v18 = vshrl.u32 %v7547_v8, 16  ;;  %v7128_v24 = vld [vmem:[%s7422_s30 + $0x3c] sm:$0xff]  }
  0x2c   : > { %6529 = vmatpush3.bf16.msra.mxu0 %v7116_v32  ;;  %6370 = vmatprep.subr.bf16.mxu1 %v7119_v49  ;;  %v7123_v32 = vld [vmem:[%s7422_s30 + $0x24] sm:$0xff]   ;;  %v2380_v43 = vsel %vm7458_vm2, %v2375_v30, %v2379_v16  ;;  %v2388_v44 = vor.u32 %v2387_v36, %v2384_v34  ;;  %v2411_v63 = vrot.slane %v2409_v52, 5  ;;  %v2421_v2 = vrot.slane %v2419_v56, 4  ;;  %p7254_p13 = pneg %p7253_p12 }
  0x2d   : > { %6562 = vmatprep.subr.bf16.mxu0 %v7120_v55  ;;  %v2403_v40 = vrot.slane %v2401_v28, 5  ;;  %v5774_v47 = vcombine.low %v2370_v38, %v2380_v43  ;;  %v2449_v19 = vshll.u32 %v7550_v9, 16  ;;  %v7132_v34 = vld [vmem:[%s7422_s30 + $0x48] sm:$0xff]   ;;  %v5726_v38 = vld [vmem:[%s7422_s30 + $0x54] sm:$0xf]  ;;  %v3105_v31 = vrot.slane %v7511_v21, 5 }
  0x2e   : > { %6339 = vmatmul.mubr.bf16.vlgmr.msra.gmra.mrb[0].mxu1 %v7118_v57  ;;  %v2389_v53 = vrot.slane %v2388_v44, 4  ;;  %v2425_v57 = vshll.u32 %v7530_v50, 16  ;;  %v2412_v6 = vor.u32 %v2411_v63, %v2408_v61  ;;  %v7572_v43 = vld [vmem:[%s7422_s30 + $0x5c] sm:$0x1]  ;;  %v2454_v44 = vshrl.u32 %v5726_v38, 16  ;;  %v7147_v21 = vld [vmem:[%s9005_s1 + $0x70] sm:$0xff]   ;;  %p7261_p3 = pnand %p7260_p2, %p7254_p13 }
  0x2f   : > { %6531 = vmatmul.mubr.bf16.vlgmr.msra.gmra.mrb[0].mxu0 %v5773_v17  ;;  %6371 = vmatpush3.bf16.msra.mxu1 %v7119_v49  ;;  %v2398_v49 = vor.u32 %v2397_v39, %v2393_v37  ;;  %v2439_v17 = vshll.u32 %v7547_v8, 16  ;;  %v2451_v30 = vrot.slane %v2449_v19, 5  ;;  %v2457_v45 = vshll.u32 %v5726_v38, 16 }
  0x30   : > { %6563 = vmatpush3.bf16.msra.mxu0 %v7120_v55  ;;  %6342 = vmatprep.mubr.bf16.mxu1 %v7122_v3  ;;  %v2415_v55 = vshll.u32 %v7527_v46, 16  ;;  %v2394_v0 = vsel %vm7458_vm2, %v2389_v53, %v2393_v37  ;;  %v2427_v3 = vrot.slane %v2425_v57, 5  ;;  %v2413_v16 = vrot.slane %v2412_v6, 4  ;;  %v7134_v57 = vld [vmem:[%s9005_s1 + $0x58] sm:$0xff]  }
  0x31   : > { %6564 = vmatprep.subr.bf16.mxu0 %v7121_v7  ;;  %6372 = vmatprep.subr.bf16.mxu1 %v7124_v11  ;;  %v2399_v58 = vrot.slane %v2398_v49, 4  ;;  %v2441_v28 = vrot.slane %v2439_v17, 5  ;;  %v2473_v52 = vshll.u32 %v7572_v43, 16  ;;  %v2459_v56 = vrot.slane %v2457_v45, 5 }
  0x32   : > { %6534 = vmatprep.mubr.bf16.mxu0 %v5774_v47  ;;  %v2417_v1 = vrot.slane %v2415_v55, 5  ;;  %v2456_v55 = vrot.slane %v2454_v44, 4  ;;  %v3091_v44 = vrot.slane %v7463_v35, 5 }
  0x33   : > { %6373 = vmatpush3.bf16.msra.mxu1 %v7124_v11  ;;  %v2404_v5 = vsel %vm7458_vm2, %v2399_v58, %v2403_v40  ;;  %v2475_v63 = vrot.slane %v2473_v52, 5  ;;  %v7138_v52 = vld [vmem:[%s7422_s30 + $0x6c] sm:$0xff]  }
  0x34   : > { %6565 = vmatpush3.bf16.msra.mxu0 %v7121_v7  ;;  %v5723_v7 = vld [vmem:[%s7422_s30 + $0x48] sm:$0xf]  ;;  %v5775_v10 = vcombine.low %v2394_v0, %v2404_v5  ;;  %v2422_v11 = vor.u32 %v2421_v2, %v2417_v1  ;;  %6374 = vmatprep.subr.bf16.mxu1 %v7129_v4  ;;  %v2418_v27 = vsel %vm7458_vm2, %v2413_v16, %v2417_v1  ;;  %v7133_v0 = vld [vmem:[%s7422_s30 + $0x54] sm:$0xff]   ;;  %v7590_v5 = vld [vmem:[%s7422_s30 + $0x64] sm:$0xf] }
  0x35   : > { %6566 = vmatprep.subr.bf16.mxu0 %v7125_v29  ;;  %v2430_v12 = vshrl.u32 %v5723_v7, 16  ;;  %v2433_v13 = vshll.u32 %v5723_v7, 16  ;;  %v7135_v1 = vld [vmem:[%s9005_s1 + $0x170] sm:$0xff]   ;;  %v2487_v16 = vshll.u32 %v7590_v5, 16  ;;  %v2491_v17 = vshrl.u32 %v7590_v5, 16 }
  0x36   : > { %6343 = vmatmul.mubr.bf16.gmra.mrb[4].mxu1 %v7123_v32  ;;  %v2423_v23 = vrot.slane %v2422_v11, 4  ;;  %v7131_v32 = vld [vmem:[%s9005_s1 + $0x168] sm:$0xff]  }
  0x37   : > { %6346 = vmatprep.mubr.bf16.mxu1 %v7127_v41  ;;  %6375 = vmatpush3.bf16.msra.mxu1 %v7129_v4  ;;  %v2432_v25 = vrot.slane %v2430_v12, 4  ;;  %v2435_v26 = vrot.slane %v2433_v13, 5  ;;  %v7569_v41 = vld [vmem:[%s7422_s30 + $0x58] sm:$0xf]  ;;  %v5729_v4 = vld [vmem:[%s7422_s30 + $0x60] sm:$0xf] }
  0x38   : > { %6567 = vmatpush3.bf16.msra.mxu0 %v7125_v29  ;;  %v2445_v29 = vrot.slane %v2443_v18, 4  ;;  %v2428_v36 = vsel %vm7458_vm2, %v2423_v23, %v2427_v3  ;;  %v2463_v49 = vshll.u32 %v7569_v41, 16  ;;  %v2467_v51 = vshrl.u32 %v7569_v41, 16  ;;  %6376 = vmatprep.subr.bf16.mxu1 %v7134_v57 }
  0x39   : > { %6568 = vmatprep.subr.bf16.mxu0 %v7126_v59  ;;  %6535 = vmatmul.mubr.bf16.gmra.mrb[4].mxu0 %v5775_v10  ;;  %v2436_v37 = vor.u32 %v2435_v26, %v2432_v25  ;;  %v5776_v39 = vcombine.low %v2418_v27, %v2428_v36  ;;  %v2460_v3 = vor.u32 %v2459_v56, %v2456_v55  ;;  %v7593_v10 = vld [vmem:[%s7422_s30 + $0x68] sm:$0x1]  ;;  %v2478_v11 = vshrl.u32 %v5729_v4, 16  ;;  %v5797_v55 = vld [vmem:[%s7422_s30 + $0x18] sm:$0xe]  ;;  %v7140_v56 = vld [vmem:[%s9005_s1 + $0x180] sm:$0xff]  }
  0x3a   : > { %v2446_v40 = vor.u32 %v2445_v29, %v2441_v28  ;;  %v2469_v61 = vrot.slane %v2467_v51, 4  ;;  %v2481_v12 = vshll.u32 %v5729_v4, 16  ;;  %v2497_v18 = vshll.u32 %v7593_v10, 16  ;;  %v7137_v29 = vld [vmem:[%s7422_s30 + $0x60] sm:$0xff]  }
  0x3b   : > { %v2437_v47 = vrot.slane %v2436_v37, 4  ;;  %6538 = vmatprep.mubr.bf16.mxu0 %v5776_v39  ;;  %6377 = vmatpush3.bf16.msra.mxu1 %v7134_v57  ;;  %v2461_v13 = vrot.slane %v2460_v3, 4  ;;  %v2489_v26 = vrot.slane %v2487_v16, 5  ;;  %v2493_v27 = vrot.slane %v2491_v17, 4  ;;  %v7144_v17 = vld [vmem:[%s9005_s1 + $0x188] sm:$0xff]  }
  0x3c   : > { %6569 = vmatpush3.bf16.msra.mxu0 %v7126_v59  ;;  %v2447_v53 = vrot.slane %v2446_v40, 4  ;;  %v2465_v59 = vrot.slane %v2463_v49, 5  ;;  %v2483_v23 = vrot.slane %v2481_v12, 5  ;;  %v3081_v40 = vrot.slane %v7433_v14, 5 }
  0x3d   : > { %6570 = vmatprep.subr.bf16.mxu0 %v7130_v22  ;;  %v2442_v58 = vsel %vm7458_vm2, %v2437_v47, %v2441_v28  ;;  %v2499_v28 = vrot.slane %v2497_v18, 5  ;;  %v2494_v38 = vor.u32 %v2493_v27, %v2489_v26  ;;  %v5813_v35 = vrot.slane %v5797_v55, 9  ;;  %v7145_v18 = vld [vmem:[%s7422_s30 + $0x90] sm:$0xff]  }
  0x3e   : > { %6347 = vmatmul.mubr.bf16.gmra.mrb[8].mxu1 %v7128_v24  ;;  %v2452_v2 = vsel %vm7458_vm2, %v2447_v53, %v2451_v30  ;;  %v2470_v7 = vor.u32 %v2469_v61, %v2465_v59  ;;  %v7136_v24 = vld [vmem:[%s9005_s1 + $0x178] sm:$0xff]   ;;  %v2466_v25 = vsel %vm7458_vm2, %v2461_v13, %v2465_v59  ;;  %v3083_v51 = vrot.slane %v3081_v40, 4  ;;  %v7139_v53 = vld [vmem:[%s9005_s1 + $0x60] sm:$0xff]  }
  0x3f   : > { %6350 = vmatprep.mubr.bf16.mxu1 %v7132_v34  ;;  %v5777_v6 = vcombine.low %v2442_v58, %v2452_v2  ;;  %v2495_v47 = vrot.slane %v2494_v38, 4  ;;  %6378 = vmatprep.subr.bf16.mxu1 %v7139_v53  ;;  %v5798_v59 = vld [vmem:[%s7422_s30 + $0x24] sm:$0xe]  ;;  %v3095_v2 = vrot.slane %v7487_v60, 5  ;;  %v3098_v3 = vrot.slane %v7490_v62, 5 }
  0x40   : > { %6571 = vmatpush3.bf16.msra.mxu0 %v7130_v22  ;;  %v2471_v19 = vrot.slane %v2470_v7, 4  ;;  %v2480_v22 = vrot.slane %v2478_v11, 4  ;;  %v3085_v58 = vsel %vm7606_vm5, %v3083_v51, %v3084_v48  ;;  %6379 = vmatpush3.bf16.msra.mxu1 %v7139_v53  ;;  %v5799_v48 = vld [vmem:[%s7422_s30 + $0x30] sm:$0xe]  ;;  %v3102_v4 = vrot.slane %v7508_v20, 5  ;;  %v7142_v11 = vld [vmem:[%s7422_s30 + $0x84] sm:$0xff]  }
  0x41   : > { %6572 = vmatprep.subr.bf16.mxu0 %v7131_v32  ;;  %6539 = vmatmul.mubr.bf16.gmra.mrb[8].mxu0 %v5777_v6  ;;  %v2500_v57 = vsel %vm7458_vm2, %v2495_v47, %v2499_v28  ;;  %v3089_v6 = vsel %vm7606_vm5, %v5813_v35, %v3088_v42  ;;  %v3092_v60 = vsel %vm7606_vm5, %v7479_v54, %v3091_v44  ;;  %v3097_v62 = vrot.slane %v3095_v2, 4  ;;  %v5800_v13 = vld [vmem:[%s7422_s30 + $0x3c] sm:$0xe] }
  0x42   : > { %v2476_v34 = vsel %vm7458_vm2, %v2471_v19, %v2475_v63  ;;  %v2484_v36 = vor.u32 %v2483_v23, %v2480_v22  ;;  %6380 = vmatprep.subr.bf16.mxu1 %v7143_v15  ;;  %v5815_v20 = vrot.slane %v5799_v48, 9  ;;  %v3104_v12 = vrot.slane %v3102_v4, 4  ;;  %v7152_v35 = vld [vmem:[%s9005_s1 + $0x198] sm:$0xff]  }
  0x43   : > { %v5778_v37 = vcombine.low %v2466_v25, %v2476_v34  ;;  %v3099_v42 = vsel %vm7606_vm5, %v3097_v62, %v3098_v3  ;;  %v3109_v54 = vrot.slane %v7527_v46, 5  ;;  %v5845_v16 = vcombine.low %v3089_v6, %v3092_v60  ;;  %v5802_v34 = vld [vmem:[%s7422_s30 + $0x54] sm:$0xe]  ;;  %v5733_v3 = vld [vmem:[%s7422_s30 + $0x70] sm:$0xf] }
  0x44   : > { %6573 = vmatpush3.bf16.msra.mxu0 %v7131_v32  ;;  %v5796_v32 = vld [vmem:[%s7422_s30 + $0xc] sm:$0xe]  ;;  %v2485_v45 = vrot.slane %v2484_v36, 4  ;;  %6381 = vmatpush3.bf16.msra.mxu1 %v7143_v15  ;;  %v3112_v19 = vrot.slane %v7530_v50, 5  ;;  %v5816_v23 = vrot.slane %v5800_v13, 9  ;;  %v3116_v46 = vrot.slane %v7547_v8, 5 }
  0x45   : > { %6574 = vmatprep.subr.bf16.mxu0 %v7135_v1  ;;  %v5812_v39 = vrot.slane %v5796_v32, 9  ;;  %6542 = vmatprep.mubr.bf16.mxu0 %v5778_v37  ;;  %v3111_v25 = vrot.slane %v3109_v54, 4  ;;  %v3119_v27 = vrot.slane %v7550_v9, 5  ;;  %v3103_v50 = vsel %vm7606_vm5, %v5815_v20, %v3102_v4  ;;  %v7722_v15 = vld [vmem:[%s9005_s1 + $0x80] sm:$0xff]   ;;  %v5734_v62 = vld [vmem:[%s7422_s30 + $0x74] sm:$0x1] }
  0x46   : > { %6351 = vmatmul.mubr.bf16.gmra.mrb[12].mxu1 %v7133_v0  ;;  %v2490_v14 = vsel %vm7458_vm2, %v2485_v45, %v2489_v26  ;;  %v7141_v0 = vld [vmem:[%s7422_s30 + $0x78] sm:$0xff]   ;;  %6382 = vmatprep.subr.bf16.mxu1 %v7147_v21  ;;  %v3118_v28 = vrot.slane %v3116_v46, 4  ;;  %v3123_v36 = vrot.slane %v7569_v41, 5  ;;  %v3106_v8 = vsel %vm7606_vm5, %v3104_v12, %v3105_v31  ;;  %v5803_v45 = vld [vmem:[%s7422_s30 + $0x60] sm:$0xe] }
  0x47   : > { %6354 = vmatprep.mubr.bf16.mxu1 %v7137_v29  ;;  %v3082_v49 = vsel %vm7606_vm5, %v5812_v39, %v3081_v40  ;;  %v5779_v61 = vcombine.low %v2490_v14, %v2500_v57  ;;  %v7148_v29 = vld [vmem:[%s9005_s1 + $0x190] sm:$0xff]   ;;  %v3110_v9 = vsel %vm7606_vm5, %v5816_v23, %v3109_v54  ;;  %v5818_v32 = vrot.slane %v5802_v34, 9  ;;  %v7146_v39 = vld [vmem:[%s7422_s30 + $0x9c] sm:$0xff]   ;;  %v619_v12 = vld [vmem:[%s7422_s30 + $0xc] sm:$0xf] }
  0x48   : > { %6575 = vmatpush3.bf16.msra.mxu0 %v7135_v1  ;;  %v5844_v63 = vcombine.low %v3082_v49, %v3085_v58  ;;  %v5814_v1 = vrot.slane %v5798_v59, 9  ;;  %v3126_v37 = vrot.slane %v7572_v43, 5  ;;  %v3113_v38 = vsel %vm7606_vm5, %v3111_v25, %v3112_v19  ;;  %v7151_v43 = vld [vmem:[%s9005_s1 + $0x78] sm:$0xff]   ;;  %6383 = vmatpush3.bf16.msra.mxu1 %v7147_v21  ;;  %v617_v58 = vld [vmem:[%s7422_s30 + $0x4] sm:$0xf] }
  0x49   : > { %6576 = vmatprep.subr.bf16.mxu0 %v7136_v24  ;;  %6543 = vmatmul.mubr.bf16.gmra.mrb[12].mxu0 %v5779_v61  ;;  %v7689_v40 = vsel %vm7606_vm5, %v3118_v28, %v3119_v27  ;;  %v3125_v44 = vrot.slane %v3123_v36, 4  ;;  %v3130_v47 = vrot.slane %v7590_v5, 5  ;;  %v3133_v49 = vrot.slane %v7593_v10, 5  ;;  %v616_v5 = vld [vmem:[%s7422_s30] sm:$0xf] }
  0x4a   : > { %6578 = vmatprep.mubr.bf16.mxu0 %v5844_v63  ;;  %v3096_v7 = vsel %vm7606_vm5, %v5814_v1, %v3095_v2  ;;  %v5847_v51 = vcombine.low %v3103_v50, %v3106_v8  ;;  %v7700_v53 = vsel %vm7606_vm5, %v5818_v32, %v3123_v36  ;;  %6384 = vmatprep.subr.bf16.mxu1 %v7151_v43  ;;  %v5819_v14 = vrot.slane %v5803_v45, 9  ;;  %v618_v59 = vld [vmem:[%s7422_s30 + $0x8] sm:$0x1]  ;;  %v7154_v13 = vld [vmem:[%s9005_s1 + $0x1a0] sm:$0xff]   ;;  %v620_v19 = vld [vmem:[%s7422_s30 + $0x10] sm:$0xf] }
  0x4b   : > { %v5846_v22 = vcombine.low %v3096_v7, %v3099_v42  ;;  %v7704_v55 = vsel %vm7606_vm5, %v3125_v44, %v3126_v37  ;;  %v5848_v10 = vcombine.low %v3110_v9, %v3113_v38  ;;  %v3132_v57 = vrot.slane %v3130_v47, 4  ;;  %v5804_v7 = vld [vmem:[%s7422_s30 + $0x6c] sm:$0xe]  ;;  %v621_v21 = vld [vmem:[%s7422_s30 + $0x14] sm:$0x1] }
  0x4c   : > { %6577 = vmatpush3.bf16.msra.mxu0 %v7136_v24  ;;  %v5801_v24 = vld [vmem:[%s7422_s30 + $0x48] sm:$0xe]  ;;  %v668_v61 = vshrl.u32 %v616_v5, 16  ;;  %v7716_v63 = vsel %vm7606_vm5, %v5819_v14, %v3130_v47  ;;  %v677_v1 = vshll.u32 %v617_v58, 16  ;;  %v681_v2 = vshrl.u32 %v617_v58, 16  ;;  %6385 = vmatpush3.bf16.msra.mxu1 %v7151_v43 }
  0x4d   : > { %6610 = vmatprep.subr.bf16.mxu0 %v7140_v56  ;;  %v5817_v26 = vrot.slane %v5801_v24, 9  ;;  %v5850_v48 = vcombine.low %v7700_v53, %v7704_v55  ;;  %v7728_v4 = vsel %vm7606_vm5, %v3132_v57, %v3133_v49  ;;  %v687_v60 = vshll.u32 %v618_v59, 16  ;;  %6418 = vmatprep.subr.bf16.mxu1 %v7722_v15  ;;  %v5736_v9 = vld [vmem:[%s7422_s30 + $0x7c] sm:$0xf]  ;;  %v5737_v44 = vld [vmem:[%s7422_s30 + $0x80] sm:$0x1] }
  0x4e   : > { %6355 = vmatmul.mubr.bf16.gmra.mrb[16].mxu1 %v7138_v52  ;;  %v7149_v52 = vld [vmem:[%s7422_s30 + $0xa8] sm:$0xff]   ;;  %v670_v6 = vrot.slane %v668_v61, 4  ;;  %v679_v31 = vrot.slane %v677_v1, 5  ;;  %v683_v42 = vrot.slane %v681_v2, 4  ;;  %v692_v24 = vshrl.u32 %v619_v12, 16 }
  0x4f   : > { %6358 = vmatprep.mubr.bf16.mxu1 %v7141_v0  ;;  %v7685_v41 = vsel %vm7606_vm5, %v5817_v26, %v3116_v46  ;;  %v671_v0 = vshll.u32 %v616_v5, 16  ;;  %v689_v54 = vrot.slane %v687_v60, 5  ;;  %v695_v25 = vshll.u32 %v619_v12, 16  ;;  %v7150_v26 = vld [vmem:[%s7422_s30 + $0xb4] sm:$0xff]   ;;  %v7156_v57 = vld [vmem:[%s9005_s1 + $0x1a8] sm:$0xff]  }
  0x50   : > { %v684_v23 = vor.u32 %v683_v42, %v679_v31  ;;  %v701_v50 = vshll.u32 %v620_v19, 16  ;;  %v705_v28 = vshrl.u32 %v620_v19, 16  ;;  %v694_v36 = vrot.slane %v692_v24, 4  ;;  %v623_v1 = vld [vmem:[%s7422_s30 + $0x1c] sm:$0xf] }
  0x51   : > { %6579 = vmatmul.mubr.bf16.vlgmr.msra.gmra.mrb[0].mxu0 %v5845_v16  ;;  %v673_v20 = vrot.slane %v671_v0, 5  ;;  %v5820_v16 = vrot.slane %v5804_v7, 9  ;;  %v697_v8 = vrot.slane %v695_v25, 5  ;;  %v2535_v5 = vshll.u32 %v5736_v9, 16  ;;  %v5739_v55 = vld [vmem:[%s7422_s30 + $0x88] sm:$0xf] }
  0x52   : > { %6611 = vmatpush3.bf16.msra.mxu0 %v7140_v56  ;;  %6582 = vmatprep.mubr.bf16.mxu0 %v5846_v22  ;;  %v5849_v56 = vcombine.low %v7685_v41, %v7689_v40  ;;  %v685_v34 = vrot.slane %v684_v23, 4  ;;  %v703_v37 = vrot.slane %v701_v50, 5  ;;  %v707_v38 = vrot.slane %v705_v28, 4  ;;  %v624_v40 = vld [vmem:[%s7422_s30 + $0x20] sm:$0x1]  ;;  %v7158_v25 = vld [vmem:[%s9005_s1 + $0x1b0] sm:$0xff]  }
  0x53   : > { %6612 = vmatprep.subr.bf16.mxu0 %v7144_v17  ;;  %v674_v22 = vor.u32 %v673_v20, %v670_v6  ;;  %v698_v49 = vor.u32 %v697_v8, %v694_v36  ;;  %v2539_v59 = vshrl.u32 %v5736_v9, 16  ;;  %v2545_v61 = vshll.u32 %v5737_v44, 16  ;;  %v5740_v42 = vld [vmem:[%s7422_s30 + $0x8c] sm:$0x1]  ;;  %v5806_v12 = vld [vmem:[%s7422_s30 + $0x84] sm:$0xe] }
  0x54   : > { %v690_v45 = vsel %vm7458_vm2, %v685_v34, %v689_v54  ;;  %v708_v14 = vor.u32 %v707_v38, %v703_v37  ;;  %v3144_v6 = vrot.slane %v5736_v9, 5  ;;  %v3147_v41 = vrot.slane %v5737_v44, 5  ;;  %v7789_v19 = vld [vmem:[%s7422_s30 + $0x28] sm:$0xf]  ;;  %v7160_v38 = vld [vmem:[%s9005_s1 + $0x1b8] sm:$0xff]  }
  0x55   : > { %v699_v58 = vrot.slane %v698_v49, 4  ;;  %v2541_v60 = vrot.slane %v2539_v59, 4  ;;  %v735_v24 = vshll.u32 %v624_v40, 16  ;;  %v5822_v28 = vrot.slane %v5806_v12, 9  ;;  %v5742_v49 = vld [vmem:[%s7422_s30 + $0x94] sm:$0xf] }
  0x56   : > { %6359 = vmatmul.mubr.bf16.gmra.mrb[20].mxu1 %v7142_v11  ;;  %6613 = vmatpush3.bf16.msra.mxu0 %v7144_v17  ;;  %v5851_v11 = vcombine.low %v7716_v63, %v7728_v4  ;;  %v3137_v17 = vrot.slane %v5733_v3, 5  ;;  %v709_v2 = vrot.slane %v708_v14, 4  ;;  %v7770_v3 = vrot.slane %v2535_v5, 5  ;;  %v628_v59 = vld [vmem:[%s7422_s30 + $0x30] sm:$0xf] }
  0x57   : > { %6362 = vmatprep.mubr.bf16.mxu1 %v7145_v18  ;;  %6614 = vmatprep.subr.bf16.mxu0 %v7148_v29  ;;  %v3140_v18 = vrot.slane %v5734_v62, 5  ;;  %v7775_v62 = vrot.slane %v2545_v61, 5  ;;  %v3146_v20 = vrot.slane %v3144_v6, 4  ;;  %v737_v8 = vrot.slane %v735_v24, 5  ;;  %v5745_v12 = vld [vmem:[%s7422_s30 + $0xa0] sm:$0xf] }
  0x58   : > { %v7743_v46 = vsel %vm7606_vm5, %v5820_v16, %v3137_v17  ;;  %v3139_v27 = vrot.slane %v3137_v17, 4  ;;  %v2542_v16 = vor.u32 %v2541_v60, %v7770_v3  ;;  %v3151_v9 = vrot.slane %v5739_v55, 5 }
  0x59   : > { %6583 = vmatmul.mubr.bf16.gmra.mrb[4].mxu0 %v5847_v51  ;;  %v5805_v51 = vld [vmem:[%s7422_s30 + $0x78] sm:$0xe] }
  0x5a   : > { %6586 = vmatprep.mubr.bf16.mxu0 %v5848_v10  ;;  %6615 = vmatpush3.bf16.msra.mxu0 %v7148_v29  ;;  %v675_v29 = vrot.slane %v674_v22, 4  ;;  %v7749_v32 = vsel %vm7606_vm5, %v3139_v27, %v3140_v18  ;;  %v622_v10 = vld [vmem:[%s7422_s30 + $0x18] sm:$0xf]  ;;  %v5821_v0 = vrot.slane %v5805_v51, 9  ;;  %v725_v18 = vshll.u32 %v623_v1, 16 }
  0x5b   : > { %6616 = vmatprep.subr.bf16.mxu0 %v7152_v35  ;;  %v5852_v47 = vcombine.low %v7743_v46, %v7749_v32  ;;  %v716_v53 = vshrl.u32 %v622_v10, 16  ;;  %v7793_v22 = vsel %vm7606_vm5, %v3146_v20, %v3147_v41  ;;  %v5743_v51 = vld [vmem:[%s7422_s30 + $0x98] sm:$0x1]  ;;  %v3153_v14 = vrot.slane %v3151_v9, 4 }
  0x5c   : > { %v680_v43 = vsel %vm7458_vm2, %v675_v29, %v679_v31  ;;  %v7782_v7 = vsel %vm7606_vm5, %v5821_v0, %v3144_v6  ;;  %v719_v31 = vshll.u32 %v622_v10, 16  ;;  %v727_v50 = vrot.slane %v725_v18, 5  ;;  %v7155_v29 = vld [vmem:[%s9005_s1 + $0x88] sm:$0xff]   ;;  %v7835_v6 = vld [vmem:[%s7422_s30 + $0x34] sm:$0xf] }
  0x5d   : > { %v718_v17 = vrot.slane %v716_v53, 4  ;;  %v5853_v27 = vcombine.low %v7782_v7, %v7793_v22  ;;  %v3161_v60 = vrot.slane %v5743_v51, 5  ;;  %v7159_v53 = vld [vmem:[%s9005_s1 + $0x98] sm:$0xff]   ;;  %v773_v18 = vshll.u32 %v7835_v6, 16  ;;  %v7864_v22 = vld [vmem:[%s9005_s1 + $0x1c0] sm:$0xff]  }
  0x5e   : > { %6363 = vmatmul.mubr.bf16.gmra.mrb[24].mxu1 %v7146_v39  ;;  %6617 = vmatpush3.bf16.msra.mxu0 %v7152_v35  ;;  %v711_v39 = vshll.u32 %v621_v21, 16  ;;  %v721_v23 = vrot.slane %v719_v31, 5  ;;  %v729_v21 = vshrl.u32 %v623_v1, 16  ;;  %v7843_v31 = vld [vmem:[%s7422_s30 + $0x38] sm:$0x1] }
  0x5f   : > { %6366 = vmatprep.mubr.bf16.mxu1 %v7149_v52  ;;  %6618 = vmatprep.subr.bf16.mxu0 %v7154_v13  ;;  %v5556_v52 = vcombine.low %v680_v43, %v690_v45  ;;  %v749_v45 = vshll.u32 %v7789_v19, 16  ;;  %v783_v7 = vshll.u32 %v7843_v31, 16  ;;  %v7872_v51 = vld [vmem:[%s7422_s30 + $0x44] sm:$0x1] }
  0x60   : > { %v713_v35 = vrot.slane %v711_v39, 5  ;;  %v722_v34 = vor.u32 %v721_v23, %v718_v17  ;;  %v731_v36 = vrot.slane %v729_v21, 4  ;;  %v3154_v39 = vrot.slane %v5740_v42, 5  ;;  %v5808_v23 = vld [vmem:[%s7422_s30 + $0x9c] sm:$0xe] }
  0x61   : > { %6587 = vmatmul.mubr.bf16.gmra.mrb[8].mxu0 %v5849_v56  ;;  %v704_v56 = vsel %vm7458_vm2, %v699_v58, %v703_v37  ;;  %v7806_v37 = vld [vmem:[%s7422_s30 + $0x2c] sm:$0x1]  ;;  %v753_v58 = vshrl.u32 %v7789_v19, 16  ;;  %v764_v42 = vshrl.u32 %v628_v59, 16  ;;  %v767_v17 = vshll.u32 %v628_v59, 16 }
  0x62   : > { %6590 = vmatprep.mubr.bf16.mxu0 %v5850_v48  ;;  %6619 = vmatpush3.bf16.msra.mxu0 %v7154_v13  ;;  %v714_v48 = vsel %vm7458_vm2, %v709_v2, %v713_v35  ;;  %v625_v13 = vld [vmem:[%s7422_s30 + $0x24] sm:$0xf]  ;;  %v723_v63 = vrot.slane %v722_v34, 4  ;;  %v732_v4 = vor.u32 %v731_v36, %v727_v50  ;;  %v5807_v35 = vld [vmem:[%s7422_s30 + $0x90] sm:$0xe]  ;;  %v3155_v32 = vsel %vm7606_vm5, %v3153_v14, %v3154_v39 }
  0x63   : > { %6620 = vmatprep.subr.bf16.mxu0 %v7156_v57  ;;  %v5557_v54 = vcombine.low %v704_v56, %v714_v48  ;;  %v740_v44 = vshrl.u32 %v625_v13, 16  ;;  %v743_v43 = vshll.u32 %v625_v13, 16  ;;  %v755_v1 = vrot.slane %v753_v58, 4  ;;  %v5746_v13 = vld [vmem:[%s7422_s30 + $0xa4] sm:$0x1] }
  0x64   : > { %v728_v46 = vsel %vm7458_vm2, %v723_v63, %v727_v50  ;;  %v5823_v2 = vrot.slane %v5807_v35, 9  ;;  %v3158_v56 = vrot.slane %v5742_v49, 5  ;;  %v777_v50 = vshrl.u32 %v7835_v6, 16  ;;  %v7869_v39 = vld [vmem:[%s7422_s30 + $0x40] sm:$0xf] }
  0x65   : > { %v742_v5 = vrot.slane %v740_v44, 4  ;;  %v745_v10 = vrot.slane %v743_v43, 5  ;;  %v769_v34 = vrot.slane %v767_v17, 5  ;;  %v775_v36 = vrot.slane %v773_v18, 5  ;;  %v5748_v35 = vld [vmem:[%s7422_s30 + $0xac] sm:$0xf] }
  0x66   : > { %6367 = vmatmul.mubr.bf16.gmra.mrb[28].mxu1 %v7150_v26  ;;  %v7798_v26 = vrot.slane %v2542_v16, 4  ;;  %6621 = vmatpush3.bf16.msra.mxu0 %v7156_v57  ;;  %v751_v57 = vrot.slane %v749_v45, 5  ;;  %v3160_v16 = vrot.slane %v3158_v56, 4  ;;  %v785_v45 = vrot.slane %v783_v7, 5  ;;  %v7900_v17 = vld [vmem:[%s7422_s30 + $0x50] sm:$0x1] }
  0x67   : > { %6386 = vmatprep.mubr.bf16.mxu1 %v5556_v52  ;;  %6622 = vmatprep.subr.bf16.mxu0 %v7158_v25  ;;  %v7157_v52 = vld [vmem:[%s9005_s1 + $0x90] sm:$0xff]   ;;  %v746_v0 = vor.u32 %v745_v10, %v742_v5  ;;  %v3165_v49 = vrot.slane %v5745_v12, 5  ;;  %v797_v58 = vshll.u32 %v7869_v39, 16  ;;  %v801_v59 = vshrl.u32 %v7869_v39, 16 }
  0x68   : > { %v756_v20 = vor.u32 %v755_v1, %v751_v57  ;;  %v7170_v7 = vld [vmem:[%s9005_s1 + $0xb0] sm:$0xff]  }
  0x69   : > { %6591 = vmatmul.mubr.bf16.gmra.mrb[12].mxu0 %v5851_v11  ;;  %v3152_v11 = vsel %vm7606_vm5, %v5822_v28, %v3151_v9  ;;  %v747_v48 = vrot.slane %v746_v0, 4  ;;  %v631_v28 = vld [vmem:[%s7422_s30 + $0x3c] sm:$0xf]  ;;  %v779_v9 = vrot.slane %v777_v50, 4 }
  0x6a   : > { %6594 = vmatprep.mubr.bf16.mxu0 %v5852_v47  ;;  %6623 = vmatpush3.bf16.msra.mxu0 %v7158_v25  ;;  %v759_v47 = vshll.u32 %v7806_v37, 16  ;;  %v5854_v61 = vcombine.low %v3152_v11, %v3155_v32  ;;  %v757_v24 = vrot.slane %v756_v20, 4  ;;  %v766_v25 = vrot.slane %v764_v42, 4  ;;  %v7897_v20 = vld [vmem:[%s7422_s30 + $0x4c] sm:$0xf] }
  0x6b   : > { %6624 = vmatprep.subr.bf16.mxu0 %v7160_v38  ;;  %v752_v21 = vsel %vm7458_vm2, %v747_v48, %v751_v57  ;;  %v780_v63 = vor.u32 %v779_v9, %v775_v36  ;;  %v788_v11 = vshrl.u32 %v631_v28, 16  ;;  %v791_v14 = vshll.u32 %v631_v28, 16 }
  0x6c   : > { %v761_v40 = vrot.slane %v759_v47, 5  ;;  %v770_v43 = vor.u32 %v769_v34, %v766_v25  ;;  %v3167_v57 = vrot.slane %v3165_v49, 4  ;;  %v803_v48 = vrot.slane %v801_v59, 4  ;;  %v5752_v34 = vld [vmem:[%s7422_s30 + $0xbc] sm:$0x1] }
  0x6d   : > { %v790_v32 = vrot.slane %v788_v11, 4  ;;  %v793_v47 = vrot.slane %v791_v14, 5 }
  0x6e   : > { %6387 = vmatmul.mubr.bf16.vlgmr.msra.gmra.mrb[0].mxu1 %v5557_v54  ;;  %6625 = vmatpush3.bf16.msra.mxu0 %v7160_v38  ;;  %v3159_v54 = vsel %vm7606_vm5, %v5823_v2, %v3158_v56  ;;  %v5824_v38 = vrot.slane %v5808_v23, 9  ;;  %v771_v5 = vrot.slane %v770_v43, 4  ;;  %v799_v2 = vrot.slane %v797_v58, 5  ;;  %v7166_v56 = vld [vmem:[%s9005_s1 + $0xa8] sm:$0xff]  }
  0x6f   : > { %6419 = vmatpush3.bf16.msra.mxu1 %v7722_v15  ;;  %v733_v15 = vrot.slane %v732_v4, 4  ;;  %6658 = vmatprep.subr.bf16.mxu0 %v7864_v22  ;;  %v3168_v4 = vrot.slane %v5746_v13, 5 }
  0x70   : > { %6420 = vmatprep.subr.bf16.mxu1 %v7155_v29  ;;  %v3166_v10 = vsel %vm7606_vm5, %v5824_v38, %v3165_v49  ;;  %v776_v0 = vsel %vm7458_vm2, %v771_v5, %v775_v36  ;;  %v804_v13 = vor.u32 %v803_v48, %v799_v2  ;;  %v5810_v36 = vld [vmem:[%s7422_s30 + $0xb4] sm:$0xe]  ;;  %v825_v38 = vshrl.u32 %v7897_v20, 16 }
  0x71   : > { %v738_v41 = vsel %vm7458_vm2, %v733_v15, %v737_v8  ;;  %6595 = vmatmul.mubr.bf16.gmra.mrb[16].mxu0 %v5853_v27  ;;  %v762_v27 = vsel %vm7458_vm2, %v757_v24, %v761_v40  ;;  %v781_v15 = vrot.slane %v780_v63, 4  ;;  %v3169_v1 = vsel %vm7606_vm5, %v3167_v57, %v3168_v4  ;;  %v634_v40 = vld [vmem:[%s7422_s30 + $0x48] sm:$0xf]  ;;  %v5751_v24 = vld [vmem:[%s7422_s30 + $0xb8] sm:$0xf] }
  0x72   : > { %v5558_v55 = vcombine.low %v728_v46, %v738_v41  ;;  %6598 = vmatprep.mubr.bf16.mxu0 %v5854_v61  ;;  %v5559_v44 = vcombine.low %v752_v21, %v762_v27  ;;  %v5749_v46 = vld [vmem:[%s7422_s30 + $0xb0] sm:$0x1]  ;;  %v5809_v61 = vld [vmem:[%s7422_s30 + $0xa8] sm:$0xe]  ;;  %v807_v41 = vshll.u32 %v7872_v51, 16  ;;  %v812_v21 = vshrl.u32 %v634_v40, 16 }
  0x73   : > { %6421 = vmatpush3.bf16.msra.mxu1 %v7155_v29  ;;  %v3162_v29 = vsel %vm7606_vm5, %v3160_v16, %v3161_v60  ;;  %v786_v60 = vsel %vm7458_vm2, %v781_v15, %v785_v45  ;;  %v3172_v16 = vrot.slane %v5748_v35, 5  ;;  %v3175_v23 = vrot.slane %v5749_v46, 5  ;;  %v7921_v35 = vld [vmem:[%s7422_s30 + $0x58] sm:$0xf]  ;;  %v7924_v46 = vld [vmem:[%s7422_s30 + $0x5c] sm:$0x1] }
  0x74   : > { %6422 = vmatprep.subr.bf16.mxu1 %v7157_v52  ;;  %6390 = vmatprep.mubr.bf16.mxu1 %v5558_v55  ;;  %v5855_v8 = vcombine.low %v3159_v54, %v3162_v29  ;;  %v794_v55 = vor.u32 %v793_v47, %v790_v32  ;;  %v5560_v42 = vcombine.low %v776_v0, %v786_v60  ;;  %v809_v12 = vrot.slane %v807_v41, 5 }
  0x75   : > { %v5825_v54 = vrot.slane %v5809_v61, 9  ;;  %v3174_v50 = vrot.slane %v3172_v16, 4  ;;  %v815_v28 = vshll.u32 %v634_v40, 16  ;;  %v821_v29 = vshll.u32 %v7897_v20, 16  ;;  %v5754_v61 = vld [vmem:[%s7422_s30 + $0xc4] sm:$0xf] }
  0x76   : > { %6391 = vmatmul.mubr.bf16.gmra.mrb[4].mxu1 %v5559_v44  ;;  %v795_v18 = vrot.slane %v794_v55, 4  ;;  %v814_v9 = vrot.slane %v812_v21, 4  ;;  %v637_v44 = vld [vmem:[%s7422_s30 + $0x54] sm:$0xf]  ;;  %v827_v11 = vrot.slane %v825_v38, 4  ;;  %v5826_v14 = vrot.slane %v5810_v36, 9 }
  0x77   : > { %6423 = vmatpush3.bf16.msra.mxu1 %v7157_v52  ;;  %v7162_v52 = vld [vmem:[%s9005_s1 + $0xa0] sm:$0xff]   ;;  %6394 = vmatprep.mubr.bf16.mxu1 %v5560_v42  ;;  %v3173_v25 = vsel %vm7606_vm5, %v5825_v54, %v3172_v16  ;;  %v3176_v43 = vsel %vm7606_vm5, %v3174_v50, %v3175_v23  ;;  %v817_v45 = vrot.slane %v815_v28, 5  ;;  %v823_v49 = vrot.slane %v821_v29, 5  ;;  %v5755_v40 = vld [vmem:[%s7422_s30 + $0xc8] sm:$0x1] }
  0x78   : > { %6424 = vmatprep.subr.bf16.mxu1 %v7159_v53  ;;  %v800_v27 = vsel %vm7458_vm2, %v795_v18, %v799_v2  ;;  %v5857_v4 = vcombine.low %v3173_v25, %v3176_v43  ;;  %v3179_v58 = vrot.slane %v5751_v24, 5  ;;  %v3182_v32 = vrot.slane %v5752_v34, 5  ;;  %v5811_v42 = vld [vmem:[%s7422_s30 + $0xc0] sm:$0xe]  ;;  %v7943_v23 = vld [vmem:[%s7422_s30 + $0x64] sm:$0xf] }
  0x79   : > { %6599 = vmatmul.mubr.bf16.gmra.mrb[20].mxu0 %v5855_v8  ;;  %v805_v8 = vrot.slane %v804_v13, 4  ;;  %v828_v15 = vor.u32 %v827_v11, %v823_v49  ;;  %v836_v47 = vshrl.u32 %v637_v44, 16  ;;  %v839_v59 = vshll.u32 %v637_v44, 16  ;;  %v640_v13 = vld [vmem:[%s7422_s30 + $0x60] sm:$0xf] }
  0x7a   : > { %v3181_v2 = vrot.slane %v3179_v58, 4  ;;  %v845_v41 = vshll.u32 %v7921_v35, 16  ;;  %v849_v48 = vshrl.u32 %v7921_v35, 16  ;;  %v855_v18 = vshll.u32 %v7924_v46, 16  ;;  %v643_v44 = vld [vmem:[%s7422_s30 + $0x6c] sm:$0xf] }
  0x7b   : > { %6425 = vmatpush3.bf16.msra.mxu1 %v7159_v53  ;;  %v5856_v53 = vcombine.low %v3166_v10, %v3169_v1  ;;  %v810_v63 = vsel %vm7458_vm2, %v805_v8, %v809_v12  ;;  %v818_v10 = vor.u32 %v817_v45, %v814_v9  ;;  %v3180_v1 = vsel %vm7606_vm5, %v5826_v14, %v3179_v58 }
  0x7c   : > { %6426 = vmatprep.subr.bf16.mxu1 %v7162_v52  ;;  %v5561_v5 = vcombine.low %v800_v27, %v810_v63  ;;  %v829_v60 = vrot.slane %v828_v15, 4  ;;  %v841_v55 = vrot.slane %v839_v59, 5  ;;  %v3183_v54 = vsel %vm7606_vm5, %v3181_v2, %v3182_v32  ;;  %v7955_v63 = vld [vmem:[%s7422_s30 + $0x70] sm:$0xf]  ;;  %v7161_v59 = vld [vmem:[%s7422_s30 + $0x18] sm:$0xff]  }
  0x7d   : > { %6602 = vmatprep.mubr.bf16.mxu0 %v5856_v53  ;;  %v819_v0 = vrot.slane %v818_v10, 4  ;;  %v838_v53 = vrot.slane %v836_v47, 4  ;;  %v847_v16 = vrot.slane %v845_v41, 5  ;;  %v5858_v24 = vcombine.low %v3180_v1, %v3183_v54 }
  0x7e   : > { %6395 = vmatmul.mubr.bf16.gmra.mrb[8].mxu1 %v5561_v5  ;;  %v851_v50 = vrot.slane %v849_v48, 4  ;;  %v857_v29 = vrot.slane %v855_v18, 5  ;;  %v5827_v34 = vrot.slane %v5811_v42, 9  ;;  %v3186_v36 = vrot.slane %v5754_v61, 5 }
  0x7f   : > { %6427 = vmatpush3.bf16.msra.mxu1 %v7162_v52  ;;  %v831_v52 = vshll.u32 %v7900_v17, 16  ;;  %v824_v12 = vsel %vm7458_vm2, %v819_v0, %v823_v49  ;;  %v842_v25 = vor.u32 %v841_v55, %v838_v53  ;;  %v3189_v9 = vrot.slane %v5755_v40, 5 }
  0x80   : > { %6428 = vmatprep.subr.bf16.mxu1 %v7166_v56  ;;  %v852_v8 = vor.u32 %v851_v50, %v847_v16  ;;  %v860_v38 = vshrl.u32 %v640_v13, 16  ;;  %v3187_v43 = vsel %vm7606_vm5, %v5827_v34, %v3186_v36  ;;  %v3188_v45 = vrot.slane %v3186_v36, 4 }
  0x81   : > { %v833_v57 = vrot.slane %v831_v52, 5  ;;  %6603 = vmatmul.mubr.bf16.gmra.mrb[24].mxu0 %v5857_v4  ;;  %v843_v27 = vrot.slane %v842_v25, 4  ;;  %v863_v49 = vshll.u32 %v640_v13, 16  ;;  %v869_v52 = vshll.u32 %v7943_v23, 16  ;;  %v7960_v4 = vld [vmem:[%s9005_s1 + $0xc0] sm:$0xff]  }
  0x82   : > { %6606 = vmatprep.mubr.bf16.mxu0 %v5858_v24  ;;  %v853_v14 = vrot.slane %v852_v8, 4  ;;  %v862_v5 = vrot.slane %v860_v38, 4  ;;  %v873_v10 = vshrl.u32 %v7943_v23, 16  ;;  %v3190_v58 = vsel %vm7606_vm5, %v3188_v45, %v3189_v9  ;;  %v7980_v13 = vld [vmem:[%s7422_s30 + $0x7c] sm:$0xf] }
  0x83   : > { %6429 = vmatpush3.bf16.msra.mxu1 %v7166_v56  ;;  %v7174_v56 = vld [vmem:[%s9005_s1 + $0xb8] sm:$0xff]   ;;  %v834_v21 = vsel %vm7458_vm2, %v829_v60, %v833_v57  ;;  %v848_v11 = vsel %vm7458_vm2, %v843_v27, %v847_v16  ;;  %v7966_v57 = vld [vmem:[%s7422_s30 + $0x74] sm:$0x1]  ;;  %v865_v15 = vrot.slane %v863_v49, 5  ;;  %v871_v32 = vrot.slane %v869_v52, 5 }
  0x84   : > { %6430 = vmatprep.subr.bf16.mxu1 %v7170_v7  ;;  %v5562_v28 = vcombine.low %v824_v12, %v834_v21  ;;  %v858_v61 = vsel %vm7458_vm2, %v853_v14, %v857_v29  ;;  %v5859_v0 = vcombine.low %v3187_v43, %v3190_v58  ;;  %v875_v1 = vrot.slane %v873_v10, 4  ;;  %v646_v12 = vld [vmem:[%s7422_s30 + $0x78] sm:$0xf]  ;;  %v7984_v29 = vld [vmem:[%s7422_s30 + $0x80] sm:$0x1]  ;;  %v7165_v58 = vld [vmem:[%s7422_s30 + $0x30] sm:$0xff]  }
  0x85   : > { %v884_v2 = vshrl.u32 %v643_v44, 16  ;;  %v5563_v41 = vcombine.low %v848_v11, %v858_v61  ;;  %v866_v40 = vor.u32 %v865_v15, %v862_v5  ;;  %v887_v60 = vshll.u32 %v643_v44, 16  ;;  %v649_v49 = vld [vmem:[%s7422_s30 + $0x84] sm:$0xf]  ;;  %v7993_v52 = vld [vmem:[%s7422_s30 + $0x88] sm:$0xf] }
  0x86   : > { %6398 = vmatprep.mubr.bf16.mxu1 %v5562_v28  ;;  %v876_v53 = vor.u32 %v875_v1, %v871_v32  ;;  %v893_v48 = vshll.u32 %v7955_v63, 16  ;;  %v897_v42 = vshrl.u32 %v7955_v63, 16  ;;  %v903_v18 = vshll.u32 %v7966_v57, 16  ;;  %v7163_v28 = vld [vmem:[%s7422_s30 + $0x24] sm:$0xff]   ;;  %v7999_v15 = vld [vmem:[%s7422_s30 + $0x8c] sm:$0x1] }
  0x87   : > { %6431 = vmatpush3.bf16.msra.mxu1 %v7170_v7  ;;  %v7948_v7 = vld [vmem:[%s7422_s30 + $0x68] sm:$0x1]  ;;  %v886_v55 = vrot.slane %v884_v2, 4  ;;  %v867_v54 = vrot.slane %v866_v40, 4  ;;  %v889_v16 = vrot.slane %v887_v60, 5  ;;  %v908_v21 = vshrl.u32 %v646_v12, 16 }
  0x88   : > { %6432 = vmatprep.subr.bf16.mxu1 %v7174_v56  ;;  %v879_v47 = vshll.u32 %v7948_v7, 16  ;;  %6399 = vmatmul.mubr.bf16.gmra.mrb[12].mxu1 %v5563_v41  ;;  %v877_v24 = vrot.slane %v876_v53, 4  ;;  %v895_v25 = vrot.slane %v893_v48, 5  ;;  %v899_v50 = vrot.slane %v897_v42, 4  ;;  %v7172_v48 = vld [vmem:[%s9005_s1 + $0x1d0] sm:$0xff]  }
  0x89   : > { %6607 = vmatmul.mubr.bf16.gmra.mrb[28].mxu0 %v5859_v0  ;;  %v911_v34 = vshll.u32 %v646_v12, 16  ;;  %v872_v36 = vsel %vm7458_vm2, %v867_v54, %v871_v32  ;;  %v890_v27 = vor.u32 %v889_v16, %v886_v55  ;;  %v905_v8 = vrot.slane %v903_v18, 5  ;;  %v7168_v0 = vld [vmem:[%s9005_s1 + $0x1c8] sm:$0xff]  }
  0x8a   : > { %6626 = vmatprep.mubr.bf16.mxu0 %v7161_v59  ;;  %v910_v9 = vrot.slane %v908_v21, 4  ;;  %v900_v44 = vor.u32 %v899_v50, %v895_v25  ;;  %v917_v45 = vshll.u32 %v7980_v13, 16  ;;  %v921_v5 = vshrl.u32 %v7980_v13, 16 }
  0x8b   : > { %6433 = vmatpush3.bf16.msra.mxu1 %v7174_v56  ;;  %v881_v56 = vrot.slane %v879_v47, 5  ;;  %v913_v43 = vrot.slane %v911_v34, 5  ;;  %v891_v14 = vrot.slane %v890_v27, 4  ;;  %v927_v10 = vshll.u32 %v7984_v29, 16  ;;  %v8023_v27 = vld [vmem:[%s7422_s30 + $0x98] sm:$0x1] }
  0x8c   : > { %6466 = vmatprep.subr.bf16.mxu1 %v7960_v4  ;;  %v901_v32 = vrot.slane %v900_v44, 4  ;;  %v919_v59 = vrot.slane %v917_v45, 5  ;;  %v932_v61 = vshrl.u32 %v649_v49, 16  ;;  %v923_v2 = vrot.slane %v921_v5, 4  ;;  %v655_v5 = vld [vmem:[%s7422_s30 + $0x9c] sm:$0xf] }
  0x8d   : > { %v882_v38 = vsel %vm7458_vm2, %v877_v24, %v881_v56  ;;  %v914_v47 = vor.u32 %v913_v43, %v910_v9  ;;  %v896_v1 = vsel %vm7458_vm2, %v891_v14, %v895_v25  ;;  %v929_v41 = vrot.slane %v927_v10, 5  ;;  %v7167_v24 = vld [vmem:[%s7422_s30 + $0x3c] sm:$0xff]   ;;  %v652_v25 = vld [vmem:[%s7422_s30 + $0x90] sm:$0xf] }
  0x8e   : > { %v5564_v11 = vcombine.low %v872_v36, %v882_v38  ;;  %v935_v40 = vshll.u32 %v649_v49, 16  ;;  %v906_v56 = vsel %vm7458_vm2, %v901_v32, %v905_v8  ;;  %v934_v53 = vrot.slane %v932_v61, 4  ;;  %v8020_v36 = vld [vmem:[%s7422_s30 + $0x94] sm:$0xf]  ;;  %v7169_v8 = vld [vmem:[%s7422_s30 + $0x48] sm:$0xff]   ;;  %v7176_v61 = vld [vmem:[%s9005_s1 + $0x1d8] sm:$0xff]  }
  0x8f   : > { %v915_v60 = vrot.slane %v914_v47, 4  ;;  %v941_v55 = vshll.u32 %v7993_v52, 16  ;;  %v5565_v42 = vcombine.low %v896_v1, %v906_v56  ;;  %v924_v12 = vor.u32 %v923_v2, %v919_v59 }
  0x90   : > { %6402 = vmatprep.mubr.bf16.mxu1 %v5564_v11  ;;  %v937_v54 = vrot.slane %v935_v40, 5  ;;  %v945_v16 = vshrl.u32 %v7993_v52, 16  ;;  %v951_v21 = vshll.u32 %v7999_v15, 16  ;;  %v956_v38 = vshrl.u32 %v652_v25, 16  ;;  %v8041_v40 = vld [vmem:[%s7422_s30 + $0xa4] sm:$0x1] }
  0x91   : > { %6627 = vmatmul.mubr.bf16.vlgmr.msra.gmra.mrb[0].mxu0 %v7163_v28  ;;  %v943_v18 = vrot.slane %v941_v55, 5  ;;  %6403 = vmatmul.mubr.bf16.gmra.mrb[16].mxu1 %v5565_v42  ;;  %v920_v50 = vsel %vm7458_vm2, %v915_v60, %v919_v59  ;;  %v925_v28 = vrot.slane %v924_v12, 4  ;;  %v959_v44 = vshll.u32 %v652_v25, 16  ;;  %v8032_v59 = vld [vmem:[%s7422_s30 + $0xa0] sm:$0xf] }
  0x92   : > { %6659 = vmatpush3.bf16.msra.mxu0 %v7864_v22  ;;  %6630 = vmatprep.mubr.bf16.mxu0 %v7165_v58  ;;  %v938_v22 = vor.u32 %v937_v54, %v934_v53  ;;  %v947_v34 = vrot.slane %v945_v16, 4  ;;  %v953_v9 = vrot.slane %v951_v21, 5  ;;  %v965_v43 = vshll.u32 %v8020_v36, 16 }
  0x93   : > { %6660 = vmatprep.subr.bf16.mxu0 %v7168_v0  ;;  %v930_v45 = vsel %vm7458_vm2, %v925_v28, %v929_v41  ;;  %v969_v14 = vshrl.u32 %v8020_v36, 16  ;;  %v958_v58 = vrot.slane %v956_v38, 4  ;;  %v961_v32 = vrot.slane %v959_v44, 5  ;;  %v7180_v28 = vld [vmem:[%s9005_s1 + $0x1e0] sm:$0xff]  }
  0x94   : > { %v939_v49 = vrot.slane %v938_v22, 4  ;;  %v948_v11 = vor.u32 %v947_v34, %v943_v18  ;;  %v5566_v10 = vcombine.low %v920_v50, %v930_v45  ;;  %v967_v47 = vrot.slane %v965_v43, 5  ;;  %v7171_v50 = vld [vmem:[%s7422_s30 + $0x54] sm:$0xff]   ;;  %v7173_v38 = vld [vmem:[%s7422_s30 + $0x60] sm:$0xff]   ;;  %v658_v43 = vld [vmem:[%s7422_s30 + $0xa8] sm:$0xf] }
  0x95   : > { %v971_v41 = vrot.slane %v969_v14, 4  ;;  %v962_v56 = vor.u32 %v961_v32, %v958_v58  ;;  %v980_v60 = vshrl.u32 %v655_v5, 16  ;;  %v983_v53 = vshll.u32 %v655_v5, 16  ;;  %v8057_v45 = vld [vmem:[%s7422_s30 + $0xac] sm:$0xf] }
  0x96   : > { %6661 = vmatpush3.bf16.msra.mxu0 %v7168_v0  ;;  %v944_v1 = vsel %vm7458_vm2, %v939_v49, %v943_v18  ;;  %v949_v2 = vrot.slane %v948_v11, 4  ;;  %v975_v0 = vshll.u32 %v8023_v27, 16  ;;  %6406 = vmatprep.mubr.bf16.mxu1 %v5566_v10  ;;  %v989_v55 = vshll.u32 %v8032_v59, 16  ;;  %v8062_v5 = vld [vmem:[%s7422_s30 + $0xb0] sm:$0x1] }
  0x97   : > { %6662 = vmatprep.subr.bf16.mxu0 %v7172_v48  ;;  %v972_v12 = vor.u32 %v971_v41, %v967_v47  ;;  %v993_v16 = vshrl.u32 %v8032_v59, 16  ;;  %v963_v21 = vrot.slane %v962_v56, 4  ;;  %v985_v25 = vrot.slane %v983_v53, 5  ;;  %v661_v53 = vld [vmem:[%s7422_s30 + $0xb4] sm:$0xf] }
  0x98   : > { %v954_v42 = vsel %vm7458_vm2, %v949_v2, %v953_v9  ;;  %v977_v54 = vrot.slane %v975_v0, 5  ;;  %v991_v34 = vrot.slane %v989_v55, 5  ;;  %v1004_v10 = vshrl.u32 %v658_v43, 16  ;;  %v7184_v2 = vld [vmem:[%s9005_s1 + $0x1e8] sm:$0xff]  }
  0x99   : > { %6631 = vmatmul.mubr.bf16.gmra.mrb[4].mxu0 %v7167_v24  ;;  %v5567_v18 = vcombine.low %v944_v1, %v954_v42  ;;  %v982_v24 = vrot.slane %v980_v60, 4  ;;  %v973_v22 = vrot.slane %v972_v12, 4  ;;  %v995_v9 = vrot.slane %v993_v16, 4  ;;  %v8074_v12 = vld [vmem:[%s7422_s30 + $0xb8] sm:$0xf] }
  0x9a   : > { %6634 = vmatprep.mubr.bf16.mxu0 %v7169_v8  ;;  %6663 = vmatpush3.bf16.msra.mxu0 %v7172_v48  ;;  %v999_v8 = vshll.u32 %v8041_v40, 16  ;;  %v968_v48 = vsel %vm7458_vm2, %v963_v21, %v967_v47  ;;  %v1007_v1 = vshll.u32 %v658_v43, 16  ;;  %v1013_v47 = vshll.u32 %v8057_v45, 16 }
  0x9b   : > { %6664 = vmatprep.subr.bf16.mxu0 %v7176_v61  ;;  %6407 = vmatmul.mubr.bf16.gmra.mrb[20].mxu1 %v5567_v18  ;;  %v986_v44 = vor.u32 %v985_v25, %v982_v24  ;;  %v978_v49 = vsel %vm7458_vm2, %v973_v22, %v977_v54  ;;  %v996_v11 = vor.u32 %v995_v9, %v991_v34  ;;  %v1006_v0 = vrot.slane %v1004_v10, 4  ;;  %v8077_v54 = vld [vmem:[%s7422_s30 + $0xbc] sm:$0x1]  ;;  %v7188_v25 = vld [vmem:[%s9005_s1 + $0x1f0] sm:$0xff]   ;;  %v7221_v10 = vld [vmem:[%s7422_s30 + $0x4] sm:$0xf] }
  0x9c   : > { %v1001_v14 = vrot.slane %v999_v8, 5  ;;  %v5568_v58 = vcombine.low %v968_v48, %v978_v49  ;;  %v1017_v56 = vshrl.u32 %v8057_v45, 16  ;;  %v1023_v60 = vshll.u32 %v8062_v5, 16  ;;  %v7175_v8 = vld [vmem:[%s7422_s30 + $0x6c] sm:$0xff]  }
  0x9d   : > { %v987_v32 = vrot.slane %v986_v44, 4  ;;  %v997_v41 = vrot.slane %v996_v11, 4  ;;  %v1009_v55 = vrot.slane %v1007_v1, 5  ;;  %v1015_v42 = vrot.slane %v1013_v47, 5 }
  0x9e   : > { %6665 = vmatpush3.bf16.msra.mxu0 %v7176_v61  ;;  %6410 = vmatprep.mubr.bf16.mxu1 %v5568_v58  ;;  %v1019_v18 = vrot.slane %v1017_v56, 4  ;;  %v1025_v21 = vrot.slane %v1023_v60, 5  ;;  %v1028_v24 = vshrl.u32 %v661_v53, 16  ;;  %v1037_v9 = vshll.u32 %v8074_v12, 16 }
  0x9f   : > { %6666 = vmatprep.subr.bf16.mxu0 %v7180_v28  ;;  %v992_v61 = vsel %vm7458_vm2, %v987_v32, %v991_v34  ;;  %v1002_v16 = vsel %vm7458_vm2, %v997_v41, %v1001_v14  ;;  %v1010_v22 = vor.u32 %v1009_v55, %v1006_v0  ;;  %v1031_v34 = vshll.u32 %v661_v53, 16  ;;  %v7192_v32 = vld [vmem:[%s9005_s1 + $0x1f8] sm:$0xff]   ;;  %v7222_v0 = vld [vmem:[%s7422_s30 + $0x8] sm:$0x1] }
  0xa0   : > { %v1020_v48 = vor.u32 %v1019_v18, %v1015_v42  ;;  %v1030_v44 = vrot.slane %v1028_v24, 4  ;;  %v1041_v43 = vshrl.u32 %v8074_v12, 16  ;;  %v1039_v14 = vrot.slane %v1037_v9, 5  ;;  %v7224_v9 = vld [vmem:[%s7422_s30 + $0x14] sm:$0x1] }
  0xa1   : > { %6635 = vmatmul.mubr.bf16.gmra.mrb[8].mxu0 %v7171_v50  ;;  %v5569_v50 = vcombine.low %v992_v61, %v1002_v16  ;;  %v1011_v49 = vrot.slane %v1010_v22, 4  ;;  %v1033_v11 = vrot.slane %v1031_v34, 5  ;;  %v1442_v58 = vrot.slane %v7221_v10, 5  ;;  %v1373_v61 = vld [vmem:[%s7422_s30] sm:$0xe] }
  0xa2   : > { %6638 = vmatprep.mubr.bf16.mxu0 %v7173_v38  ;;  %6667 = vmatpush3.bf16.msra.mxu0 %v7180_v28  ;;  %v1047_v38 = vshll.u32 %v8077_v54, 16  ;;  %v7177_v28 = vld [vmem:[%s7422_s30 + $0x78] sm:$0xff]   ;;  %v1021_v1 = vrot.slane %v1020_v48, 4  ;;  %v1043_v47 = vrot.slane %v1041_v43, 4  ;;  %v1445_v56 = vrot.slane %v7222_v0, 5 }
  0xa3   : > { %6668 = vmatprep.subr.bf16.mxu0 %v7184_v2  ;;  %6411 = vmatmul.mubr.bf16.gmra.mrb[24].mxu1 %v5569_v50  ;;  %v1016_v60 = vsel %vm7458_vm2, %v1011_v49, %v1015_v42  ;;  %v1034_v53 = vor.u32 %v1033_v11, %v1030_v44  ;;  %v1444_v55 = vrot.slane %v1442_v58, 4  ;;  %v7223_v16 = vld [vmem:[%s7422_s30 + $0x10] sm:$0xf]  ;;  %v5580_v22 = vrot.slane %v1373_v61, 9  ;;  %v1374_v34 = vld [vmem:[%s7422_s30 + $0xc] sm:$0xe] }
  0xa4   : > { %v1049_v41 = vrot.slane %v1047_v38, 5  ;;  %v1449_v18 = vrot.slane %v7223_v16, 5  ;;  %v1026_v24 = vsel %vm7458_vm2, %v1021_v1, %v1025_v21  ;;  %v1044_v50 = vor.u32 %v1043_v47, %v1039_v14  ;;  %v1375_v10 = vld [vmem:[%s7422_s30 + $0x18] sm:$0xe]  ;;  %v7181_v16 = vld [vmem:[%s7422_s30 + $0x90] sm:$0xff]  }
  0xa5   : > { %v1452_v48 = vrot.slane %v7224_v9, 5  ;;  %v1035_v43 = vrot.slane %v1034_v53, 4  ;;  %v1446_v42 = vsel %vm7606_vm5, %v1444_v55, %v1445_v56  ;;  %v5581_v44 = vrot.slane %v1374_v34, 9  ;;  %v7225_v56 = vld [vmem:[%s7422_s30 + $0x1c] sm:$0xf] }
  0xa6   : > { %6669 = vmatpush3.bf16.msra.mxu0 %v7184_v2  ;;  %v5570_v2 = vcombine.low %v1016_v60, %v1026_v24  ;;  %v1045_v38 = vrot.slane %v1044_v50, 4  ;;  %v1443_v21 = vsel %vm7606_vm5, %v5580_v22, %v1442_v58  ;;  %v1451_v49 = vrot.slane %v1449_v18, 4 }
  0xa7   : > { %6670 = vmatprep.subr.bf16.mxu0 %v7188_v25  ;;  %v1040_v11 = vsel %vm7458_vm2, %v1035_v43, %v1039_v14  ;;  %v5612_v47 = vcombine.low %v1443_v21, %v1446_v42  ;;  %v5582_v0 = vrot.slane %v1375_v10, 9  ;;  %v1456_v60 = vrot.slane %v7225_v56, 5  ;;  %v1378_v43 = vld [vmem:[%s7422_s30 + $0x3c] sm:$0xe]  ;;  %v8135_v42 = vld [vmem:[%s9005_s1 + $0x200] sm:$0xff]  }
  0xa8   : > { %6414 = vmatprep.mubr.bf16.mxu1 %v5570_v2  ;;  %v1050_v1 = vsel %vm7458_vm2, %v1045_v38, %v1049_v41  ;;  %v1463_v61 = vrot.slane %v7789_v19, 5  ;;  %v1466_v24 = vrot.slane %v7806_v37, 5  ;;  %v1470_v50 = vrot.slane %v7835_v6, 5  ;;  %v1377_v19 = vld [vmem:[%s7422_s30 + $0x30] sm:$0xe]  ;;  %v7182_v38 = vld [vmem:[%s9005_s1 + $0xc8] sm:$0xff]  }
  0xa9   : > { %6639 = vmatmul.mubr.bf16.gmra.mrb[12].mxu0 %v7175_v8  ;;  %v7179_v8 = vld [vmem:[%s7422_s30 + $0x84] sm:$0xff]   ;;  %v5571_v58 = vcombine.low %v1040_v11, %v1050_v1  ;;  %v1458_v55 = vrot.slane %v1456_v60, 4  ;;  %v1450_v22 = vsel %vm7606_vm5, %v5581_v44, %v1449_v18  ;;  %v1453_v34 = vsel %vm7606_vm5, %v1451_v49, %v1452_v48  ;;  %v7183_v21 = vld [vmem:[%s7422_s30 + $0x9c] sm:$0xff]  }
  0xaa   : > { %6642 = vmatprep.mubr.bf16.mxu0 %v7177_v28  ;;  %6671 = vmatpush3.bf16.msra.mxu0 %v7188_v25  ;;  %v7226_v28 = vld [vmem:[%s7422_s30 + $0x20] sm:$0x1]  ;;  %v1376_v25 = vld [vmem:[%s7422_s30 + $0x24] sm:$0xe]  ;;  %v1465_v41 = vrot.slane %v1463_v61, 4  ;;  %v1457_v9 = vsel %vm7606_vm5, %v5582_v0, %v1456_v60  ;;  %v1472_v2 = vrot.slane %v1470_v50, 4  ;;  %v5613_v44 = vcombine.low %v1450_v22, %v1453_v34 }
  0xab   : > { %6672 = vmatprep.subr.bf16.mxu0 %v7192_v32  ;;  %v1459_v53 = vrot.slane %v7226_v28, 5  ;;  %v5583_v14 = vrot.slane %v1376_v25, 9  ;;  %6415 = vmatmul.mubr.bf16.gmra.mrb[28].mxu1 %v5571_v58  ;;  %v1473_v6 = vrot.slane %v7843_v31, 5  ;;  %v1477_v18 = vrot.slane %v7869_v39, 5  ;;  %v1379_v0 = vld [vmem:[%s7422_s30 + $0x48] sm:$0xe] }
  0xac   : > { %6434 = vmatprep.mubr.bf16.mxu1 %v5612_v47  ;;  %v1480_v48 = vrot.slane %v7872_v51, 5  ;;  %v5585_v49 = vrot.slane %v1378_v43, 9  ;;  %v1484_v31 = vrot.slane %v7897_v20, 5  ;;  %v1487_v51 = vrot.slane %v7900_v17, 5  ;;  %v7186_v25 = vld [vmem:[%s9005_s1 + $0xd0] sm:$0xff]  }
  0xad   : > { %v1460_v37 = vsel %vm7606_vm5, %v1458_v55, %v1459_v53  ;;  %v1479_v39 = vrot.slane %v1477_v18, 4  ;;  %v1464_v10 = vsel %vm7606_vm5, %v5583_v14, %v1463_v61  ;;  %v1467_v1 = vsel %vm7606_vm5, %v1465_v41, %v1466_v24  ;;  %v1380_v61 = vld [vmem:[%s7422_s30 + $0x54] sm:$0xe]  ;;  %v5941_v43 = vld [vmem:[%s7422_s30 + $0x1c] sm:$0xf] }
  0xae   : > { %6673 = vmatpush3.bf16.msra.mxu0 %v7192_v32  ;;  %v5584_v32 = vrot.slane %v1377_v19, 9  ;;  %v5614_v11 = vcombine.low %v1457_v9, %v1460_v37  ;;  %v8151_v47 = vsel %vm7606_vm5, %v5585_v49, %v1477_v18  ;;  %v2548_v20 = vsel %vm7458_vm2, %v7798_v26, %v7775_v62  ;;  %v1381_v19 = vld [vmem:[%s7422_s30 + $0x60] sm:$0xe]  ;;  %v7241_v62 = vld [vmem:[%s7422_s30 + $0x94] sm:$0xf] }
  0xaf   : > { %6706 = vmatprep.subr.bf16.mxu0 %v8135_v42  ;;  %v8162_v56 = vsel %vm7606_vm5, %v1479_v39, %v1480_v48  ;;  %v5586_v60 = vrot.slane %v1379_v0, 9  ;;  %v1486_v58 = vrot.slane %v1484_v31, 4  ;;  %v1474_v28 = vsel %vm7606_vm5, %v1472_v2, %v1473_v6 }
  0xb0   : > { %v1471_v17 = vsel %vm7606_vm5, %v5584_v32, %v1470_v50  ;;  %v5617_v53 = vcombine.low %v8151_v47, %v8162_v56  ;;  %v1491_v55 = vrot.slane %v7921_v35, 5  ;;  %v5587_v41 = vrot.slane %v1380_v61, 9  ;;  %v7187_v32 = vld [vmem:[%s7422_s30 + $0xb4] sm:$0xff]  }
  0xb1   : > { %6643 = vmatmul.mubr.bf16.gmra.mrb[16].mxu0 %v7179_v8  ;;  %v7185_v8 = vld [vmem:[%s7422_s30 + $0xa8] sm:$0xff]   ;;  %v8177_v14 = vsel %vm7606_vm5, %v5586_v60, %v1484_v31  ;;  %v8181_v24 = vsel %vm7606_vm5, %v1486_v58, %v1487_v51  ;;  %v1498_v50 = vrot.slane %v7943_v23, 5  ;;  %v5615_v22 = vcombine.low %v1464_v10, %v1467_v1  ;;  %v7189_v51 = vld [vmem:[%s7422_s30 + $0xc0] sm:$0xff]  }
  0xb2   : > { %6646 = vmatprep.mubr.bf16.mxu0 %v7181_v16  ;;  %v1494_v16 = vrot.slane %v7924_v46, 5  ;;  %v5618_v35 = vcombine.low %v8177_v14, %v8181_v24  ;;  %v1493_v46 = vrot.slane %v1491_v55, 4  ;;  %v8189_v34 = vsel %vm7606_vm5, %v5587_v41, %v1491_v55  ;;  %v1382_v31 = vld [vmem:[%s7422_s30 + $0x6c] sm:$0xe]  ;;  %v7193_v55 = vld [vmem:[%s9005_s1 + $0xe0] sm:$0xff]  }
  0xb3   : > { %6435 = vmatmul.mubr.bf16.vlgmr.msra.gmra.mrb[0].mxu1 %v5613_v44  ;;  %v1500_v23 = vrot.slane %v1498_v50, 4  ;;  %v1505_v9 = vrot.slane %v7955_v63, 5  ;;  %v5616_v37 = vcombine.low %v1471_v17, %v1474_v28  ;;  %v5588_v6 = vrot.slane %v1381_v19, 9  ;;  %v5942_v63 = vld [vmem:[%s7422_s30 + $0x20] sm:$0x1] }
  0xb4   : > { %6467 = vmatpush3.bf16.msra.mxu1 %v7960_v4  ;;  %6438 = vmatprep.mubr.bf16.mxu1 %v5614_v11  ;;  %v1501_v4 = vrot.slane %v7948_v7, 5  ;;  %v8196_v2 = vsel %vm7606_vm5, %v1493_v46, %v1494_v16  ;;  %v5940_v7 = vld [vmem:[%s7422_s30 + $0x18] sm:$0xf]  ;;  %v1508_v18 = vrot.slane %v7966_v57, 5  ;;  %v3968_v39 = vshll.u32 %v5942_v63, 16 }
  0xb5   : > { %6468 = vmatprep.subr.bf16.mxu1 %v7182_v38  ;;  %v5619_v48 = vcombine.low %v8189_v34, %v8196_v2  ;;  %v3952_v49 = vshll.u32 %v5940_v7, 16  ;;  %v7190_v11 = vld [vmem:[%s9005_s1 + $0xd8] sm:$0xff]   ;;  %v8214_v57 = vsel %vm7606_vm5, %v5588_v6, %v1498_v50  ;;  %v5589_v17 = vrot.slane %v1382_v31, 9  ;;  %v5943_v16 = vld [vmem:[%s7422_s30 + $0x24] sm:$0xf] }
  0xb6   : > { %v8205_v44 = vsel %vm7606_vm5, %v1500_v23, %v1501_v4  ;;  %v3970_v28 = vrot.slane %v3968_v39, 5  ;;  %v1507_v61 = vrot.slane %v1505_v9, 4  ;;  %v8228_v46 = vld [vmem:[%s7422_s30 + $0x28] sm:$0xf]  ;;  %v8231_v4 = vld [vmem:[%s7422_s30 + $0x2c] sm:$0x1] }
  0xb7   : > { %v5620_v10 = vcombine.low %v8214_v57, %v8205_v44  ;;  %v3954_v0 = vrot.slane %v3952_v49, 5  ;;  %v8225_v50 = vsel %vm7606_vm5, %v5589_v17, %v1505_v9  ;;  %v3976_v19 = vshll.u32 %v5943_v16, 16  ;;  %v5946_v17 = vld [vmem:[%s7422_s30 + $0x30] sm:$0xf] }
  0xb8   : > { %6469 = vmatpush3.bf16.msra.mxu1 %v7182_v38  ;;  %v3958_v38 = vshll.u32 %v5941_v43, 16  ;;  %v3986_v9 = vshrl.u32 %v8228_v46, 16  ;;  %v1529_v57 = vrot.slane %v8023_v27, 5  ;;  %v7198_v27 = vld [vmem:[%s9005_s1 + $0x210] sm:$0xff]   ;;  %v2583_v26 = vshll.u32 %v7241_v62, 16 }
  0xb9   : > { %6647 = vmatmul.mubr.bf16.gmra.mrb[20].mxu0 %v7183_v21  ;;  %v3949_v21 = vshrl.u32 %v5940_v7, 16  ;;  %6470 = vmatprep.subr.bf16.mxu1 %v7186_v25  ;;  %v3978_v63 = vrot.slane %v3976_v19, 5 }
  0xba   : > { %6650 = vmatprep.mubr.bf16.mxu0 %v7185_v8  ;;  %v3962_v8 = vshrl.u32 %v5941_v43, 16  ;;  %v3960_v60 = vrot.slane %v3958_v38, 5  ;;  %v3992_v38 = vshll.u32 %v8231_v4, 16 }
  0xbb   : > { %v3951_v1 = vrot.slane %v3949_v21, 4  ;;  %6439 = vmatmul.mubr.bf16.gmra.mrb[4].mxu1 %v5615_v22  ;;  %v3973_v22 = vshrl.u32 %v5943_v16, 16  ;;  %v7191_v21 = vld [vmem:[%s7422_s30 + $0xcc] sm:$0xff]  }
  0xbc   : > { %v3964_v58 = vrot.slane %v3962_v8, 4  ;;  %6442 = vmatprep.mubr.bf16.mxu1 %v5616_v37  ;;  %6471 = vmatpush3.bf16.msra.mxu1 %v7186_v25  ;;  %v8235_v37 = vsel %vm7606_vm5, %v1507_v61, %v1508_v18  ;;  %v3982_v25 = vshll.u32 %v8228_v46, 16  ;;  %v3988_v18 = vrot.slane %v3986_v9, 4  ;;  %v7195_v8 = vld [vmem:[%s9005_s1 + $0xe8] sm:$0xff]  }
  0xbd   : > { %v3955_v41 = vor.u32 %v3954_v0, %v3951_v1  ;;  %6472 = vmatprep.subr.bf16.mxu1 %v7190_v11  ;;  %v5621_v7 = vcombine.low %v8225_v50, %v8235_v37  ;;  %v3975_v43 = vrot.slane %v3973_v22, 4  ;;  %v1512_v0 = vrot.slane %v7980_v13, 5  ;;  %v1387_v37 = vld [vmem:[%s7422_s30 + $0xa8] sm:$0xe] }
  0xbe   : > { %v3965_v23 = vor.u32 %v3964_v58, %v3960_v60  ;;  %v3984_v31 = vrot.slane %v3982_v25, 5  ;;  %v8252_v58 = vld [vmem:[%s7422_s30 + $0x34] sm:$0xf]  ;;  %v1515_v22 = vrot.slane %v7984_v29, 5  ;;  %v3997_v25 = vshrl.u32 %v5946_v17, 16 }
  0xbf   : > { %v3956_v6 = vrot.slane %v3955_v41, 4  ;;  %v3994_v41 = vrot.slane %v3992_v38, 5  ;;  %v4000_v9 = vshll.u32 %v5946_v17, 16  ;;  %v1384_v29 = vld [vmem:[%s7422_s30 + $0x84] sm:$0xe]  ;;  %v4010_v56 = vshrl.u32 %v8252_v58, 16 }
  0xc0   : > { %v3966_v49 = vrot.slane %v3965_v23, 4  ;;  %6473 = vmatpush3.bf16.msra.mxu1 %v7190_v11  ;;  %v3989_v16 = vor.u32 %v3988_v18, %v3984_v31  ;;  %v8258_v11 = vld [vmem:[%s7422_s30 + $0x38] sm:$0x1]  ;;  %v1514_v23 = vrot.slane %v1512_v0, 4  ;;  %v3999_v24 = vrot.slane %v3997_v25, 4 }
  0xc1   : > { %6651 = vmatmul.mubr.bf16.gmra.mrb[24].mxu0 %v7187_v32  ;;  %v1383_v32 = vld [vmem:[%s7422_s30 + $0x78] sm:$0xe]  ;;  %v3961_v39 = vsel %vm7458_vm2, %v3956_v6, %v3960_v60  ;;  %6474 = vmatprep.subr.bf16.mxu1 %v7193_v55  ;;  %v4006_v6 = vshll.u32 %v8252_v58, 16  ;;  %v4012_v38 = vrot.slane %v4010_v56, 4 }
  0xc2   : > { %6654 = vmatprep.mubr.bf16.mxu0 %v7189_v51  ;;  %v3979_v51 = vor.u32 %v3978_v63, %v3975_v43  ;;  %v5590_v1 = vrot.slane %v1383_v32, 9  ;;  %v3971_v61 = vsel %vm7458_vm2, %v3966_v49, %v3970_v28  ;;  %v3990_v28 = vrot.slane %v3989_v16, 4  ;;  %v7197_v43 = vld [vmem:[%s9005_s1 + $0xf0] sm:$0xff]   ;;  %v5949_v32 = vld [vmem:[%s7422_s30 + $0x3c] sm:$0xf] }
  0xc3   : > { %v6004_v19 = vcombine.low %v3961_v39, %v3971_v61  ;;  %6443 = vmatmul.mubr.bf16.gmra.mrb[8].mxu1 %v5617_v53  ;;  %v8279_v47 = vsel %vm7606_vm5, %v1514_v23, %v1515_v22  ;;  %v4016_v53 = vshll.u32 %v8258_v11, 16  ;;  %v4008_v18 = vrot.slane %v4006_v6, 5  ;;  %v8294_v61 = vld [vmem:[%s7422_s30 + $0x44] sm:$0x1]  ;;  %v7199_v25 = vld [vmem:[%s9005_s1 + $0xf8] sm:$0xff]  }
  0xc4   : > { %v3980_v60 = vrot.slane %v3979_v51, 4  ;;  %v8262_v13 = vsel %vm7606_vm5, %v5590_v1, %v1512_v0  ;;  %6446 = vmatprep.mubr.bf16.mxu1 %v5618_v35  ;;  %6475 = vmatpush3.bf16.msra.mxu1 %v7193_v55  ;;  %v3995_v49 = vsel %vm7458_vm2, %v3990_v28, %v3994_v41  ;;  %v4002_v35 = vrot.slane %v4000_v9, 5  ;;  %v8289_v55 = vld [vmem:[%s7422_s30 + $0x40] sm:$0xf] }
  0xc5   : > { %v5622_v14 = vcombine.low %v8262_v13, %v8279_v47  ;;  %6476 = vmatprep.subr.bf16.mxu1 %v7195_v8  ;;  %v4018_v39 = vrot.slane %v4016_v53, 5  ;;  %v1519_v1 = vrot.slane %v7993_v52, 5  ;;  %v1522_v0 = vrot.slane %v7999_v15, 5  ;;  %v7196_v52 = vld [vmem:[%s9005_s1 + $0x208] sm:$0xff]   ;;  %v1385_v15 = vld [vmem:[%s7422_s30 + $0x90] sm:$0xe] }
  0xc6   : > { %v3985_v63 = vsel %vm7458_vm2, %v3980_v60, %v3984_v31  ;;  %v4003_v51 = vor.u32 %v4002_v35, %v3999_v24  ;;  %v4013_v17 = vor.u32 %v4012_v38, %v4008_v18  ;;  %v4021_v16 = vshrl.u32 %v5949_v32, 16  ;;  %v8328_v35 = vld [vmem:[%s7422_s30 + $0x4c] sm:$0xf] }
  0xc7   : > { %v6005_v31 = vcombine.low %v3985_v63, %v3995_v49  ;;  %v4024_v41 = vshll.u32 %v5949_v32, 16  ;;  %v4030_v22 = vshll.u32 %v8289_v55, 16  ;;  %v1521_v23 = vrot.slane %v1519_v1, 4  ;;  %v5952_v49 = vld [vmem:[%s7422_s30 + $0x48] sm:$0xf] }
  0xc8   : > { %6477 = vmatpush3.bf16.msra.mxu1 %v7195_v8  ;;  %v4034_v28 = vshrl.u32 %v8289_v55, 16  ;;  %v4014_v8 = vrot.slane %v4013_v17, 4  ;;  %v4023_v9 = vrot.slane %v4021_v16, 4  ;;  %v4040_v32 = vshll.u32 %v8294_v61, 16 }
  0xc9   : > { %6655 = vmatmul.mubr.bf16.gmra.mrb[28].mxu0 %v7191_v21  ;;  %v5591_v21 = vrot.slane %v1384_v29, 9  ;;  %6478 = vmatprep.subr.bf16.mxu1 %v7197_v43  ;;  %v4026_v6 = vrot.slane %v4024_v41, 5  ;;  %v4032_v29 = vrot.slane %v4030_v22, 5  ;;  %v8316_v56 = vsel %vm7606_vm5, %v1521_v23, %v1522_v0  ;;  %v1386_v22 = vld [vmem:[%s7422_s30 + $0x9c] sm:$0xe] }
  0xca   : > { %6674 = vmatprep.mubr.bf16.mxu0 %v6004_v19  ;;  %v4004_v19 = vrot.slane %v4003_v51, 4  ;;  %v4036_v53 = vrot.slane %v4034_v28, 4  ;;  %v4019_v34 = vsel %vm7458_vm2, %v4014_v8, %v4018_v39  ;;  %v5592_v24 = vrot.slane %v1385_v15, 9  ;;  %v5955_v8 = vld [vmem:[%s7422_s30 + $0x54] sm:$0xf] }
  0xcb   : > { %v8299_v60 = vsel %vm7606_vm5, %v5591_v21, %v1519_v1  ;;  %6447 = vmatmul.mubr.bf16.gmra.mrb[12].mxu1 %v5619_v48  ;;  %v4027_v48 = vor.u32 %v4026_v6, %v4023_v9  ;;  %v4042_v51 = vrot.slane %v4040_v32, 5  ;;  %v1526_v21 = vrot.slane %v8020_v36, 5  ;;  %v8357_v9 = vld [vmem:[%s7422_s30 + $0x58] sm:$0xf]  ;;  %v8362_v6 = vld [vmem:[%s9005_s1 + $0x100] sm:$0xff]  }
  0xcc   : > { %v4009_v63 = vsel %vm7458_vm2, %v4004_v19, %v4008_v18  ;;  %6450 = vmatprep.mubr.bf16.mxu1 %v5620_v10  ;;  %v5623_v2 = vcombine.low %v8299_v60, %v8316_v56  ;;  %6479 = vmatpush3.bf16.msra.mxu1 %v7197_v43  ;;  %v4037_v38 = vor.u32 %v4036_v53, %v4032_v29  ;;  %v8334_v10 = vld [vmem:[%s7422_s30 + $0x50] sm:$0x1]  ;;  %v4045_v39 = vshrl.u32 %v5952_v49, 16  ;;  %v7200_v32 = vld [vmem:[%s9005_s1 + $0x218] sm:$0xff]  }
  0xcd   : > { %v6006_v18 = vcombine.low %v4009_v63, %v4019_v34  ;;  %6480 = vmatprep.subr.bf16.mxu1 %v7199_v25  ;;  %v4028_v44 = vrot.slane %v4027_v48, 4  ;;  %v4048_v1 = vshll.u32 %v5952_v49, 16  ;;  %v8338_v43 = vsel %vm7606_vm5, %v5592_v24, %v1526_v21  ;;  %v8376_v24 = vld [vmem:[%s7422_s30 + $0x5c] sm:$0x1] }
  0xce   : > { %v4038_v0 = vrot.slane %v4037_v38, 4  ;;  %v1528_v36 = vrot.slane %v1526_v21, 4  ;;  %v4047_v17 = vrot.slane %v4045_v39, 4  ;;  %v4058_v41 = vshrl.u32 %v8328_v35, 16  ;;  %v8392_v39 = vld [vmem:[%s7422_s30 + $0x64] sm:$0xf] }
  0xcf   : > { %v4050_v16 = vrot.slane %v4048_v1, 5  ;;  %v4064_v15 = vshll.u32 %v8334_v10, 16  ;;  %v5593_v34 = vrot.slane %v1386_v22, 9  ;;  %v1533_v48 = vrot.slane %v8032_v59, 5 }
  0xd0   : > { %6481 = vmatpush3.bf16.msra.mxu1 %v7199_v25  ;;  %v4043_v19 = vsel %vm7458_vm2, %v4038_v0, %v4042_v51  ;;  %v8352_v23 = vsel %vm7606_vm5, %v1528_v36, %v1529_v57  ;;  %v4060_v53 = vrot.slane %v4058_v41, 4  ;;  %v4069_v51 = vshrl.u32 %v5955_v8, 16 }
  0xd1   : > { %6675 = vmatmul.mubr.bf16.vlgmr.msra.gmra.mrb[0].mxu0 %v6005_v31  ;;  %v4033_v31 = vsel %vm7458_vm2, %v4028_v44, %v4032_v29  ;;  %6754 = vmatprep.subr.bf16.mxu1 %v8362_v6  ;;  %v5624_v29 = vcombine.low %v8338_v43, %v8352_v23  ;;  %v4051_v63 = vor.u32 %v4050_v16, %v4047_v17  ;;  %v4066_v49 = vrot.slane %v4064_v15, 5  ;;  %v5958_v44 = vld [vmem:[%s7422_s30 + $0x60] sm:$0xf] }
  0xd2   : > { %6707 = vmatpush3.bf16.msra.mxu0 %v8135_v42  ;;  %6678 = vmatprep.mubr.bf16.mxu0 %v6006_v18  ;;  %v4054_v42 = vshll.u32 %v8328_v35, 16  ;;  %v6007_v25 = vcombine.low %v4033_v31, %v4043_v19  ;;  %v4072_v50 = vshll.u32 %v5955_v8, 16  ;;  %v1535_v59 = vrot.slane %v1533_v48, 4  ;;  %v7203_v16 = vld [vmem:[%s9005_s1 + $0x220] sm:$0xff]  }
  0xd3   : > { %6708 = vmatprep.subr.bf16.mxu0 %v7196_v52  ;;  %6451 = vmatmul.mubr.bf16.gmra.mrb[16].mxu1 %v5621_v7  ;;  %v4052_v18 = vrot.slane %v4051_v63, 4  ;;  %v8384_v7 = vsel %vm7606_vm5, %v5593_v34, %v1533_v48  ;;  %v4082_v21 = vshrl.u32 %v8357_v9, 16  ;;  %v4088_v36 = vshll.u32 %v8376_v24, 16 }
  0xd4   : > { %v4056_v28 = vrot.slane %v4054_v42, 5  ;;  %6454 = vmatprep.mubr.bf16.mxu1 %v5622_v14  ;;  %v4071_v14 = vrot.slane %v4069_v51, 4  ;;  %v4074_v57 = vrot.slane %v4072_v50, 5  ;;  %v5594_v17 = vrot.slane %v1387_v37, 9  ;;  %v8431_v50 = vld [vmem:[%s7422_s30 + $0x70] sm:$0xf] }
  0xd5   : > { %v4084_v43 = vrot.slane %v4082_v21, 4  ;;  %v4090_v19 = vrot.slane %v4088_v36, 5  ;;  %v1540_v23 = vrot.slane %v8057_v45, 5  ;;  %v1543_v8 = vrot.slane %v8062_v5, 5  ;;  %v7206_v5 = vld [vmem:[%s9005_s1 + $0x228] sm:$0xff]  }
  0xd6   : > { %6709 = vmatpush3.bf16.msra.mxu0 %v7196_v52  ;;  %v1536_v52 = vrot.slane %v8041_v40, 5  ;;  %v4061_v38 = vor.u32 %v4060_v53, %v4056_v28  ;;  %v4078_v40 = vshll.u32 %v8357_v9, 16  ;;  %v4057_v13 = vsel %vm7458_vm2, %v4052_v18, %v4056_v28  ;;  %v8408_v28 = vld [vmem:[%s7422_s30 + $0x68] sm:$0x1]  ;;  %v1388_v53 = vld [vmem:[%s7422_s30 + $0xb4] sm:$0xe] }
  0xd7   : > { %6710 = vmatprep.subr.bf16.mxu0 %v7198_v27  ;;  %v4096_v63 = vshll.u32 %v5958_v44, 16  ;;  %v1541_v45 = vsel %vm7606_vm5, %v5594_v17, %v1540_v23  ;;  %v1542_v34 = vrot.slane %v1540_v23, 4  ;;  %v4102_v48 = vshll.u32 %v8392_v39, 16  ;;  %v8434_v21 = vld [vmem:[%s7422_s30 + $0x74] sm:$0x1] }
  0xd8   : > { %v4062_v47 = vrot.slane %v4061_v38, 4  ;;  %v8396_v1 = vsel %vm7606_vm5, %v1535_v59, %v1536_v52  ;;  %v4080_v0 = vrot.slane %v4078_v40, 5  ;;  %v4112_v51 = vshll.u32 %v8408_v28, 16  ;;  %v8449_v23 = vld [vmem:[%s7422_s30 + $0x7c] sm:$0xf] }
  0xd9   : > { %6679 = vmatmul.mubr.bf16.gmra.mrb[4].mxu0 %v6007_v25  ;;  %v5625_v31 = vcombine.low %v8384_v7, %v8396_v1  ;;  %v4093_v25 = vshrl.u32 %v5958_v44, 16  ;;  %v1544_v18 = vsel %vm7606_vm5, %v1542_v34, %v1543_v8  ;;  %v4104_v38 = vrot.slane %v4102_v48, 5  ;;  %v7209_v44 = vld [vmem:[%s9005_s1 + $0x230] sm:$0xff]   ;;  %v5964_v1 = vld [vmem:[%s7422_s30 + $0x78] sm:$0xf] }
  0xda   : > { %6711 = vmatpush3.bf16.msra.mxu0 %v7198_v27  ;;  %v4067_v42 = vsel %vm7458_vm2, %v4062_v47, %v4066_v49  ;;  %v4075_v27 = vor.u32 %v4074_v57, %v4071_v14  ;;  %v4085_v22 = vor.u32 %v4084_v43, %v4080_v0  ;;  %v5626_v7 = vcombine.low %v1541_v45, %v1544_v18 }
  0xdb   : > { %6712 = vmatprep.subr.bf16.mxu0 %v7200_v32  ;;  %v6008_v41 = vcombine.low %v4057_v13, %v4067_v42  ;;  %6455 = vmatmul.mubr.bf16.gmra.mrb[20].mxu1 %v5623_v2  ;;  %v4095_v56 = vrot.slane %v4093_v25, 4  ;;  %v4098_v2 = vrot.slane %v4096_v63, 5  ;;  %v4114_v13 = vrot.slane %v4112_v51, 5 }
  0xdc   : > { %v4076_v15 = vrot.slane %v4075_v27, 4  ;;  %v4086_v49 = vrot.slane %v4085_v22, 4  ;;  %6458 = vmatprep.mubr.bf16.mxu1 %v5624_v29  ;;  %v5961_v29 = vld [vmem:[%s7422_s30 + $0x6c] sm:$0xf]  ;;  %v5595_v47 = vrot.slane %v1388_v53, 9  ;;  %v1547_v14 = vrot.slane %v8074_v12, 5 }
  0xdd   : > { %6682 = vmatprep.mubr.bf16.mxu0 %v6008_v41  ;;  %v4099_v59 = vor.u32 %v4098_v2, %v4095_v56  ;;  %v1550_v57 = vrot.slane %v8077_v54, 5  ;;  %v4117_v36 = vshrl.u32 %v5961_v29, 16  ;;  %v4120_v42 = vshll.u32 %v5961_v29, 16  ;;  %v8455_v53 = vld [vmem:[%s7422_s30 + $0x80] sm:$0x1] }
  0xde   : > { %6713 = vmatpush3.bf16.msra.mxu0 %v7200_v32  ;;  %v4081_v60 = vsel %vm7458_vm2, %v4076_v15, %v4080_v0  ;;  %v4106_v32 = vshrl.u32 %v8392_v39, 16  ;;  %v4091_v52 = vsel %vm7458_vm2, %v4086_v49, %v4090_v19  ;;  %v1548_v27 = vsel %vm7606_vm5, %v5595_v47, %v1547_v14  ;;  %v7212_v49 = vld [vmem:[%s9005_s1 + $0x238] sm:$0xff]   ;;  %v5970_v47 = vld [vmem:[%s7422_s30 + $0x90] sm:$0xf] }
  0xdf   : > { %6714 = vmatprep.subr.bf16.mxu0 %v7203_v16  ;;  %v6009_v37 = vcombine.low %v4081_v60, %v4091_v52  ;;  %v4100_v0 = vrot.slane %v4099_v59, 4  ;;  %v1549_v17 = vrot.slane %v1547_v14, 4  ;;  %v4130_v41 = vshrl.u32 %v8431_v50, 16  ;;  %v8464_v52 = vld [vmem:[%s7422_s30 + $0x88] sm:$0xf] }
  0xe0   : > { %v4108_v40 = vrot.slane %v4106_v32, 4  ;;  %v4119_v22 = vrot.slane %v4117_v36, 4  ;;  %v4122_v19 = vrot.slane %v4120_v42, 5  ;;  %v4136_v63 = vshll.u32 %v8434_v21, 16 }
  0xe1   : > { %6683 = vmatmul.mubr.bf16.gmra.mrb[8].mxu0 %v6009_v37  ;;  %v4105_v12 = vsel %vm7458_vm2, %v4100_v0, %v4104_v38  ;;  %v1551_v15 = vsel %vm7606_vm5, %v1549_v17, %v1550_v57  ;;  %v4132_v25 = vrot.slane %v4130_v41, 4  ;;  %v4141_v48 = vshrl.u32 %v5964_v1, 16  ;;  %v8469_v37 = vld [vmem:[%s7422_s30 + $0x8c] sm:$0x1] }
  0xe2   : > { %6715 = vmatpush3.bf16.msra.mxu0 %v7203_v16  ;;  %v4109_v43 = vor.u32 %v4108_v40, %v4104_v38  ;;  %v4126_v16 = vshll.u32 %v8431_v50, 16  ;;  %v5627_v45 = vcombine.low %v1548_v27, %v1551_v15  ;;  %v4123_v34 = vor.u32 %v4122_v19, %v4119_v22  ;;  %v7201_v57 = vld [vmem:[%s7422_s30 + $0xc] sm:$0xff]  }
  0xe3   : > { %6716 = vmatprep.subr.bf16.mxu0 %v7206_v5  ;;  %6459 = vmatmul.mubr.bf16.gmra.mrb[24].mxu1 %v5625_v31  ;;  %v4138_v2 = vrot.slane %v4136_v63, 5  ;;  %v4144_v32 = vshll.u32 %v5964_v1, 16  ;;  %v4143_v38 = vrot.slane %v4141_v48, 4  ;;  %v4150_v51 = vshll.u32 %v8449_v23, 16 }
  0xe4   : > { %v4110_v54 = vrot.slane %v4109_v43, 4  ;;  %v4128_v8 = vrot.slane %v4126_v16, 5  ;;  %6462 = vmatprep.mubr.bf16.mxu1 %v5626_v7  ;;  %v4124_v18 = vrot.slane %v4123_v34, 4  ;;  %v4154_v29 = vshrl.u32 %v8449_v23, 16 }
  0xe5   : > { %v4146_v59 = vrot.slane %v4144_v32, 5  ;;  %v4160_v40 = vshll.u32 %v8455_v53, 16  ;;  %v4152_v1 = vrot.slane %v4150_v51, 5  ;;  %v4178_v19 = vshrl.u32 %v8464_v52, 16 }
  0xe6   : > { %6717 = vmatpush3.bf16.msra.mxu0 %v7206_v5  ;;  %v4115_v31 = vsel %vm7458_vm2, %v4110_v54, %v4114_v13  ;;  %v5967_v5 = vld [vmem:[%s7422_s30 + $0x84] sm:$0xf]  ;;  %v4133_v56 = vor.u32 %v4132_v25, %v4128_v8  ;;  %v4129_v14 = vsel %vm7458_vm2, %v4124_v18, %v4128_v8  ;;  %v4156_v0 = vrot.slane %v4154_v29, 4  ;;  %v8480_v54 = vld [vmem:[%s7422_s30 + $0x94] sm:$0xf] }
  0xe7   : > { %6718 = vmatprep.subr.bf16.mxu0 %v7209_v44  ;;  %v6010_v60 = vcombine.low %v4105_v12, %v4115_v31  ;;  %v4165_v13 = vshrl.u32 %v5967_v5, 16  ;;  %v4168_v43 = vshll.u32 %v5967_v5, 16  ;;  %v4147_v36 = vor.u32 %v4146_v59, %v4143_v38  ;;  %v8485_v8 = vld [vmem:[%s7422_s30 + $0x98] sm:$0x1]  ;;  %v5973_v5 = vld [vmem:[%s7422_s30 + $0x9c] sm:$0xf] }
  0xe8   : > { %v4134_v7 = vrot.slane %v4133_v56, 4  ;;  %v4162_v42 = vrot.slane %v4160_v40, 5  ;;  %v4157_v16 = vor.u32 %v4156_v0, %v4152_v1  ;;  %v4174_v12 = vshll.u32 %v8464_v52, 16  ;;  %v7204_v38 = vld [vmem:[%s7422_s30 + $0x24] sm:$0xff]  }
  0xe9   : > { %6686 = vmatprep.mubr.bf16.mxu0 %v6010_v60  ;;  %v4167_v27 = vrot.slane %v4165_v13, 4  ;;  %v4170_v41 = vrot.slane %v4168_v43, 5  ;;  %v4148_v22 = vrot.slane %v4147_v36, 4  ;;  %v4184_v15 = vshll.u32 %v8469_v37, 16 }
  0xea   : > { %6719 = vmatpush3.bf16.msra.mxu0 %v7209_v44  ;;  %v4139_v44 = vsel %vm7458_vm2, %v4134_v7, %v4138_v2  ;;  %v4189_v25 = vshrl.u32 %v5970_v47, 16  ;;  %v4158_v63 = vrot.slane %v4157_v16, 4  ;;  %v4176_v34 = vrot.slane %v4174_v12, 5 }
  0xeb   : > { %6720 = vmatprep.subr.bf16.mxu0 %v7212_v49  ;;  %v6011_v17 = vcombine.low %v4129_v14, %v4139_v44  ;;  %6463 = vmatmul.mubr.bf16.gmra.mrb[28].mxu1 %v5627_v45  ;;  %v4171_v31 = vor.u32 %v4170_v41, %v4167_v27  ;;  %v4192_v48 = vshll.u32 %v5970_v47, 16  ;;  %v7202_v45 = vld [vmem:[%s7422_s30 + $0x18] sm:$0xff]   ;;  %v4180_v60 = vrot.slane %v4178_v19, 4  ;;  %v8498_v47 = vld [vmem:[%s7422_s30 + $0xa0] sm:$0xf] }
  0xec   : > { %6482 = vmatprep.mubr.bf16.mxu1 %v7201_v57  ;;  %v4186_v56 = vrot.slane %v4184_v15, 5  ;;  %v4191_v2 = vrot.slane %v4189_v25, 4  ;;  %v4163_v32 = vsel %vm7458_vm2, %v4158_v63, %v4162_v42  ;;  %v4198_v29 = vshll.u32 %v8480_v54, 16  ;;  %v8501_v14 = vld [vmem:[%s7422_s30 + $0xa4] sm:$0x1] }
  0xed   : > { %6687 = vmatmul.mubr.bf16.gmra.mrb[12].mxu0 %v6011_v17  ;;  %v4172_v18 = vrot.slane %v4171_v31, 4  ;;  %v4194_v51 = vrot.slane %v4192_v48, 5  ;;  %v4181_v59 = vor.u32 %v4180_v60, %v4176_v34  ;;  %v4202_v40 = vshrl.u32 %v8480_v54, 16  ;;  %v5976_v44 = vld [vmem:[%s7422_s30 + $0xa8] sm:$0xf] }
  0xee   : > { %6721 = vmatpush3.bf16.msra.mxu0 %v7212_v49  ;;  %v4153_v49 = vsel %vm7458_vm2, %v4148_v22, %v4152_v1  ;;  %v4208_v13 = vshll.u32 %v8485_v8, 16  ;;  %v4200_v0 = vrot.slane %v4198_v29, 5  ;;  %v4213_v43 = vshrl.u32 %v5973_v5, 16  ;;  %v8512_v31 = vld [vmem:[%s7422_s30 + $0xac] sm:$0xf] }
  0xef   : > { %v6012_v7 = vcombine.low %v4153_v49, %v4163_v32  ;;  %v4177_v57 = vsel %vm7458_vm2, %v4172_v18, %v4176_v34  ;;  %v4195_v1 = vor.u32 %v4194_v51, %v4191_v2  ;;  %v4182_v36 = vrot.slane %v4181_v59, 4  ;;  %v5979_v60 = vld [vmem:[%s7422_s30 + $0xb4] sm:$0xf]  ;;  %v7228_v2 = vld [vmem:[%s9005_s1 + $0x108] sm:$0xff]  }
  0xf0   : > { %v4204_v42 = vrot.slane %v4202_v40, 4  ;;  %v4210_v27 = vrot.slane %v4208_v13, 5  ;;  %v4216_v17 = vshll.u32 %v5973_v5, 16  ;;  %v4215_v41 = vrot.slane %v4213_v43, 4  ;;  %v7205_v13 = vld [vmem:[%s7422_s30 + $0x30] sm:$0xff]  }
  0xf1   : > { %6690 = vmatprep.mubr.bf16.mxu0 %v6012_v7  ;;  %v4196_v16 = vrot.slane %v4195_v1, 4  ;;  %v4222_v12 = vshll.u32 %v8498_v47, 16  ;;  %v4226_v22 = vshrl.u32 %v8498_v47, 16  ;;  %v4187_v19 = vsel %vm7458_vm2, %v4182_v36, %v4186_v56  ;;  %v8534_v43 = vld [vmem:[%s7422_s30 + $0xbc] sm:$0x1] }
  0xf2   : > { %v4205_v15 = vor.u32 %v4204_v42, %v4200_v0  ;;  %v4218_v25 = vrot.slane %v4216_v17, 5  ;;  %v4232_v63 = vshll.u32 %v8501_v14, 16  ;;  %v6013_v34 = vcombine.low %v4177_v57, %v4187_v19  ;;  %v7207_v17 = vld [vmem:[%s7422_s30 + $0x3c] sm:$0xff]   ;;  %v7229_v19 = vld [vmem:[%s9005_s1 + $0x110] sm:$0xff]  }
  0xf3   : > { %6483 = vmatmul.mubr.bf16.vlgmr.msra.gmra.mrb[0].mxu1 %v7202_v45  ;;  %v4201_v48 = vsel %vm7458_vm2, %v4196_v16, %v4200_v0  ;;  %v4224_v5 = vrot.slane %v4222_v12, 5  ;;  %v4228_v49 = vrot.slane %v4226_v22, 4  ;;  %v8518_v45 = vld [vmem:[%s7422_s30 + $0xb0] sm:$0x1]  ;;  %v4240_v29 = vshll.u32 %v5976_v44, 16 }
  0xf4   : > { %6762 = vmatpush3.bf16.msra.mxu1 %v8362_v6  ;;  %6486 = vmatprep.mubr.bf16.mxu1 %v7204_v38  ;;  %v4206_v56 = vrot.slane %v4205_v15, 4  ;;  %v4219_v32 = vor.u32 %v4218_v25, %v4215_v41  ;;  %v4234_v18 = vrot.slane %v4232_v63, 5  ;;  %v4237_v6 = vshrl.u32 %v5976_v44, 16  ;;  %v8525_v38 = vld [vmem:[%s7422_s30 + $0xb8] sm:$0xf] }
  0xf5   : > { %6755 = vmatprep.subr.bf16.mxu1 %v7228_v2  ;;  %6691 = vmatmul.mubr.bf16.gmra.mrb[16].mxu0 %v6013_v34  ;;  %v4229_v51 = vor.u32 %v4228_v49, %v4224_v5  ;;  %v4246_v7 = vshll.u32 %v8512_v31, 16  ;;  %v4250_v59 = vshrl.u32 %v8512_v31, 16  ;;  %v4256_v0 = vshll.u32 %v8518_v45, 16  ;;  %v5982_v41 = vld [vmem:[%s7422_s30 + $0xc0] sm:$0xf] }
  0xf6   : > { %v4211_v40 = vsel %vm7458_vm2, %v4206_v56, %v4210_v27  ;;  %v4220_v57 = vrot.slane %v4219_v32, 4  ;;  %v4239_v1 = vrot.slane %v4237_v6, 4  ;;  %v4242_v44 = vrot.slane %v4240_v29, 5  ;;  %v8544_v25 = vld [vmem:[%s7422_s30 + $0xc4] sm:$0xf] }
  0xf7   : > { %v6014_v36 = vcombine.low %v4201_v48, %v4211_v40  ;;  %v4230_v42 = vrot.slane %v4229_v51, 4  ;;  %v4248_v16 = vrot.slane %v4246_v7, 5  ;;  %v4252_v22 = vrot.slane %v4250_v59, 4  ;;  %v7208_v40 = vld [vmem:[%s7422_s30 + $0x48] sm:$0xff]  }
  0xf8   : > { %6763 = vmatpush3.bf16.msra.mxu1 %v7228_v2  ;;  %v4225_v12 = vsel %vm7458_vm2, %v4220_v57, %v4224_v5  ;;  %v4258_v27 = vrot.slane %v4256_v0, 5  ;;  %v4261_v15 = vshrl.u32 %v5979_v60, 16  ;;  %v4243_v34 = vor.u32 %v4242_v44, %v4239_v1  ;;  %v7230_v0 = vld [vmem:[%s9005_s1 + $0x118] sm:$0xff]  }
  0xf9   : > { %6756 = vmatprep.subr.bf16.mxu1 %v7229_v19  ;;  %6694 = vmatprep.mubr.bf16.mxu0 %v6014_v36  ;;  %v4235_v63 = vsel %vm7458_vm2, %v4230_v42, %v4234_v18  ;;  %v4264_v48 = vshll.u32 %v5979_v60, 16  ;;  %v4270_v5 = vshll.u32 %v8525_v38, 16  ;;  %v4253_v56 = vor.u32 %v4252_v22, %v4248_v16  ;;  %v8552_v18 = vld [vmem:[%s7422_s30 + $0xc8] sm:$0x1]  ;;  %v5985_v60 = vld [vmem:[%s7422_s30 + $0xcc] sm:$0xf] }
  0xfa   : > { %v6015_v49 = vcombine.low %v4225_v12, %v4235_v63  ;;  %v4263_v2 = vrot.slane %v4261_v15, 4  ;;  %v4274_v32 = vshrl.u32 %v8525_v38, 16  ;;  %v4244_v6 = vrot.slane %v4243_v34, 4  ;;  %v8563_v12 = vld [vmem:[%s7422_s30 + $0xd0] sm:$0xf] }
  0xfb   : > { %6487 = vmatmul.mubr.bf16.gmra.mrb[4].mxu1 %v7205_v13  ;;  %v4266_v51 = vrot.slane %v4264_v48, 5  ;;  %v4272_v29 = vrot.slane %v4270_v5, 5  ;;  %v4280_v7 = vshll.u32 %v8534_v43, 16  ;;  %v4254_v59 = vrot.slane %v4253_v56, 4  ;;  %v7210_v48 = vld [vmem:[%s7422_s30 + $0x54] sm:$0xff]  }
  0xfc   : > { %6490 = vmatprep.mubr.bf16.mxu1 %v7207_v17  ;;  %6764 = vmatpush3.bf16.msra.mxu1 %v7229_v19  ;;  %v4276_v57 = vrot.slane %v4274_v32, 4  ;;  %v4285_v13 = vshrl.u32 %v5982_v41, 16  ;;  %v4288_v1 = vshll.u32 %v5982_v41, 16  ;;  %v4249_v36 = vsel %vm7458_vm2, %v4244_v6, %v4248_v16  ;;  %v8570_v16 = vld [vmem:[%s7422_s30 + $0xd4] sm:$0x1] }
  0xfd   : > { %6757 = vmatprep.subr.bf16.mxu1 %v7230_v0  ;;  %6695 = vmatmul.mubr.bf16.gmra.mrb[20].mxu0 %v6015_v49  ;;  %v4267_v42 = vor.u32 %v4266_v51, %v4263_v2  ;;  %v4282_v17 = vrot.slane %v4280_v7, 5  ;;  %v4294_v44 = vshll.u32 %v8544_v25, 16  ;;  %v4259_v41 = vsel %vm7458_vm2, %v4254_v59, %v4258_v27  ;;  %v6028_v56 = vld [vmem:[%s7422_s30 + $0x18] sm:$0xe]  ;;  %v7231_v27 = vld [vmem:[%s9005_s1 + $0x120] sm:$0xff]  }
  0xfe   : > { %v4277_v22 = vor.u32 %v4276_v57, %v4272_v29  ;;  %v4287_v19 = vrot.slane %v4285_v13, 4  ;;  %v4290_v15 = vrot.slane %v4288_v1, 5  ;;  %v6016_v63 = vcombine.low %v4249_v36, %v4259_v41 }
  0xff   : > { %v4268_v34 = vrot.slane %v4267_v42, 4  ;;  %v4296_v5 = vrot.slane %v4294_v44, 5  ;;  %v4298_v49 = vshrl.u32 %v8544_v25, 16  ;;  %v4304_v6 = vshll.u32 %v8552_v18, 16  ;;  %v6029_v44 = vld [vmem:[%s7422_s30 + $0x24] sm:$0xe] }
 0x100   : > { %6765 = vmatpush3.bf16.msra.mxu1 %v7230_v0  ;;  %v4278_v2 = vrot.slane %v4277_v22, 4  ;;  %v4291_v32 = vor.u32 %v4290_v15, %v4287_v19  ;;  %v4309_v51 = vshrl.u32 %v5985_v60, 16  ;;  %6698 = vmatprep.mubr.bf16.mxu0 %v6016_v63  ;;  %v4312_v57 = vshll.u32 %v5985_v60, 16  ;;  %v6030_v63 = vld [vmem:[%s7422_s30 + $0x30] sm:$0xe] }
 0x101   : > { %6758 = vmatprep.subr.bf16.mxu1 %v7231_v27  ;;  %v4273_v7 = vsel %vm7458_vm2, %v4268_v34, %v4272_v29  ;;  %v4300_v59 = vrot.slane %v4298_v49, 4  ;;  %v4318_v13 = vshll.u32 %v8563_v12, 16  ;;  %v4306_v36 = vrot.slane %v4304_v6, 5  ;;  %v7232_v34 = vld [vmem:[%s9005_s1 + $0x128] sm:$0xff]   ;;  %v7211_v49 = vld [vmem:[%s7422_s30 + $0x60] sm:$0xff]  }
 0x102   : > { %v4283_v1 = vsel %vm7458_vm2, %v4278_v2, %v4282_v17  ;;  %v4292_v0 = vrot.slane %v4291_v32, 4  ;;  %v4311_v42 = vrot.slane %v4309_v51, 4  ;;  %v4314_v19 = vrot.slane %v4312_v57, 5  ;;  %v7233_v32 = vld [vmem:[%s7422_s30 + $0x1c] sm:$0xf] }
 0x103   : > { %6491 = vmatmul.mubr.bf16.gmra.mrb[8].mxu1 %v7208_v40  ;;  %v6017_v41 = vcombine.low %v4273_v7, %v4283_v1  ;;  %v4301_v22 = vor.u32 %v4300_v59, %v4296_v5  ;;  %v4320_v29 = vrot.slane %v4318_v13, 5  ;;  %v4322_v40 = vshrl.u32 %v8563_v12, 16  ;;  %v7234_v51 = vld [vmem:[%s7422_s30 + $0x20] sm:$0x1]  ;;  %v7213_v1 = vld [vmem:[%s7422_s30 + $0x6c] sm:$0xff]  }
 0x104   : > { %6494 = vmatprep.mubr.bf16.mxu1 %v7210_v48  ;;  %6766 = vmatpush3.bf16.msra.mxu1 %v7231_v27  ;;  %v4297_v60 = vsel %vm7458_vm2, %v4292_v0, %v4296_v5  ;;  %v4328_v17 = vshll.u32 %v8570_v16, 16  ;;  %v6044_v15 = vrot.slane %v6028_v56, 9  ;;  %v4315_v2 = vor.u32 %v4314_v19, %v4311_v42 }
 0x105   : > { %6759 = vmatprep.subr.bf16.mxu1 %v7232_v34  ;;  %6699 = vmatmul.mubr.bf16.gmra.mrb[24].mxu0 %v6017_v41  ;;  %v4302_v48 = vrot.slane %v4301_v22, 4  ;;  %v4720_v6 = vrot.slane %v7233_v32, 5  ;;  %v4723_v5 = vrot.slane %v7234_v51, 5  ;;  %v4324_v27 = vrot.slane %v4322_v40, 4  ;;  %v6031_v40 = vld [vmem:[%s7422_s30 + $0x3c] sm:$0xe] }
 0x106   : > { %v4330_v7 = vrot.slane %v4328_v17, 5  ;;  %v6045_v59 = vrot.slane %v6029_v44, 9  ;;  %v4727_v56 = vrot.slane %v8228_v46, 5  ;;  %v4316_v13 = vrot.slane %v4315_v2, 4  ;;  %v7235_v46 = vld [vmem:[%s9005_s1 + $0x130] sm:$0xff]  }
 0x107   : > { %v4307_v57 = vsel %vm7458_vm2, %v4302_v48, %v4306_v36  ;;  %v4721_v0 = vsel %vm7606_vm5, %v6044_v15, %v4720_v6  ;;  %v4722_v41 = vrot.slane %v4720_v6, 4  ;;  %v4325_v22 = vor.u32 %v4324_v27, %v4320_v29  ;;  %v6032_v6 = vld [vmem:[%s7422_s30 + $0x48] sm:$0xe] }
 0x108   : > { %6767 = vmatpush3.bf16.msra.mxu1 %v7232_v34  ;;  %v6018_v42 = vcombine.low %v4297_v60, %v4307_v57  ;;  %v8602_v19 = vsel %vm7606_vm5, %v6045_v59, %v4727_v56  ;;  %v4729_v44 = vrot.slane %v4727_v56, 4  ;;  %v4321_v36 = vsel %vm7458_vm2, %v4316_v13, %v4320_v29  ;;  %v6034_v57 = vld [vmem:[%s7422_s30 + $0x60] sm:$0xe]  ;;  %v7214_v13 = vld [vmem:[%s7422_s30 + $0x78] sm:$0xff]  }
 0x109   : > { %6760 = vmatprep.subr.bf16.mxu1 %v7235_v46  ;;  %v4724_v60 = vsel %vm7606_vm5, %v4722_v41, %v4723_v5  ;;  %v4730_v17 = vrot.slane %v8231_v4, 5  ;;  %v6046_v15 = vrot.slane %v6030_v63, 9  ;;  %v4326_v34 = vrot.slane %v4325_v22, 4  ;;  %v7215_v22 = vld [vmem:[%s7422_s30 + $0x84] sm:$0xff]  }
 0x10a   : > { %6702 = vmatprep.mubr.bf16.mxu0 %v6018_v42  ;;  %v6076_v48 = vcombine.low %v4721_v0, %v4724_v60  ;;  %v4734_v2 = vrot.slane %v8252_v58, 5  ;;  %v4737_v32 = vrot.slane %v8258_v11, 5  ;;  %v6047_v51 = vrot.slane %v6031_v40, 9 }
 0x10b   : > { %6495 = vmatmul.mubr.bf16.gmra.mrb[12].mxu1 %v7211_v49  ;;  %v8618_v29 = vsel %vm7606_vm5, %v4729_v44, %v4730_v17  ;;  %v4741_v4 = vrot.slane %v8289_v55, 5  ;;  %v4744_v63 = vrot.slane %v8294_v61, 5  ;;  %v6033_v49 = vld [vmem:[%s7422_s30 + $0x54] sm:$0xe]  ;;  %v4331_v58 = vsel %vm7458_vm2, %v4326_v34, %v4330_v7  ;;  %v7236_v55 = vld [vmem:[%s9005_s1 + $0x138] sm:$0xff]  }
 0x10c   : > { %6498 = vmatprep.mubr.bf16.mxu1 %v7213_v1  ;;  %6768 = vmatpush3.bf16.msra.mxu1 %v7235_v46  ;;  %v6077_v11 = vcombine.low %v8602_v19, %v8618_v29  ;;  %v8629_v5 = vsel %vm7606_vm5, %v6046_v15, %v4734_v2  ;;  %v4736_v27 = vrot.slane %v4734_v2, 4  ;;  %v6019_v61 = vcombine.low %v4321_v36, %v4331_v58  ;;  %v6035_v36 = vld [vmem:[%s7422_s30 + $0x6c] sm:$0xe] }
 0x10d   : > { %6761 = vmatprep.subr.bf16.mxu1 %v7236_v55  ;;  %v8636_v59 = vsel %vm7606_vm5, %v6047_v51, %v4741_v4  ;;  %v4743_v7 = vrot.slane %v4741_v4, 4  ;;  %v6048_v56 = vrot.slane %v6032_v6, 9  ;;  %v4748_v0 = vrot.slane %v8328_v35, 5  ;;  %v5732_v2 = vld [vmem:[%s7422_s30 + $0x6c] sm:$0xf] }
 0x10e   : > { %v4738_v1 = vsel %vm7606_vm5, %v4736_v27, %v4737_v32  ;;  %v4751_v41 = vrot.slane %v8334_v10, 5  ;;  %v6049_v42 = vrot.slane %v6033_v49, 9  ;;  %6703 = vmatmul.mubr.bf16.gmra.mrb[28].mxu0 %v6019_v61  ;;  %v4755_v40 = vrot.slane %v8357_v9, 5  ;;  %v7237_v27 = vld [vmem:[%s7422_s30 + $0x70] sm:$0xf] }
 0x10f   : > { %v6078_v19 = vcombine.low %v8629_v5, %v4738_v1  ;;  %v8648_v44 = vsel %vm7606_vm5, %v4743_v7, %v4744_v63  ;;  %v4758_v46 = vrot.slane %v8376_v24, 5  ;;  %6722 = vmatprep.mubr.bf16.mxu0 %v6076_v48  ;;  %v8657_v10 = vsel %vm7606_vm5, %v6048_v56, %v4748_v0  ;;  %v6036_v7 = vld [vmem:[%s7422_s30 + $0x78] sm:$0xe]  ;;  %v7216_v56 = vld [vmem:[%s7422_s30 + $0x90] sm:$0xff]  }
 0x110   : > { %6769 = vmatpush3.bf16.msra.mxu1 %v7236_v55  ;;  %v6079_v35 = vcombine.low %v8636_v59, %v8648_v44  ;;  %v4750_v60 = vrot.slane %v4748_v0, 4  ;;  %v6050_v17 = vrot.slane %v6034_v57, 9  ;;  %v8661_v15 = vsel %vm7606_vm5, %v6049_v42, %v4755_v40  ;;  %v7238_v0 = vld [vmem:[%s7422_s30 + $0x74] sm:$0x1]  ;;  %v5735_v42 = vld [vmem:[%s7422_s30 + $0x78] sm:$0xf] }
 0x111   : > { %v4757_v34 = vrot.slane %v4755_v40, 4  ;;  %v4762_v9 = vrot.slane %v8392_v39, 5  ;;  %v4765_v24 = vrot.slane %v8408_v28, 5  ;;  %v6051_v32 = vrot.slane %v6035_v36, 9 }
 0x112   : > { %v8668_v48 = vsel %vm7606_vm5, %v4750_v60, %v4751_v41  ;;  %v4769_v6 = vrot.slane %v8431_v50, 5  ;;  %v4772_v29 = vrot.slane %v8434_v21, 5  ;;  %v2502_v49 = vshrl.u32 %v5732_v2, 16 }
 0x113   : > { %6499 = vmatmul.mubr.bf16.gmra.mrb[16].mxu1 %v7214_v13  ;;  %v6080_v39 = vcombine.low %v8657_v10, %v8668_v48  ;;  %v8676_v28 = vsel %vm7606_vm5, %v4757_v34, %v4758_v46  ;;  %v8680_v51 = vsel %vm7606_vm5, %v6050_v17, %v4762_v9  ;;  %v4764_v4 = vrot.slane %v4762_v9, 4  ;;  %v6037_v17 = vld [vmem:[%s7422_s30 + $0x84] sm:$0xe] }
 0x114   : > { %6502 = vmatprep.mubr.bf16.mxu1 %v7215_v22  ;;  %v6081_v50 = vcombine.low %v8661_v15, %v8676_v28  ;;  %v8686_v21 = vsel %vm7606_vm5, %v6051_v32, %v4769_v6  ;;  %v4771_v63 = vrot.slane %v4769_v6, 4  ;;  %v2505_v5 = vshll.u32 %v5732_v2, 16  ;;  %v7217_v22 = vld [vmem:[%s7422_s30 + $0x9c] sm:$0xff]  }
 0x115   : > { %v8690_v58 = vsel %vm7606_vm5, %v4764_v4, %v4765_v24  ;;  %v2511_v55 = vshll.u32 %v7237_v27, 16  ;;  %v2515_v61 = vshrl.u32 %v7237_v27, 16  ;;  %v2504_v1 = vrot.slane %v2502_v49, 4 }
 0x116   : > { %v6082_v57 = vcombine.low %v8680_v51, %v8690_v58  ;;  %v8699_v13 = vsel %vm7606_vm5, %v4771_v63, %v4772_v29  ;;  %v2521_v41 = vshll.u32 %v7238_v0, 16  ;;  %6723 = vmatmul.mubr.bf16.vlgmr.msra.gmra.mrb[0].mxu0 %v6077_v11  ;;  %v2507_v46 = vrot.slane %v2505_v5, 5 }
 0x117   : > { %v6083_v40 = vcombine.low %v8686_v21, %v8699_v13  ;;  %v2513_v36 = vrot.slane %v2511_v55, 5  ;;  %v2517_v60 = vrot.slane %v2515_v61, 4  ;;  %6726 = vmatprep.mubr.bf16.mxu0 %v6078_v19  ;;  %v6052_v9 = vrot.slane %v6036_v7, 9  ;;  %v5738_v55 = vld [vmem:[%s7422_s30 + $0x84] sm:$0xf] }
 0x118   : > { %v2523_v34 = vrot.slane %v2521_v41, 5  ;;  %v4776_v24 = vrot.slane %v8449_v23, 5  ;;  %v4779_v2 = vrot.slane %v8455_v53, 5  ;;  %v2508_v32 = vor.u32 %v2507_v46, %v2504_v1  ;;  %v7218_v46 = vld [vmem:[%s7422_s30 + $0xa8] sm:$0xff]  }
 0x119   : > { %v2518_v6 = vor.u32 %v2517_v60, %v2513_v36  ;;  %v2526_v29 = vshrl.u32 %v5735_v42, 16  ;;  %v2529_v11 = vshll.u32 %v5735_v42, 16  ;;  %v6053_v49 = vrot.slane %v6037_v17, 9  ;;  %v7245_v21 = vld [vmem:[%s7422_s30 + $0xac] sm:$0xf] }
 0x11a   : > { %v8711_v4 = vsel %vm7606_vm5, %v6052_v9, %v4776_v24  ;;  %v4778_v63 = vrot.slane %v4776_v24, 4  ;;  %v4783_v19 = vrot.slane %v8464_v52, 5  ;;  %v2509_v23 = vrot.slane %v2508_v32, 4 }
 0x11b   : > { %6503 = vmatmul.mubr.bf16.gmra.mrb[20].mxu1 %v7216_v56  ;;  %v2519_v5 = vrot.slane %v2518_v6, 4  ;;  %v2528_v27 = vrot.slane %v2526_v29, 4  ;;  %v2531_v53 = vrot.slane %v2529_v11, 5  ;;  %v4786_v52 = vrot.slane %v8469_v37, 5 }
 0x11c   : > { %6506 = vmatprep.mubr.bf16.mxu1 %v7217_v22  ;;  %v8717_v61 = vsel %vm7606_vm5, %v4778_v63, %v4779_v2  ;;  %v8721_v7 = vsel %vm7606_vm5, %v6053_v49, %v4783_v19  ;;  %v4785_v56 = vrot.slane %v4783_v19, 4  ;;  %v2514_v1 = vsel %vm7458_vm2, %v2509_v23, %v2513_v36  ;;  %v6038_v22 = vld [vmem:[%s7422_s30 + $0x90] sm:$0xe]  ;;  %v7219_v36 = vld [vmem:[%s7422_s30 + $0xb4] sm:$0xff]   ;;  %v7239_v2 = vld [vmem:[%s7422_s30 + $0x88] sm:$0xf] }
 0x11d   : > { %v2524_v0 = vsel %vm7458_vm2, %v2519_v5, %v2523_v34  ;;  %v6084_v41 = vcombine.low %v8711_v4, %v8717_v61  ;;  %v2532_v42 = vor.u32 %v2531_v53, %v2528_v27  ;;  %v2550_v37 = vshrl.u32 %v5738_v55, 16  ;;  %v7240_v63 = vld [vmem:[%s7422_s30 + $0x8c] sm:$0x1]  ;;  %v5741_v23 = vld [vmem:[%s7422_s30 + $0x90] sm:$0xf] }
 0x11e   : > { %v8732_v60 = vcombine.low %v2514_v1, %v2524_v0  ;;  %v8736_v17 = vsel %vm7606_vm5, %v4785_v56, %v4786_v52  ;;  %v2553_v9 = vshll.u32 %v5738_v55, 16  ;;  %6727 = vmatmul.mubr.bf16.gmra.mrb[4].mxu0 %v6079_v35  ;;  %v2559_v32 = vshll.u32 %v7239_v2, 16  ;;  %v6039_v1 = vld [vmem:[%s7422_s30 + $0x9c] sm:$0xe] }
 0x11f   : > { %v2533_v34 = vrot.slane %v2532_v42, 4  ;;  %v6085_v24 = vcombine.low %v8721_v7, %v8736_v17  ;;  %v2563_v6 = vshrl.u32 %v7239_v2, 16  ;;  %6730 = vmatprep.mubr.bf16.mxu0 %v6080_v39  ;;  %v2552_v29 = vrot.slane %v2550_v37, 4  ;;  %v7220_v37 = vld [vmem:[%s7422_s30 + $0xc0] sm:$0xff]  }
 0x120   : > { %v2555_v11 = vrot.slane %v2553_v9, 5  ;;  %v2569_v49 = vshll.u32 %v7240_v63, 16  ;;  %v6054_v19 = vrot.slane %v6038_v22, 9  ;;  %v2561_v44 = vrot.slane %v2559_v32, 5  ;;  %v7242_v22 = vld [vmem:[%s7422_s30 + $0x98] sm:$0x1] }
 0x121   : > { %v2538_v59 = vsel %vm7458_vm2, %v2533_v34, %v7770_v3  ;;  %v2565_v35 = vrot.slane %v2563_v6, 4  ;;  %v4790_v5 = vrot.slane %v8480_v54, 5  ;;  %v4793_v27 = vrot.slane %v8485_v8, 5  ;;  %v5744_v32 = vld [vmem:[%s7422_s30 + $0x9c] sm:$0xf] }
 0x122   : > { %v8759_v10 = vcombine.low %v2538_v59, %v2548_v20  ;;  %v2556_v48 = vor.u32 %v2555_v11, %v2552_v29  ;;  %v2571_v39 = vrot.slane %v2569_v49, 5  ;;  %v2574_v55 = vshrl.u32 %v5741_v23, 16 }
 0x123   : > { %6507 = vmatmul.mubr.bf16.gmra.mrb[24].mxu1 %v7218_v46  ;;  %v2566_v3 = vor.u32 %v2565_v35, %v2561_v44  ;;  %v8764_v54 = vsel %vm7606_vm5, %v6054_v19, %v4790_v5  ;;  %v4792_v53 = vrot.slane %v4790_v5, 4  ;;  %v2577_v52 = vshll.u32 %v5741_v23, 16 }
 0x124   : > { %6510 = vmatprep.mubr.bf16.mxu1 %v7219_v36  ;;  %v2557_v56 = vrot.slane %v2556_v48, 4  ;;  %v2587_v20 = vshrl.u32 %v7241_v62, 16  ;;  %v2576_v42 = vrot.slane %v2574_v55, 4  ;;  %v2593_v46 = vshll.u32 %v7242_v22, 16  ;;  %v6040_v48 = vld [vmem:[%s7422_s30 + $0xa8] sm:$0xe] }
 0x125   : > { %v2567_v0 = vrot.slane %v2566_v3, 4  ;;  %v8770_v8 = vsel %vm7606_vm5, %v4792_v53, %v4793_v27  ;;  %v2579_v34 = vrot.slane %v2577_v52, 5  ;;  %v2585_v2 = vrot.slane %v2583_v26, 5  ;;  %v5747_v62 = vld [vmem:[%s7422_s30 + $0xa8] sm:$0xf] }
 0x126   : > { %v2562_v9 = vsel %vm7458_vm2, %v2557_v56, %v2561_v44  ;;  %v6086_v36 = vcombine.low %v8764_v54, %v8770_v8  ;;  %6731 = vmatmul.mubr.bf16.gmra.mrb[8].mxu0 %v6081_v50  ;;  %v2589_v29 = vrot.slane %v2587_v20, 4  ;;  %v2595_v11 = vrot.slane %v2593_v46, 5  ;;  %v7243_v50 = vld [vmem:[%s7422_s30 + $0xa0] sm:$0xf]  ;;  %v7244_v56 = vld [vmem:[%s7422_s30 + $0xa4] sm:$0x1] }
 0x127   : > { %v2572_v6 = vsel %vm7458_vm2, %v2567_v0, %v2571_v39  ;;  %v6055_v63 = vrot.slane %v6039_v1, 9  ;;  %6734 = vmatprep.mubr.bf16.mxu0 %v6082_v57  ;;  %v2580_v19 = vor.u32 %v2579_v34, %v2576_v42  ;;  %v4797_v23 = vrot.slane %v8498_v47, 5 }
 0x128   : > { %v5782_v49 = vcombine.low %v2562_v9, %v2572_v6  ;;  %v4800_v59 = vrot.slane %v8501_v14, 5  ;;  %v2590_v44 = vor.u32 %v2589_v29, %v2585_v2  ;;  %v2598_v15 = vshrl.u32 %v5744_v32, 16 }
 0x129   : > { %v2601_v28 = vshll.u32 %v5744_v32, 16  ;;  %v2607_v35 = vshll.u32 %v7243_v50, 16  ;;  %v2581_v5 = vrot.slane %v2580_v19, 4  ;;  %v8792_v51 = vsel %vm7606_vm5, %v6055_v63, %v4797_v23  ;;  %v6041_v63 = vld [vmem:[%s7422_s30 + $0xb4] sm:$0xe] }
 0x12a   : > { %v4799_v58 = vrot.slane %v4797_v23, 4  ;;  %v2611_v57 = vshrl.u32 %v7243_v50, 16  ;;  %v2591_v47 = vrot.slane %v2590_v44, 4  ;;  %v2600_v14 = vrot.slane %v2598_v15, 4  ;;  %v7246_v19 = vld [vmem:[%s7422_s30 + $0xb0] sm:$0x1] }
 0x12b   : > { %6511 = vmatmul.mubr.bf16.gmra.mrb[28].mxu1 %v7220_v37  ;;  %v2603_v39 = vrot.slane %v2601_v28, 5  ;;  %v2609_v27 = vrot.slane %v2607_v35, 5  ;;  %v2586_v3 = vsel %vm7458_vm2, %v2581_v5, %v2585_v2  ;;  %v2617_v52 = vshll.u32 %v7244_v56, 16  ;;  %v6042_v56 = vld [vmem:[%s7422_s30 + $0xc0] sm:$0xe] }
 0x12c   : > { %6546 = vmatprep.mubr.bf16.mxu1 %v8732_v60  ;;  %v8800_v53 = vsel %vm7606_vm5, %v4799_v58, %v4800_v59  ;;  %v2613_v55 = vrot.slane %v2611_v57, 4  ;;  %v2596_v26 = vsel %vm7458_vm2, %v2591_v47, %v2595_v11  ;;  %v6056_v1 = vrot.slane %v6040_v48, 9  ;;  %v5750_v59 = vld [vmem:[%s7422_s30 + $0xb4] sm:$0xf] }
 0x12d   : > { %v6087_v60 = vcombine.low %v8792_v51, %v8800_v53  ;;  %v2604_v20 = vor.u32 %v2603_v39, %v2600_v14  ;;  %v5783_v0 = vcombine.low %v2586_v3, %v2596_v26  ;;  %v2619_v22 = vrot.slane %v2617_v52, 5 }
 0x12e   : > { %v2614_v42 = vor.u32 %v2613_v55, %v2609_v27  ;;  %v4804_v46 = vrot.slane %v8512_v31, 5  ;;  %6735 = vmatmul.mubr.bf16.gmra.mrb[12].mxu0 %v6083_v40  ;;  %v4807_v9 = vrot.slane %v8518_v45, 5  ;;  %v2622_v34 = vshrl.u32 %v5747_v62, 16 }
 0x12f   : > { %v2605_v37 = vrot.slane %v2604_v20, 4  ;;  %v2625_v2 = vshll.u32 %v5747_v62, 16  ;;  %6738 = vmatprep.mubr.bf16.mxu0 %v6084_v41  ;;  %v2631_v13 = vshll.u32 %v7245_v21, 16  ;;  %v2635_v11 = vshrl.u32 %v7245_v21, 16 }
 0x130   : > { %v2615_v32 = vrot.slane %v2614_v42, 4  ;;  %v8818_v31 = vsel %vm7606_vm5, %v6056_v1, %v4804_v46  ;;  %v4806_v6 = vrot.slane %v4804_v46, 4  ;;  %v2624_v45 = vrot.slane %v2622_v34, 4  ;;  %v7248_v42 = vld [vmem:[%s7422_s30 + $0xbc] sm:$0x1] }
 0x131   : > { %v2610_v40 = vsel %vm7458_vm2, %v2605_v37, %v2609_v27  ;;  %v2627_v29 = vrot.slane %v2625_v2, 5  ;;  %v2633_v41 = vrot.slane %v2631_v13, 5  ;;  %v2641_v23 = vshll.u32 %v7246_v19, 16  ;;  %v7247_v27 = vld [vmem:[%s7422_s30 + $0xb8] sm:$0xf] }
 0x132   : > { %v2620_v4 = vsel %vm7458_vm2, %v2615_v32, %v2619_v22  ;;  %v8829_v61 = vsel %vm7606_vm5, %v4806_v6, %v4807_v9  ;;  %v6057_v35 = vrot.slane %v6041_v63, 9  ;;  %v4811_v5 = vrot.slane %v8525_v38, 5  ;;  %v5753_v46 = vld [vmem:[%s7422_s30 + $0xc0] sm:$0xf]  ;;  %v6043_v63 = vld [vmem:[%s7422_s30 + $0xcc] sm:$0xe] }
 0x133   : > { %6547 = vmatmul.mubr.bf16.vlgmr.msra.gmra.mrb[16].mxu1 %v8759_v10  ;;  %v5784_v44 = vcombine.low %v2610_v40, %v2620_v4  ;;  %v6088_v15 = vcombine.low %v8818_v31, %v8829_v61  ;;  %v2628_v28 = vor.u32 %v2627_v29, %v2624_v45  ;;  %v2637_v10 = vrot.slane %v2635_v11, 4  ;;  %v7249_v40 = vld [vmem:[%s7422_s30 + $0xc4] sm:$0xf] }
 0x134   : > { %6550 = vmatprep.mubr.bf16.mxu1 %v5782_v49  ;;  %v2643_v50 = vrot.slane %v2641_v23, 5  ;;  %v4814_v58 = vrot.slane %v8534_v43, 5  ;;  %v2646_v47 = vshrl.u32 %v5750_v59, 16  ;;  %v2649_v14 = vshll.u32 %v5750_v59, 16 }
 0x135   : > { %v2629_v57 = vrot.slane %v2628_v28, 4  ;;  %v2638_v48 = vor.u32 %v2637_v10, %v2633_v41  ;;  %v8839_v49 = vsel %vm7606_vm5, %v6057_v35, %v4811_v5  ;;  %v4813_v39 = vrot.slane %v4811_v5, 4 }
 0x136   : > { %v2655_v3 = vshll.u32 %v7247_v27, 16  ;;  %v2659_v55 = vshrl.u32 %v7247_v27, 16  ;;  %6739 = vmatmul.mubr.bf16.gmra.mrb[16].mxu0 %v6085_v24  ;;  %v2648_v52 = vrot.slane %v2646_v47, 4  ;;  %v2651_v62 = vrot.slane %v2649_v14, 5 }
 0x137   : > { %v2634_v38 = vsel %vm7458_vm2, %v2629_v57, %v2633_v41  ;;  %v2639_v43 = vrot.slane %v2638_v48, 4  ;;  %6742 = vmatprep.mubr.bf16.mxu0 %v6086_v36  ;;  %v4815_v26 = vsel %vm7606_vm5, %v4813_v39, %v4814_v58  ;;  %v2665_v22 = vshll.u32 %v7248_v42, 16  ;;  %v7250_v41 = vld [vmem:[%s7422_s30 + $0xc8] sm:$0x1] }
 0x138   : > { %v2657_v20 = vrot.slane %v2655_v3, 5  ;;  %v2661_v1 = vrot.slane %v2659_v55, 4  ;;  %v6089_v17 = vcombine.low %v8839_v49, %v4815_v26  ;;  %v2652_v24 = vor.u32 %v2651_v62, %v2648_v52 }
 0x139   : > { %v2644_v7 = vsel %vm7458_vm2, %v2639_v43, %v2643_v50  ;;  %v6058_v37 = vrot.slane %v6042_v56, 9  ;;  %v2667_v8 = vrot.slane %v2665_v22, 5  ;;  %v4818_v36 = vrot.slane %v8544_v25, 5  ;;  %v8897_v22 = vld [vmem:[%s9006_s2] ss:$0 sm:$0xff] }
 0x13a   : > { %v5785_v9 = vcombine.low %v2634_v38, %v2644_v7  ;;  %v2662_v54 = vor.u32 %v2661_v1, %v2657_v20  ;;  %v2653_v34 = vrot.slane %v2652_v24, 4  ;;  %v4821_v2 = vrot.slane %v8552_v18, 5 }
 0x13b   : > { %6551 = vmatmul.mubr.bf16.gmra.mrb[20].mxu1 %v5783_v0  ;;  %v2670_v32 = vshrl.u32 %v5753_v46, 16  ;;  %v2673_v31 = vshll.u32 %v5753_v46, 16  ;;  %v4819_v21 = vsel %vm7606_vm5, %v6058_v37, %v4818_v36  ;;  %v4820_v13 = vrot.slane %v4818_v36, 4 }
 0x13c   : > { %6554 = vmatprep.mubr.bf16.mxu1 %v5784_v44  ;;  %v2663_v6 = vrot.slane %v2662_v54, 4  ;;  %v2679_v0 = vshll.u32 %v7249_v40, 16  ;;  %v2658_v45 = vsel %vm7458_vm2, %v2653_v34, %v2657_v20  ;;  %v2683_v25 = vshrl.u32 %v7249_v40, 16 }
 0x13d   : > { %v2672_v29 = vrot.slane %v2670_v32, 4  ;;  %v2675_v11 = vrot.slane %v2673_v31, 5  ;;  %v4822_v4 = vsel %vm7606_vm5, %v4820_v13, %v4821_v2  ;;  %v2689_v19 = vshll.u32 %v7250_v41, 16 }
 0x13e   : > { %v2668_v18 = vsel %vm7458_vm2, %v2663_v6, %v2667_v8  ;;  %v2681_v61 = vrot.slane %v2679_v0, 5  ;;  %6743 = vmatmul.mubr.bf16.gmra.mrb[20].mxu0 %v6087_v60  ;;  %v6090_v59 = vcombine.low %v4819_v21, %v4822_v4  ;;  %v2685_v28 = vrot.slane %v2683_v25, 4 }
 0x13f   : > { %v5786_v23 = vcombine.low %v2658_v45, %v2668_v18  ;;  %v2676_v44 = vor.u32 %v2675_v11, %v2672_v29  ;;  %6746 = vmatprep.mubr.bf16.mxu0 %v6088_v15  ;;  %v6059_v10 = vrot.slane %v6043_v63, 9  ;;  %v4825_v50 = vrot.slane %v8563_v12, 5 }
 0x140   : > { %v4828_v35 = vrot.slane %v8570_v16, 5  ;;  %v2686_v58 = vor.u32 %v2685_v28, %v2681_v61  ;;  %v2691_v57 = vrot.slane %v2689_v19, 5  ;;  %v7315_v14 = vmov 0.0  }
 0x141   : > { %v2677_v5 = vrot.slane %v2676_v44, 4  ;;  %v4826_v48 = vsel %vm7606_vm5, %v6059_v10, %v4825_v50  ;;  %v4827_v47 = vrot.slane %v4825_v50, 4  ;;  %176 = vst [vmem:[#allocation2 + $0x30] sm:$0xff] %v7315_v14  ;;  %177 = vst [vmem:[#allocation2 + $0x38] sm:$0xff] %v7315_v14 }
 0x142   : > { %v2687_v53 = vrot.slane %v2686_v58, 4  ;;  %172 = vst [vmem:[#allocation2 + $0x10] sm:$0x3] %v7315_v14  ;;  %173 = vst [vmem:[#allocation2 + $0x18] sm:$0xff] %v7315_v14 }
 0x143   : > { %6555 = vmatmul.mubr.bf16.gmra.mrb[24].mxu1 %v5785_v9  ;;  %v2682_v51 = vsel %vm7458_vm2, %v2677_v5, %v2681_v61  ;;  %v4829_v60 = vsel %vm7606_vm5, %v4827_v47, %v4828_v35  ;;  %174 = vst [vmem:[#allocation2 + $0x20] sm:$0xff] %v7315_v14  ;;  %175 = vst [vmem:[#allocation2 + $0x28] sm:$0x3] %v7315_v14 }
 0x144   : > { %6558 = vmatprep.mubr.bf16.mxu1 %v5786_v23  ;;  %v2692_v12 = vsel %vm7458_vm2, %v2687_v53, %v2691_v57  ;;  %v6091_v16 = vcombine.low %v4826_v48, %v4829_v60  ;;  %178 = vst [vmem:[#allocation2 + $0x40] sm:$0x3] %v7315_v14  ;;  %179 = vst [vmem:[#allocation2 + $0x48] sm:$0xff] %v7315_v14 }
 0x145   : > { %v5787_v15 = vcombine.low %v2682_v51, %v2692_v12  ;;  %180 = vst [vmem:[#allocation2 + $0x50] sm:$0xff] %v7315_v14  ;;  %181 = vst [vmem:[#allocation2 + $0x58] sm:$0x3] %v7315_v14 }
 0x146   : > { %6747 = vmatmul.mubr.bf16.gmra.mrb[24].mxu0 %v6089_v17  ;;  %182 = vst [vmem:[#allocation2 + $0x60] sm:$0xff] %v7315_v14  ;;  %183 = vst [vmem:[#allocation2 + $0x68] sm:$0xff] %v7315_v14 }
 0x147   : > { %6750 = vmatprep.mubr.bf16.mxu0 %v6090_v59  ;;  %184 = vst [vmem:[#allocation2 + $0x70] sm:$0x3] %v7315_v14  ;;  %185 = vst [vmem:[#allocation2 + $0x78] sm:$0xff] %v7315_v14 }
 0x148   : > { %186 = vst [vmem:[#allocation2 + $0x80] sm:$0xff] %v7315_v14  ;;  %187 = vst [vmem:[#allocation2 + $0x88] sm:$0x3] %v7315_v14 }
 0x149   : > { %188 = vst [vmem:[#allocation2 + $0x90] sm:$0xff] %v7315_v14  ;;  %189 = vst [vmem:[#allocation2 + $0x98] sm:$0xff] %v7315_v14  ;;  %v5219_v28 = vld [vmem:[#allocation2 + $0x10] sm:$0x3] }
 0x14a   : > { %190 = vst [vmem:[#allocation2 + $0xa0] sm:$0x3] %v7315_v14  ;;  %191 = vst [vmem:[#allocation2 + $0xa8] sm:$0xff] %v7315_v14 }
 0x14b   : > { %6559 = vmatmul.mubr.bf16.gmra.mrb[28].mxu1 %v5787_v15  ;;  %192 = vst [vmem:[#allocation2 + $0xb0] sm:$0xff] %v7315_v14  ;;  %193 = vst [vmem:[#allocation2 + $0xb8] sm:$0x3] %v7315_v14 }
 0x14c   : > { %194 = vst [vmem:[#allocation2 + $0xc0] sm:$0xff] %v7315_v14  ;;  %195 = vst [vmem:[#allocation2 + $0xc8] sm:$0xff] %v7315_v14 }
 0x14d   : > { %196 = vst [vmem:[#allocation2 + $0xd0] sm:$0x3] %v7315_v14  ;;  %197 = vst [vmem:[#allocation2 + $0xd8] sm:$0xff] %v7315_v14 }
 0x14e   : > { %6751 = vmatmul.mubr.bf16.gmra.mrb[28].mxu0 %v6091_v16  ;;  %198 = vst [vmem:[#allocation2 + $0xe0] sm:$0xff] %v7315_v14  ;;  %199 = vst [vmem:[#allocation2 + $0xe8] sm:$0x3] %v7315_v14 }
 0x14f   : > { %200 = vst [vmem:[#allocation2 + $0xf0] sm:$0xff] %v7315_v14  ;;  %201 = vst [vmem:[#allocation2 + $0xf8] sm:$0xff] %v7315_v14 }
 0x150   : > { %202 = vst [vmem:[#allocation2 + $0x100] sm:$0x3] %v7315_v14  ;;  %203 = vst [vmem:[#allocation2 + $0x108] sm:$0xff] %v7315_v14 }
 0x151   : > { %204 = vst [vmem:[#allocation2 + $0x110] sm:$0xff] %v7315_v14  ;;  %205 = vst [vmem:[#allocation2 + $0x118] sm:$0x3] %v7315_v14 }
 0x152   : > { %206 = vst [vmem:[#allocation2 + $0x120] sm:$0xff] %v7315_v14  ;;  %207 = vst [vmem:[#allocation2 + $0x128] sm:$0xff] %v7315_v14 }
 0x153   : > { %208 = vst [vmem:[#allocation2 + $0x130] sm:$0x3] %v7315_v14  ;;  %209 = vst [vmem:[#allocation2 + $0x138] sm:$0xff] %v7315_v14 }
 0x154   : > { %210 = vst [vmem:[#allocation2 + $0x140] sm:$0xff] %v7315_v14  ;;  %211 = vst [vmem:[#allocation2 + $0x148] sm:$0x3] %v7315_v14 }
 0x155   : > { %212 = vst [vmem:[#allocation2 + $0x150] sm:$0xff] %v7315_v14  ;;  %213 = vst [vmem:[#allocation2 + $0x158] sm:$0xff] %v7315_v14 }
 0x156   : > { %214 = vst [vmem:[#allocation2 + $0x160] sm:$0x3] %v7315_v14  ;;  %215 = vst [vmem:[#allocation2 + $0x168] sm:$0xff] %v7315_v14 }
 0x157   : > { %216 = vst [vmem:[#allocation2 + $0x170] sm:$0xff] %v7315_v14  ;;  %217 = vst [vmem:[#allocation2 + $0x178] sm:$0x3] %v7315_v14 }
 0x158   : > { %218 = vst [vmem:[#allocation2 + $0x180] sm:$0xff] %v7315_v14  ;;  %219 = vst [vmem:[#allocation2 + $0x188] sm:$0xff] %v7315_v14 }
 0x159   : > { %220 = vst [vmem:[#allocation2 + $0x190] sm:$0x3] %v7315_v14 }
 0x1c6   : > { %v6484_v33 = vpop.f32.mrb[0].mxu1 }
 0x1c7   : > { %v2102_v30 = vpop.f32.mrb[1].mxu1  ;;  %v6770_v46 = vadd.f32 %v6484_v33, %v8897_v22 }
 0x1c8   : > { %v6485_v49 = vpop.f32.mrb[2].mxu1  ;;  %v6772_v7 = vadd.f32 %v8897_v22, %v2102_v30 }
 0x1c9   : > { %v2105_v39 = vpop.f32.mrb[3].mxu1  ;;  %v6774_v24 = vadd.f32 %v6485_v49, %v8897_v22 }
 0x1ca   : > { %v6776_v54 = vadd.f32 %v8897_v22, %v2105_v39 }
 0x1ce   : > { %v6488_v27 = vpop.f32.mrb[4].mxu1 }
 0x1cf   : > { %v2118_v3 = vpop.f32.mrb[5].mxu1  ;;  %v6778_v40 = vadd.f32 %v6488_v27, %v8897_v22 }
 0x1d0   : > { %v6489_v55 = vpop.f32.mrb[6].mxu1  ;;  %v6780_v0 = vadd.f32 %v8897_v22, %v2118_v3 }
 0x1d1   : > { %v2121_v56 = vpop.f32.mrb[7].mxu1  ;;  %v6782_v29 = vadd.f32 %v6489_v55, %v8897_v22 }
 0x1d2   : > { %v6784_v63 = vadd.f32 %v8897_v22, %v2121_v56 }
 0x1d6   : > { %v6492_v38 = vpop.f32.mrb[8].mxu1 }
 0x1d7   : > { %v2134_v43 = vpop.f32.mrb[9].mxu1  ;;  %v6786_v5 = vadd.f32 %v6492_v38, %v8897_v22 }
 0x1d8   : > { %v6493_v52 = vpop.f32.mrb[10].mxu1  ;;  %v6788_v47 = vadd.f32 %v8897_v22, %v2134_v43 }
 0x1d9   : > { %v8884_v62 = vpop.f32.mrb[11].mxu1  ;;  %v6790_v16 = vadd.f32 %v6493_v52, %v8897_v22 }
 0x1da   : > { %v6792_v49 = vadd.f32 %v8897_v22, %v8884_v62 }
 0x1de   : > { %v8886_v26 = vpop.f32.mrb[12].mxu1 }
 0x1df   : > { %v8888_v20 = vpop.f32.mrb[13].mxu1 }
 0x1e0   : > { %v8890_v1 = vpop.f32.mrb[14].mxu1 }
 0x1e1   : > { %v8892_v42 = vpop.f32.mrb[15].mxu1 }
 0x1e9   : > { %v6724_v17 = vpop.f32.mrb[0].mxu0 }
 0x1ea   : > { %v6771_v37 = vadd.f32 %v6770_v46, %v6724_v17  ;;  %v4993_v9 = vpop.f32.mrb[1].mxu0 }
 0x1eb   : > { %v6773_v8 = vadd.f32 %v6772_v7, %v4993_v9  ;;  %v6725_v36 = vpop.f32.mrb[2].mxu0  ;;  %v6794_v9 = vadd.f32 %v8886_v26, %v8897_v22 }
 0x1ec   : > { %v5154_v34 = vmax.f32 %v6771_v37, 0.0  ;;  %v6775_v2 = vadd.f32 %v6774_v24, %v6725_v36  ;;  %v4996_v32 = vpop.f32.mrb[3].mxu0 }
 0x1ed   : > { %v5152_v31 = vmax.f32 %v6773_v8, 0.0  ;;  %v6777_v6 = vadd.f32 %v6776_v54, %v4996_v32 }
 0x1ee   : > { %5187 = vst [vmem:[#allocation2 + $0x31] sm:$0xff] %v5154_v34  ;;  %v5155_v21 = vmax.f32 %v6775_v2, 0.0  ;;  %v6796_v34 = vadd.f32 %v8897_v22, %v8888_v20 }
 0x1ef   : > { %5185 = vst [vmem:[#allocation2 + $0x19] sm:$0xff] %v5152_v31  ;;  %v5153_v13 = vmax.f32 %v6777_v6, 0.0 }
 0x1f0   : > { %5188 = vst [vmem:[#allocation2 + $0x39] sm:$0xff] %v5155_v21  ;;  %v6798_v21 = vadd.f32 %v8890_v1, %v8897_v22 }
 0x1f1   : > { %5186 = vst [vmem:[#allocation2 + $0x21] sm:$0xff] %v5153_v13  ;;  %v6728_v45 = vpop.f32.mrb[4].mxu0 }
 0x1f2   : > { %v6779_v11 = vadd.f32 %v6778_v40, %v6728_v45  ;;  %v5009_v25 = vpop.f32.mrb[5].mxu0  ;;  %v6800_v45 = vadd.f32 %v8897_v22, %v8892_v42 }
 0x1f3   : > { %v6781_v18 = vadd.f32 %v6780_v0, %v5009_v25  ;;  %v6729_v4 = vpop.f32.mrb[6].mxu0 }
 0x1f4   : > { %v5158_v61 = vmax.f32 %v6779_v11, 0.0  ;;  %v6783_v41 = vadd.f32 %v6782_v29, %v6729_v4  ;;  %v5012_v19 = vpop.f32.mrb[7].mxu0 }
 0x1f5   : > { %v5156_v23 = vmax.f32 %v6781_v18, 0.0  ;;  %v6785_v59 = vadd.f32 %v6784_v63, %v5012_v19  ;;  %v5220_v58 = vld [vmem:[#allocation2 + $0x30] sm:$0xff] }
 0x1f6   : > { %v5241_v44 = vld [vmem:[#allocation2 + $0x18] sm:$0xff]  ;;  %5191 = vst [vmem:[#allocation2 + $0x61] sm:$0xff] %v5158_v61  ;;  %v5159_v10 = vmax.f32 %v6783_v41, 0.0 }
 0x1f7   : > { %v5265_v50 = vmax.f32 %v5241_v44, 0.0  ;;  %5189 = vst [vmem:[#allocation2 + $0x49] sm:$0xff] %v5156_v23  ;;  %v5157_v35 = vmax.f32 %v6785_v59, 0.0  ;;  %v5221_v15 = vld [vmem:[#allocation2 + $0x38] sm:$0xff]  ;;  %v5292_v14 = vld [vmem:[#allocation2 + $0x40] sm:$0x3] }
 0x1f8   : > { %v5242_v57 = vld [vmem:[#allocation2 + $0x20] sm:$0xff]  ;;  %v5243_v48 = vld [vmem:[#allocation2 + $0x28] sm:$0x3]  ;;  %5192 = vst [vmem:[#allocation2 + $0x69] sm:$0xff] %v5159_v10 }
 0x1f9   : > { %v5314_v51 = vmax.f32 %v5265_v50, %v5220_v58  ;;  %v5266_v53 = vmax.f32 %v5242_v57, 0.0  ;;  %v5267_v60 = vmax.f32 %v5219_v28, %v5243_v48  ;;  %5190 = vst [vmem:[#allocation2 + $0x51] sm:$0xff] %v5157_v35  ;;  %v6732_v12 = vpop.f32.mrb[8].mxu0  ;;  %v5222_v24 = vld [vmem:[#allocation2 + $0x40] sm:$0x3] }
 0x1fa   : > { %v6787_v33 = vadd.f32 %v6786_v5, %v6732_v12  ;;  %v5025_v30 = vpop.f32.mrb[9].mxu0 }
 0x1fb   : > { %5338 = vst [vmem:[#allocation3] sm:$0xff] %v5314_v51  ;;  %v5315_v39 = vmax.f32 %v5266_v53, %v5221_v15  ;;  %v5316_v27 = vmax.f32 %v5267_v60, %v5292_v14  ;;  %v6789_v3 = vadd.f32 %v6788_v47, %v5025_v30  ;;  %v6733_v55 = vpop.f32.mrb[10].mxu0 }
 0x1fc   : > { %v5162_v56 = vmax.f32 %v6787_v33, 0.0  ;;  %v6791_v38 = vadd.f32 %v6790_v16, %v6733_v55  ;;  %v5028_v43 = vpop.f32.mrb[11].mxu0 }
 0x1fd   : > { %5339 = vst [vmem:[#allocation3 + $0x8] sm:$0xff] %v5315_v39  ;;  %5340 = vst [vmem:[#allocation3 + $0x10] sm:$0x3] %v5316_v27  ;;  %v5160_v46 = vmax.f32 %v6789_v3, 0.0  ;;  %v6793_v7 = vadd.f32 %v6792_v49, %v5028_v43  ;;  %v5223_v54 = vld [vmem:[#allocation2 + $0x60] sm:$0xff] }
 0x1fe   : > { %v5244_v52 = vld [vmem:[#allocation2 + $0x48] sm:$0xff]  ;;  %5195 = vst [vmem:[#allocation2 + $0x91] sm:$0xff] %v5162_v56  ;;  %v5163_v17 = vmax.f32 %v6791_v38, 0.0 }
 0x1ff   : > { %v5268_v37 = vmax.f32 %v5220_v58, %v5244_v52  ;;  %5193 = vst [vmem:[#allocation2 + $0x79] sm:$0xff] %v5160_v46  ;;  %v5161_v62 = vmax.f32 %v6793_v7, 0.0  ;;  %v5224_v13 = vld [vmem:[#allocation2 + $0x68] sm:$0xff]  ;;  %v5295_v40 = vld [vmem:[#allocation2 + $0x70] sm:$0x3] }
 0x200   : > { %v5245_v8 = vld [vmem:[#allocation2 + $0x50] sm:$0xff]  ;;  %v5246_v36 = vld [vmem:[#allocation2 + $0x58] sm:$0x3]  ;;  %5196 = vst [vmem:[#allocation2 + $0x99] sm:$0xff] %v5163_v17 }
 0x201   : > { %v5317_v2 = vmax.f32 %v5268_v37, %v5223_v54  ;;  %v5269_v32 = vmax.f32 %v5221_v15, %v5245_v8  ;;  %v5270_v31 = vmax.f32 %v5222_v24, %v5246_v36  ;;  %5194 = vst [vmem:[#allocation2 + $0x81] sm:$0xff] %v5161_v62  ;;  %v6736_v6 = vpop.f32.mrb[12].mxu0  ;;  %v5225_v35 = vld [vmem:[#allocation2 + $0x70] sm:$0x3] }
 0x202   : > { %v6795_v26 = vadd.f32 %v6794_v9, %v6736_v6  ;;  %v5041_v0 = vpop.f32.mrb[13].mxu0 }
 0x203   : > { %5341 = vst [vmem:[#allocation3 + $0x18] sm:$0xff] %v5317_v2  ;;  %v5318_v29 = vmax.f32 %v5269_v32, %v5224_v13  ;;  %v5319_v20 = vmax.f32 %v5270_v31, %v5295_v40  ;;  %v6797_v11 = vadd.f32 %v6796_v34, %v5041_v0  ;;  %v6737_v25 = vpop.f32.mrb[14].mxu0 }
 0x204   : > { %v5166_v63 = vmax.f32 %v6795_v26, 0.0  ;;  %v6799_v18 = vadd.f32 %v6798_v21, %v6737_v25  ;;  %v5044_v4 = vpop.f32.mrb[15].mxu0  ;;  %v5362_v1 = vld [vmem:[#allocation3] ss:$2 sm:$0xff]  ;;  %v5378_v59 = vld [vmem:[#allocation3 + $0x1] ss:$2 sm:$0xff] }
 0x205   : > { %5342 = vst [vmem:[#allocation3 + $0x20] sm:$0xff] %v5318_v29  ;;  %5343 = vst [vmem:[#allocation3 + $0x28] sm:$0x3] %v5319_v20  ;;  %v5164_v41 = vmax.f32 %v6797_v11, 0.0  ;;  %v6801_v19 = vadd.f32 %v6800_v45, %v5044_v4  ;;  %v5393_v50 = vmax.f32 %v5362_v1, %v5378_v59  ;;  %v5402_v48 = vld [vmem:[#allocation3 + $0x2] ss:$2 sm:$0xff] }
 0x206   : > { %v6548_v61 = vpop.f32.mrb[16].mxu1  ;;  %v5247_v42 = vld [vmem:[#allocation2 + $0x78] sm:$0xff]  ;;  %5199 = vst [vmem:[#allocation2 + $0xc1] sm:$0xff] %v5166_v63  ;;  %v5167_v44 = vmax.f32 %v6799_v18, 0.0  ;;  %v5226_v47 = vld [vmem:[#allocation2 + $0x90] sm:$0xff] }
 0x207   : > { %v2920_v23 = vpop.f32.mrb[17].mxu1  ;;  %v6802_v28 = vadd.f32 %v6548_v61, %v8897_v22  ;;  %v5271_v5 = vmax.f32 %v5223_v54, %v5247_v42  ;;  %5197 = vst [vmem:[#allocation2 + $0xa9] sm:$0xff] %v5164_v41  ;;  %v5165_v58 = vmax.f32 %v6801_v19, 0.0  ;;  %v5417_v16 = vmax.f32 %v5393_v50, %v5402_v48  ;;  %v5227_v39 = vld [vmem:[#allocation2 + $0x98] sm:$0xff]  ;;  %v5298_v27 = vld [vmem:[#allocation2 + $0xa0] sm:$0x3] }
 0x208   : > { %v6549_v10 = vpop.f32.mrb[18].mxu1  ;;  %v6804_v57 = vadd.f32 %v8897_v22, %v2920_v23  ;;  %v5248_v51 = vld [vmem:[#allocation2 + $0x80] sm:$0xff]  ;;  %v5249_v53 = vld [vmem:[#allocation2 + $0x88] sm:$0x3]  ;;  %5200 = vst [vmem:[#allocation2 + $0xc9] sm:$0xff] %v5167_v44 }
 0x209   : > { %v6806_v60 = vadd.f32 %v6549_v10, %v8897_v22  ;;  %v2923_v12 = vpop.f32.mrb[19].mxu1  ;;  %v5320_v15 = vmax.f32 %v5271_v5, %v5226_v47  ;;  %v5272_v14 = vmax.f32 %v5224_v13, %v5248_v51  ;;  %v5273_v33 = vmax.f32 %v5225_v35, %v5249_v53  ;;  %5198 = vst [vmem:[#allocation2 + $0xb1] sm:$0xff] %v5165_v58  ;;  %v6740_v30 = vpop.f32.mrb[16].mxu0  ;;  %v5228_v6 = vld [vmem:[#allocation2 + $0xa0] sm:$0x3] }
 0x20a   : > { %v6808_v49 = vadd.f32 %v8897_v22, %v2923_v12  ;;  %v6803_v3 = vadd.f32 %v6802_v28, %v6740_v30  ;;  %v5057_v55 = vpop.f32.mrb[17].mxu0  ;;  %5425 = vst [vmem:[%s8930_s11] sm:$0xff] %v5417_v16 }
 0x20b   : > { %5344 = vst [vmem:[#allocation3 + $0x30] sm:$0xff] %v5320_v15  ;;  %v5321_v56 = vmax.f32 %v5272_v14, %v5227_v39  ;;  %v5322_v38 = vmax.f32 %v5273_v33, %v5298_v27  ;;  %v6805_v43 = vadd.f32 %v6804_v57, %v5057_v55  ;;  %v6741_v46 = vpop.f32.mrb[18].mxu0 }
 0x20c   : > { %v5170_v7 = vmax.f32 %v6803_v3, 0.0  ;;  %v6807_v52 = vadd.f32 %v6806_v60, %v6741_v46  ;;  %v5060_v17 = vpop.f32.mrb[19].mxu0  ;;  %v5364_v37 = vld [vmem:[#allocation3 + $0x18] ss:$2 sm:$0xff]  ;;  %v5380_v8 = vld [vmem:[#allocation3 + $0x19] ss:$2 sm:$0xff] }
 0x20d   : > { %5345 = vst [vmem:[#allocation3 + $0x38] sm:$0xff] %v5321_v56  ;;  %5346 = vst [vmem:[#allocation3 + $0x40] sm:$0x3] %v5322_v38  ;;  %v5168_v62 = vmax.f32 %v6805_v43, 0.0  ;;  %v6809_v9 = vadd.f32 %v6808_v49, %v5060_v17  ;;  %v5394_v31 = vmax.f32 %v5364_v37, %v5380_v8  ;;  %v5404_v26 = vld [vmem:[#allocation3 + $0x1a] ss:$2 sm:$0xff] }
 0x20e   : > { %v6552_v24 = vpop.f32.mrb[20].mxu1  ;;  %v5250_v36 = vld [vmem:[#allocation2 + $0xa8] sm:$0xff]  ;;  %5203 = vst [vmem:[#allocation2 + $0xf1] sm:$0xff] %v5170_v7  ;;  %v5171_v34 = vmax.f32 %v6807_v52, 0.0  ;;  %v5229_v0 = vld [vmem:[#allocation2 + $0xc0] sm:$0xff] }
 0x20f   : > { %v2936_v54 = vpop.f32.mrb[21].mxu1  ;;  %v6810_v2 = vadd.f32 %v6552_v24, %v8897_v22  ;;  %v5274_v21 = vmax.f32 %v5226_v47, %v5250_v36  ;;  %5201 = vst [vmem:[#allocation2 + $0xd9] sm:$0xff] %v5168_v62  ;;  %v5169_v13 = vmax.f32 %v6809_v9, 0.0  ;;  %v5418_v25 = vmax.f32 %v5394_v31, %v5404_v26  ;;  %v5230_v41 = vld [vmem:[#allocation2 + $0xc8] sm:$0xff]  ;;  %v5301_v19 = vld [vmem:[#allocation2 + $0xd0] sm:$0x3] }
 0x210   : > { %v6553_v32 = vpop.f32.mrb[22].mxu1  ;;  %v6812_v40 = vadd.f32 %v8897_v22, %v2936_v54  ;;  %v5251_v45 = vld [vmem:[#allocation2 + $0xb0] sm:$0xff]  ;;  %v5252_v29 = vld [vmem:[#allocation2 + $0xb8] sm:$0x3]  ;;  %5204 = vst [vmem:[#allocation2 + $0xf9] sm:$0xff] %v5171_v34 }
 0x211   : > { %v6814_v20 = vadd.f32 %v6553_v32, %v8897_v22  ;;  %v2939_v11 = vpop.f32.mrb[23].mxu1  ;;  %v5323_v63 = vmax.f32 %v5274_v21, %v5229_v0  ;;  %v5275_v18 = vmax.f32 %v5227_v39, %v5251_v45  ;;  %v5276_v4 = vmax.f32 %v5228_v6, %v5252_v29  ;;  %5202 = vst [vmem:[#allocation2 + $0xe1] sm:$0xff] %v5169_v13  ;;  %v6744_v61 = vpop.f32.mrb[20].mxu0  ;;  %v5231_v33 = vld [vmem:[#allocation2 + $0xd0] sm:$0x3] }
 0x212   : > { %v6816_v1 = vadd.f32 %v8897_v22, %v2939_v11  ;;  %v6811_v23 = vadd.f32 %v6810_v2, %v6744_v61  ;;  %v5073_v59 = vpop.f32.mrb[21].mxu0  ;;  %5426 = vst [vmem:[%s8930_s11 + $0x8] sm:$0xff] %v5418_v25 }
 0x213   : > { %5347 = vst [vmem:[#allocation3 + $0x48] sm:$0xff] %v5323_v63  ;;  %v5324_v42 = vmax.f32 %v5275_v18, %v5230_v41  ;;  %v5325_v44 = vmax.f32 %v5276_v4, %v5301_v19  ;;  %v6813_v28 = vadd.f32 %v6812_v40, %v5073_v59  ;;  %v6745_v10 = vpop.f32.mrb[22].mxu0 }
 0x214   : > { %v5174_v50 = vmax.f32 %v6811_v23, 0.0  ;;  %v6815_v35 = vadd.f32 %v6814_v20, %v6745_v10  ;;  %v5076_v5 = vpop.f32.mrb[23].mxu0  ;;  %v5366_v57 = vld [vmem:[#allocation3 + $0x30] ss:$2 sm:$0xff]  ;;  %v5382_v53 = vld [vmem:[#allocation3 + $0x31] ss:$2 sm:$0xff] }
 0x215   : > { %5348 = vst [vmem:[#allocation3 + $0x50] sm:$0xff] %v5324_v42  ;;  %5349 = vst [vmem:[#allocation3 + $0x58] sm:$0x3] %v5325_v44  ;;  %v5172_v48 = vmax.f32 %v6813_v28, 0.0  ;;  %v6817_v47 = vadd.f32 %v6816_v1, %v5076_v5  ;;  %v5395_v14 = vmax.f32 %v5366_v57, %v5382_v53  ;;  %v5406_v27 = vld [vmem:[#allocation3 + $0x32] ss:$2 sm:$0xff] }
 0x216   : > { %v6556_v58 = vpop.f32.mrb[24].mxu1  ;;  %v5253_v60 = vld [vmem:[#allocation2 + $0xd8] sm:$0xff]  ;;  %5207 = vst [vmem:[#allocation2 + $0x121] sm:$0xff] %v5174_v50  ;;  %v5175_v12 = vmax.f32 %v6815_v35, 0.0  ;;  %v5232_v3 = vld [vmem:[#allocation2 + $0xf0] sm:$0xff] }
 0x217   : > { %v2952_v51 = vpop.f32.mrb[25].mxu1  ;;  %v6818_v16 = vadd.f32 %v6556_v58, %v8897_v22  ;;  %v5277_v30 = vmax.f32 %v5229_v0, %v5253_v60  ;;  %5205 = vst [vmem:[#allocation2 + $0x109] sm:$0xff] %v5172_v48  ;;  %v5173_v49 = vmax.f32 %v6817_v47, 0.0  ;;  %v5419_v46 = vmax.f32 %v5395_v14, %v5406_v27  ;;  %v5233_v62 = vld [vmem:[#allocation2 + $0xf8] sm:$0xff]  ;;  %v5304_v9 = vld [vmem:[#allocation2 + $0x100] sm:$0x3] }
 0x218   : > { %v6557_v15 = vpop.f32.mrb[26].mxu1  ;;  %v6820_v39 = vadd.f32 %v8897_v22, %v2952_v51  ;;  %v5254_v55 = vld [vmem:[#allocation2 + $0xe0] sm:$0xff]  ;;  %v5255_v56 = vld [vmem:[#allocation2 + $0xe8] sm:$0x3]  ;;  %5208 = vst [vmem:[#allocation2 + $0x129] sm:$0xff] %v5175_v12 }
 0x219   : > { %v6822_v38 = vadd.f32 %v6557_v15, %v8897_v22  ;;  %v2955_v43 = vpop.f32.mrb[27].mxu1  ;;  %v5326_v7 = vmax.f32 %v5277_v30, %v5232_v3  ;;  %v5278_v52 = vmax.f32 %v5230_v41, %v5254_v55  ;;  %v5279_v17 = vmax.f32 %v5231_v33, %v5255_v56  ;;  %5206 = vst [vmem:[#allocation2 + $0x111] sm:$0xff] %v5173_v49  ;;  %v6748_v24 = vpop.f32.mrb[24].mxu0  ;;  %v5234_v4 = vld [vmem:[#allocation2 + $0x100] sm:$0x3] }
 0x21a   : > { %v6824_v37 = vadd.f32 %v8897_v22, %v2955_v43  ;;  %v6819_v54 = vadd.f32 %v6818_v16, %v6748_v24  ;;  %v5089_v8 = vpop.f32.mrb[25].mxu0  ;;  %5427 = vst [vmem:[%s8930_s11 + $0x10] sm:$0xff] %v5419_v46 }
 0x21b   : > { %5350 = vst [vmem:[#allocation3 + $0x60] sm:$0xff] %v5326_v7  ;;  %v5327_v36 = vmax.f32 %v5278_v52, %v5233_v62  ;;  %v5328_v34 = vmax.f32 %v5279_v17, %v5304_v9  ;;  %v6821_v2 = vadd.f32 %v6820_v39, %v5089_v8  ;;  %v6749_v32 = vpop.f32.mrb[26].mxu0 }
 0x21c   : > { %v5178_v31 = vmax.f32 %v6819_v54, 0.0  ;;  %v6823_v6 = vadd.f32 %v6822_v38, %v6749_v32  ;;  %v5092_v21 = vpop.f32.mrb[27].mxu0  ;;  %v5368_v40 = vld [vmem:[#allocation3 + $0x48] ss:$2 sm:$0xff]  ;;  %v5384_v29 = vld [vmem:[#allocation3 + $0x49] ss:$2 sm:$0xff] }
 0x21d   : > { %5351 = vst [vmem:[#allocation3 + $0x68] sm:$0xff] %v5327_v36  ;;  %5352 = vst [vmem:[#allocation3 + $0x70] sm:$0x3] %v5328_v34  ;;  %v5176_v26 = vmax.f32 %v6821_v2, 0.0  ;;  %v6825_v0 = vadd.f32 %v6824_v37, %v5092_v21  ;;  %v5396_v18 = vmax.f32 %v5368_v40, %v5384_v29  ;;  %v5408_v19 = vld [vmem:[#allocation3 + $0x4a] ss:$2 sm:$0xff] }
 0x21e   : > { %v6560_v13 = vpop.f32.mrb[28].mxu1  ;;  %v5256_v20 = vld [vmem:[#allocation2 + $0x108] sm:$0xff]  ;;  %5211 = vst [vmem:[#allocation2 + $0x151] sm:$0xff] %v5178_v31  ;;  %v5179_v11 = vmax.f32 %v6823_v6, 0.0  ;;  %v5235_v23 = vld [vmem:[#allocation2 + $0x120] sm:$0xff] }
 0x21f   : > { %v2968_v45 = vpop.f32.mrb[29].mxu1  ;;  %v6826_v25 = vadd.f32 %v6560_v13, %v8897_v22  ;;  %v5280_v61 = vmax.f32 %v5232_v3, %v5256_v20  ;;  %5209 = vst [vmem:[#allocation2 + $0x139] sm:$0xff] %v5176_v26  ;;  %v5177_v1 = vmax.f32 %v6825_v0, 0.0  ;;  %v5420_v10 = vmax.f32 %v5396_v18, %v5408_v19  ;;  %v5236_v48 = vld [vmem:[#allocation2 + $0x128] sm:$0xff]  ;;  %v5307_v47 = vld [vmem:[#allocation2 + $0x130] sm:$0x3] }
 0x220   : > { %v6561_v63 = vpop.f32.mrb[30].mxu1  ;;  %v6828_v41 = vadd.f32 %v8897_v22, %v2968_v45  ;;  %v5257_v59 = vld [vmem:[#allocation2 + $0x110] sm:$0xff]  ;;  %v5258_v42 = vld [vmem:[#allocation2 + $0x118] sm:$0x3]  ;;  %5212 = vst [vmem:[#allocation2 + $0x159] sm:$0xff] %v5179_v11 }
 0x221   : > { %v6830_v44 = vadd.f32 %v6561_v63, %v8897_v22  ;;  %v2971_v28 = vpop.f32.mrb[31].mxu1  ;;  %v5329_v50 = vmax.f32 %v5280_v61, %v5235_v23  ;;  %v5281_v35 = vmax.f32 %v5233_v62, %v5257_v59  ;;  %v5282_v5 = vmax.f32 %v5234_v4, %v5258_v42  ;;  %5210 = vst [vmem:[#allocation2 + $0x141] sm:$0xff] %v5177_v1  ;;  %v6752_v58 = vpop.f32.mrb[28].mxu0  ;;  %v5237_v43 = vld [vmem:[#allocation2 + $0x130] sm:$0x3] }
 0x222   : > { %v6832_v57 = vadd.f32 %v8897_v22, %v2971_v28  ;;  %v6827_v51 = vadd.f32 %v6826_v25, %v6752_v58  ;;  %v5105_v53 = vpop.f32.mrb[29].mxu0  ;;  %5428 = vst [vmem:[%s8930_s11 + $0x18] sm:$0xff] %v5420_v10 }
 0x223   : > { %5353 = vst [vmem:[#allocation3 + $0x78] sm:$0xff] %v5329_v50  ;;  %v5330_v60 = vmax.f32 %v5281_v35, %v5236_v48  ;;  %v5331_v12 = vmax.f32 %v5282_v5, %v5307_v47  ;;  %v6829_v16 = vadd.f32 %v6828_v41, %v5105_v53  ;;  %v6753_v15 = vpop.f32.mrb[30].mxu0 }
 0x224   : > { %v5182_v14 = vmax.f32 %v6827_v51, 0.0  ;;  %v6831_v33 = vadd.f32 %v6830_v44, %v6753_v15  ;;  %v5108_v30 = vpop.f32.mrb[31].mxu0  ;;  %v5370_v49 = vld [vmem:[#allocation3 + $0x60] ss:$2 sm:$0xff]  ;;  %v5386_v39 = vld [vmem:[#allocation3 + $0x61] ss:$2 sm:$0xff] }
 0x225   : > { %5354 = vst [vmem:[#allocation3 + $0x80] sm:$0xff] %v5330_v60  ;;  %5355 = vst [vmem:[#allocation3 + $0x88] sm:$0x3] %v5331_v12  ;;  %v5180_v27 = vmax.f32 %v6829_v16, 0.0  ;;  %v6833_v3 = vadd.f32 %v6832_v57, %v5108_v30  ;;  %v5397_v22 = vmax.f32 %v5370_v49, %v5386_v39  ;;  %v5410_v38 = vld [vmem:[#allocation3 + $0x62] ss:$2 sm:$0xff] }
 0x226   : > { %v5259_v55 = vld [vmem:[#allocation2 + $0x138] sm:$0xff]  ;;  %5215 = vst [vmem:[#allocation2 + $0x181] sm:$0xff] %v5182_v14  ;;  %v5183_v56 = vmax.f32 %v6831_v33, 0.0  ;;  %v5238_v17 = vld [vmem:[#allocation2 + $0x150] sm:$0xff] }
 0x227   : > { %v5283_v46 = vmax.f32 %v5235_v23, %v5259_v55  ;;  %5213 = vst [vmem:[#allocation2 + $0x169] sm:$0xff] %v5180_v27  ;;  %v5181_v7 = vmax.f32 %v6833_v3, 0.0  ;;  %v5421_v52 = vmax.f32 %v5397_v22, %v5410_v38  ;;  %v5239_v8 = vld [vmem:[#allocation2 + $0x158] sm:$0xff]  ;;  %v5310_v36 = vld [vmem:[#allocation2 + $0x160] sm:$0x3] }
 0x228   : > { %v5260_v24 = vld [vmem:[#allocation2 + $0x140] sm:$0xff]  ;;  %v5261_v37 = vld [vmem:[#allocation2 + $0x148] sm:$0x3]  ;;  %5216 = vst [vmem:[#allocation2 + $0x189] sm:$0xff] %v5183_v56 }
 0x229   : > { %v5332_v62 = vmax.f32 %v5283_v46, %v5238_v17  ;;  %v5284_v9 = vmax.f32 %v5236_v48, %v5260_v24  ;;  %v5285_v54 = vmax.f32 %v5237_v43, %v5261_v37  ;;  %5214 = vst [vmem:[#allocation2 + $0x171] sm:$0xff] %v5181_v7  ;;  %5429 = vst [vmem:[%s8930_s11 + $0x20] sm:$0xff] %v5421_v52  ;;  %v5240_v40 = vld [vmem:[#allocation2 + $0x160] sm:$0x3] }
 0x22b   : > { %5356 = vst [vmem:[#allocation3 + $0x90] sm:$0xff] %v5332_v62  ;;  %v5333_v34 = vmax.f32 %v5284_v9, %v5239_v8  ;;  %v5334_v2 = vmax.f32 %v5285_v54, %v5310_v36 }
 0x22c   : > { %v5372_v32 = vld [vmem:[#allocation3 + $0x78] ss:$2 sm:$0xff]  ;;  %v5388_v31 = vld [vmem:[#allocation3 + $0x79] ss:$2 sm:$0xff] }
 0x22d   : > { %5357 = vst [vmem:[#allocation3 + $0x98] sm:$0xff] %v5333_v34  ;;  %5358 = vst [vmem:[#allocation3 + $0xa0] sm:$0x3] %v5334_v2  ;;  %v5398_v6 = vmax.f32 %v5372_v32, %v5388_v31  ;;  %v5412_v13 = vld [vmem:[#allocation3 + $0x7a] ss:$2 sm:$0xff]  ;;  %v5311_v45 = vld [vmem:[#allocation2 + $0x180] sm:$0xff] }
 0x22e   : > { %v5262_v21 = vld [vmem:[#allocation2 + $0x168] sm:$0xff] }
 0x22f   : > { %v5286_v26 = vmax.f32 %v5238_v17, %v5262_v21  ;;  %v5422_v0 = vmax.f32 %v5398_v6, %v5412_v13  ;;  %v5312_v18 = vld [vmem:[#allocation2 + $0x188] sm:$0xff]  ;;  %v5313_v4 = vld [vmem:[#allocation2 + $0x190] sm:$0x3] }
 0x230   : > { %v5263_v29 = vld [vmem:[#allocation2 + $0x170] sm:$0xff]  ;;  %v5264_v20 = vld [vmem:[#allocation2 + $0x178] sm:$0x3] }
 0x231   : > { %v5335_v11 = vmax.f32 %v5286_v26, %v5311_v45  ;;  %v5287_v25 = vmax.f32 %v5239_v8, %v5263_v29  ;;  %v5288_v63 = vmax.f32 %v5240_v40, %v5264_v20  ;;  %5430 = vst [vmem:[%s8930_s11 + $0x28] sm:$0xff] %v5422_v0 }
 0x233   : > { %5359 = vst [vmem:[#allocation3 + $0xa8] sm:$0xff] %v5335_v11  ;;  %v5336_v61 = vmax.f32 %v5287_v25, %v5312_v18  ;;  %v5337_v1 = vmax.f32 %v5288_v63, %v5313_v4 }
 0x234   : > { %v5374_v41 = vld [vmem:[#allocation3 + $0x90] ss:$2 sm:$0xff]  ;;  %v5390_v19 = vld [vmem:[#allocation3 + $0x91] ss:$2 sm:$0xff] }
 0x235   : > { %5360 = vst [vmem:[#allocation3 + $0xb0] sm:$0xff] %v5336_v61  ;;  %5361 = vst [vmem:[#allocation3 + $0xb8] sm:$0x3] %v5337_v1  ;;  %v5399_v23 = vmax.f32 %v5374_v41, %v5390_v19  ;;  %v5414_v59 = vld [vmem:[#allocation3 + $0x92] ss:$2 sm:$0xff] }
 0x237   : > { %v5423_v42 = vmax.f32 %v5399_v23, %v5414_v59 }
 0x239   : > { %5431 = vst [vmem:[%s8930_s11 + $0x30] sm:$0xff] %v5423_v42 }
 0x23c   : > { %v5376_v44 = vld [vmem:[#allocation3 + $0xa8] ss:$2 sm:$0xff]  ;;  %v5392_v28 = vld [vmem:[#allocation3 + $0xa9] ss:$2 sm:$0xff] }
 0x23d   : > { %v5400_v10 = vmax.f32 %v5376_v44, %v5392_v28  ;;  %v5416_v50 = vld [vmem:[#allocation3 + $0xaa] ss:$2 sm:$0xff] }
 0x23f   : > { %v5424_v35 = vmax.f32 %v5400_v10, %v5416_v50 }
 0x241   : > { %5432 = vst [vmem:[%s8930_s11 + $0x38] sm:$0xff] %v5424_v35 }
 0x242   : > { %7264 = shalt.err (!%p7261_p3)
}
 0x243   : > { %s7265_s4 = scalar_lea.hbm %s8956_s25, 1024  ;;  %s7269_s7 = scalar_lea.hbm %s9007_s3, 2048 }
 0x244   : > { %p7266_p4 = scmp.ne.s32.totalorder %s8956_s25, %s7265_s4  ;;  %p7270_p9 = scmp.lt.u32.totalorder %s8956_s25, %s9007_s3 }
 0x245   : > { %p7271_p10 = scmp.lt.u32.totalorder %s7269_s7, %s7265_s4  ;;  %p7273_p12 = scmp.lt.u32.totalorder %s7265_s4, %s8956_s25 }
 0x246   : > { %p7267_p7 = pnand %p7266_p4, %p7377_p5 }
 0x247   : > { %p7272_p11 = por %p7271_p10, %p7270_p9 }
 0x248   : > { %p7268_p8 = pneg %p7267_p7 }
 0x249   : > { %p7274_p13 = por %p7273_p12, %p7272_p11 }
 0x24b   : > { %p7275_p0 = pnand %p7274_p13, %p7268_p8 }
 0x24d   : > { %7278 = shalt.err (!%p7275_p0)
}
 0x24e   : > { %s7317_s9 = smov 128   ;;  %s7318_s10 = smov 8  }
 0x24f   : > { %7059 = dma.vmem_to_hbm [thread:$0]  (%p7377_p5), %s8958_s19, 1024, %s8956_s25, %s8963_s26, %s7317_s9, %s7317_s9, %s7318_s10  }
 0x250 PF: > { %p7065_p1 = scmp.ge.s32.totalorder %s7313_s15, 2  ;;  %s5462_s11 = sand.u32 1, %s7301_s12  }
 0x251   : > { %s5463_s17 = scalar_lea.sflag [#allocation5], %s5462_s11 }
 0x252   : > { %p7062_p2 = pnand %p7065_p1, %p7381_p6 }
 0x254   : > { %7296 = dma.done.wait (!%p7062_p2), %s5463_s17, 1024  }
 0x255   : > { %7298 = vsyncadd (!%p7062_p2), %s5463_s17, 4294966272  ;;  %p13_p3 = scmp.ge.s32.totalorder %s7364_s18, 4   ;;  %s9014_s12 = smov %s7305_s13 }
 0x256   : > { %s9015_s13 = smov %s7309_s14  ;;  %s9016_s14 = smov %s7375_s21 }
 0x257   : > { %s9017_s15 = smov %s7364_s18  ;;  %15 = sbr.rel (!%p13_p3) target bundleno = 3 (0x3), region = 102 }
 0x25e   :  { %5468 = vsyncpa [#allocation5], 1 }
 0x25f   :  { %5470 = vsyncpa [#allocation5 + $0x1], 1 }

</bundles_post_ra>
